<compile_context>
chip_gen: v5e
topology: v5e:2x2
jax: 0.10.0
libtpu: 0.0.40
codegen_flags: <defaults>
</compile_context>

<pallas_src>
import math

import jax
import jax.numpy as jnp
from jax import lax
from jax.experimental import pallas as pl
from jax.experimental.pallas import tpu as pltpu


# -----------------------------------------------------------------------------
# Fused kernel: all bidirectional LSTM layers + FC head in one pallas_call
# -----------------------------------------------------------------------------
def _make_generator_kernel(T, H, num_layers, D0):
    G2 = 8 * H  # fused gate width (4 gates x 2 directions)

    def kernel(*refs):
        idx = 0
        x_ref = refs[idx]; idx += 1
        wih_refs, whh_refs, b_refs = [], [], []
        for _ in range(num_layers):
            wih_refs.append(refs[idx])
            whh_refs.append(refs[idx + 1])
            b_refs.append(refs[idx + 2])
            idx += 3
        actc_ref = refs[idx]; h0_ref = refs[idx + 1]; c0_ref = refs[idx + 2]
        wfc_ref = refs[idx + 3]; bfc_ref = refs[idx + 4]; idx += 5
        y_ref, hN_ref, cN_ref = refs[idx], refs[idx + 1], refs[idx + 2]; idx += 3
        xp_scr, act_scr = refs[idx], refs[idx + 1]

        B = x_ref.shape[1]

        # Hoisted per-gate activation constants and the fwd/bwd column select mask
        # (emitted once for the whole kernel, not per step / per layer).
        gmul = jnp.broadcast_to(actc_ref[0:1, :], (B, G2))
        gadd = jnp.broadcast_to(actc_ref[1:2, :], (B, G2))
        col = lax.broadcasted_iota(jnp.int32, (B, G2), 1)
        fwd_mask = (col % (2 * H)) < H          # True -> column belongs to fwd dir

        for l in range(num_layers):
            # ---- hoisted input projection + combined bias for the whole sequence:
            # one big MXU matmul instead of T tiny ones.
            if l == 0:
                xin = x_ref[...].reshape(T * B, D0)
            else:
                xin = act_scr[...].reshape(T * B, 2 * H)
            xp = jnp.dot(xin, wih_refs[l][...],
                         preferred_element_type=jnp.float32) + b_refs[l][...]
            xp_scr[...] = xp.reshape(T, B, G2)

            whh = whh_refs[l][...]              # (2H, 8H) block-diagonal recurrent W

            def step(s, carry, whh=whh):
                h, c = carry                    # (B, 2H) each, vreg-resident
                tb = T - 1 - s                  # backward direction walks reversed time
                # one (B, 2H) @ (2H, 8H) MXU matmul covers both directions' gates
                hproj = jnp.dot(h, whh, preferred_element_type=jnp.float32)
                # one vsel picks x-projection rows per direction (no per-gate concat)
                z = jnp.where(fwd_mask, xp_scr[s], xp_scr[tb]) + hproj
                # all gates in ONE EUP tanh pass (sigmoid via 0.5*tanh(0.5 z)+0.5;
                # 0.5 pre-scale already folded into weights/bias at pack time)
                a = jnp.tanh(z) * gmul + gadd
                i_g = a[:, 0 * H:2 * H]         # contiguous [fwd | bwd] 2H slices
                f_g = a[:, 2 * H:4 * H]
                g_g = a[:, 4 * H:6 * H]
                o_g = a[:, 6 * H:8 * H]
                c_new = f_g * c + i_g * g_g
                h_new = o_g * jnp.tanh(c_new)
                # merged output buffer: fwd half at time s, bwd half at time T-1-s
                act_scr[s, :, 0:H] = h_new[:, 0:H]
                act_scr[tb, :, H:2 * H] = h_new[:, H:2 * H]
                return (h_new, c_new)

            # unrolled: cross-step MXU/EUP/VPU overlap; h/c stay in vregs
            h_fin, c_fin = lax.fori_loop(0, T, step,
                                         (h0_ref[l], c0_ref[l]), unroll=True)
            hN_ref[l] = h_fin
            cN_ref[l] = c_fin

        # ---- fused Linear head: one (T*B, 2H) @ (2H, 128) matmul, lane-dense store.
        y = jnp.dot(act_scr[...].reshape(T * B, 2 * H), wfc_ref[...],
                    preferred_element_type=jnp.float32) + bfc_ref[...]
        y_ref[...] = y.reshape(T, B, y_ref.shape[-1])

    return kernel


# -----------------------------------------------------------------------------
# Generator forward (glue in plain JAX, hot path in one Pallas launch)
# -----------------------------------------------------------------------------
def generator_forward(noise, condition, params, h0, c0, output_dim):
    H = h0.shape[-1]
    L = len(params["layers"])

    # x = torch.cat([noise, condition], dim=2)
    x = jnp.concatenate([noise, condition], axis=2)            # (B, T, D0)
    B, T, D0 = x.shape

    # pad batch to a full sublane tile (8) so vregs / MXU rows are fully used
    BP = ((B + 7) // 8) * 8
    x_tm = jnp.transpose(x, (1, 0, 2))                         # (T, B, D0) time-major
    if BP != B:
        pad = BP - B
        x_tm = jnp.pad(x_tm, ((0, 0), (0, pad), (0, 0)))
        h0 = jnp.pad(h0, ((0, 0), (0, pad), (0, 0)))
        c0 = jnp.pad(c0, ((0, 0), (0, pad), (0, 0)))

    # initial states per layer as [fwd | bwd]  -> (L, BP, 2H)
    h0_cat = jnp.concatenate([h0[0::2], h0[1::2]], axis=-1)
    c0_cat = jnp.concatenate([c0[0::2], c0[1::2]], axis=-1)

    OP = params["fc"]["w"].shape[1]                            # 128-padded FC width
    kernel = _make_generator_kernel(T, H, L, D0)

    in_arrays = [x_tm]
    for lp in params["layers"]:
        in_arrays += [lp["wih"], lp["whh"], lp["b"]]
    in_arrays += [params["actc"], h0_cat, c0_cat,
                  params["fc"]["w"], params["fc"]["b"]]

    def full_spec(shape):
        rank = len(shape)
        return pl.BlockSpec(tuple(shape), lambda i, _r=rank: (0,) * _r)

    out_shape = (jax.ShapeDtypeStruct((T, BP, OP), jnp.float32),
                 jax.ShapeDtypeStruct((L, BP, 2 * H), jnp.float32),
                 jax.ShapeDtypeStruct((L, BP, 2 * H), jnp.float32))

    y_full, hN, cN = pl.pallas_call(
        kernel,
        out_shape=out_shape,
        grid=(1,),
        in_specs=[full_spec(a.shape) for a in in_arrays],
        out_specs=tuple(full_spec(s.shape) for s in out_shape),
        scratch_shapes=[
            pltpu.VMEM((T, BP, 8 * H), jnp.float32),   # hoisted input projection
            pltpu.VMEM((T, BP, 2 * H), jnp.float32),   # inter-layer activations [f|b]
        ],
        compiler_params=pltpu.CompilerParams(
            dimension_semantics=("arbitrary",)),
    )(*in_arrays)

    y = jnp.transpose(y_full[:, :B, :output_dim], (1, 0, 2))   # (B, T, O) batch_first
    hidden = jnp.transpose(hN[:, :B].reshape(L, B, 2, H),
                           (0, 2, 1, 3)).reshape(2 * L, B, H)
    cell = jnp.transpose(cN[:, :B].reshape(L, B, 2, H),
                         (0, 2, 1, 3)).reshape(2 * L, B, H)
    return y, hidden, cell


# -----------------------------------------------------------------------------
# Parameter init (PyTorch-style raw weights) + packing for the fused kernel
# -----------------------------------------------------------------------------
def init_params(key, input_dim, hidden_dim, output_dim, num_layers):
    H = hidden_dim
    raw = {"layers": []}
    for l in range(num_layers):
        D = input_dim if l == 0 else 2 * H
        dirs = []
        for _ in range(2):  # forward, reverse
            key, k1, k2, k3, k4 = jax.random.split(key, 5)
            s = 1.0 / math.sqrt(H)
            dirs.append({
                "wih": jax.random.uniform(k1, (4 * H, D), jnp.float32, -s, s),
                "whh": jax.random.uniform(k2, (4 * H, H), jnp.float32, -s, s),
                "bih": jax.random.uniform(k3, (4 * H,), jnp.float32, -s, s),
                "bhh": jax.random.uniform(k4, (4 * H,), jnp.float32, -s, s),
            })
        raw["layers"].append(tuple(dirs))
    key, kw, kb = jax.random.split(key, 3)
    s = 1.0 / math.sqrt(2 * H)
    raw["fc"] = {"w": jax.random.uniform(kw, (output_dim, 2 * H), jnp.float32, -s, s),
                 "b": jax.random.uniform(kb, (output_dim,), jnp.float32, -s, s)}
    return raw


def pack_params(raw, hidden_dim, output_dim):
    """Pre-transpose / fuse / reorder weights for the fused kernel.

    Gate column layout: [i_f i_b | f_f f_b | g_f g_b | o_f o_b]  (2H lanes per gate,
    fwd and bwd halves contiguous).  sigmoid(z) = 0.5*tanh(0.5 z)+0.5, so the 0.5
    pre-scale of the i/f/o columns is folded into weights + bias; the kernel applies
    only tanh, a per-gate mul and a per-gate add.  FC output is zero-padded to 128.
    """
    H = hidden_dim
    L = len(raw["layers"])

    def per_gate_const(vals):
        return jnp.concatenate([jnp.full((2 * H,), v, jnp.float32) for v in vals])

    gscale = per_gate_const([0.5, 0.5, 1.0, 0.5])   # i, f, g, o
    goff = per_gate_const([0.5, 0.5, 0.0, 0.5])
    actc = jnp.stack([gscale, goff])                # (2, 8H)

    def interleave_cols(wf_t, wb_t):
        # wf_t/wb_t: (D, 4H), PyTorch gate order [i,f,g,o]
        #  -> (D, 8H) layout [i_f i_b | f_f f_b | g_f g_b | o_f o_b]
        blocks = []
        for k in range(4):
            blocks.append(wf_t[:, k * H:(k + 1) * H])
            blocks.append(wb_t[:, k * H:(k + 1) * H])
        return jnp.concatenate(blocks, axis=1)

    layers = []
    for l in range(L):
        pf, pb = raw["layers"][l]
        wih = interleave_cols(pf["wih"].T, pb["wih"].T) * gscale[None, :]      # (D, 8H)
        whh_f, whh_b = pf["whh"].T, pb["whh"].T                                # (H, 4H)
        whh = jnp.zeros((2 * H, 8 * H), jnp.float32)
        for k in range(4):
            whh = whh.at[:H, 2 * H * k:2 * H * k + H].set(whh_f[:, k * H:(k + 1) * H])
            whh = whh.at[H:, 2 * H * k + H:2 * H * (k + 1)].set(whh_b[:, k * H:(k + 1) * H])
        whh = whh * gscale[None, :]                                            # (2H, 8H)
        bf = (pf["bih"] + pf["bhh"])[None, :]
        bb = (pb["bih"] + pb["bhh"])[None, :]
        b = interleave_cols(bf, bb) * gscale[None, :]                          # (1, 8H)
        layers.append({"wih": wih, "whh": whh, "b": b})

    O = output_dim
    OP = ((O + 127) // 128) * 128
    wfc = jnp.zeros((2 * H, OP), jnp.float32).at[:, :O].set(raw["fc"]["w"].T)
    bfc = jnp.zeros((1, OP), jnp.float32).at[:, :O].set(raw["fc"]["b"][None, :])
    return {"layers": layers, "actc": actc, "fc": {"w": wfc, "b": bfc}}


# -----------------------------------------------------------------------------
# Pure-JAX reference (PyTorch eval-mode semantics) for correctness checking
# -----------------------------------------------------------------------------
def reference_forward(noise, condition, raw, h0, c0):
    H = h0.shape[-1]
    num_layers = len(raw["layers"])
    x = jnp.concatenate([noise, condition], axis=2)            # (B, T, D)

    def cell(h, c, x_t, p):
        z = x_t @ p["wih"].T + h @ p["whh"].T + p["bih"] + p["bhh"]
        i = jax.nn.sigmoid(z[:, 0:H])
        f = jax.nn.sigmoid(z[:, H:2 * H])
        g = jnp.tanh(z[:, 2 * H:3 * H])
        o = jax.nn.sigmoid(z[:, 3 * H:4 * H])
        c = f * c + i * g
        h = o * jnp.tanh(c)
        return h, c

    layer_in = jnp.transpose(x, (1, 0, 2))                     # (T, B, D)
    hs, cs = [], []
    for l in range(num_layers):
        pf, pb = raw["layers"][l]

        def scan_fwd(carry, x_t, p=pf):
            h, c = cell(carry[0], carry[1], x_t, p)
            return (h, c), h

        def scan_bwd(carry, x_t, p=pb):
            h, c = cell(carry[0], carry[1], x_t, p)
            return (h, c), h

        (hf, cf), out_f = lax.scan(scan_fwd, (h0[2 * l], c0[2 * l]), layer_in)
        (hb, cb), out_b_rev = lax.scan(scan_bwd, (h0[2 * l + 1], c0[2 * l + 1]),
                                       layer_in[::-1])
        out_b = out_b_rev[::-1]
        layer_in = jnp.concatenate([out_f, out_b], axis=-1)    # (T, B, 2H)
        hs += [hf, hb]
        cs += [cf, cb]

    y_tm = layer_in @ raw["fc"]["w"].T + raw["fc"]["b"]        # (T, B, O)
    return jnp.transpose(y_tm, (1, 0, 2)), jnp.stack(hs), jnp.stack(cs)


# -----------------------------------------------------------------------------
if __name__ == "__main__":
    key = jax.random.PRNGKey(0)
    B, T = 2, 8
    noise_dim, cond_dim = 16, 16
    input_dim = noise_dim + cond_dim
    hidden_dim, output_dim, num_layers = 32, 8, 2

    k_noise, k_cond, k_h, k_c, k_param = jax.random.split(key, 5)
    noise = jax.random.normal(k_noise, (B, T, noise_dim), jnp.float32)
    condition = jax.random.normal(k_cond, (B, T, cond_dim), jnp.float32)
    # deterministic stand-in for torch.randn init_hidden
    h0 = jax.random.normal(k_h, (num_layers * 2, B, hidden_dim), jnp.float32)
    c0 = jax.random.normal(k_c, (num_layers * 2, B, hidden_dim), jnp.float32)

    raw = init_params(k_param, input_dim, hidden_dim, output_dim, num_layers)
    packed = pack_params(raw, hidden_dim, output_dim)

    fwd = jax.jit(generator_forward, static_argnames=("output_dim",))
    y, h_n, c_n = fwd(noise, condition, packed, h0, c0, output_dim=output_dim)
    jax.block_until_ready((y, h_n, c_n))

    assert y.shape == (B, T, output_dim)
    assert h_n.shape == (num_layers * 2, B, hidden_dim)
    assert c_n.shape == (num_layers * 2, B, hidden_dim)
    assert jnp.all(jnp.isfinite(y)) and jnp.all(jnp.isfinite(h_n)) and jnp.all(jnp.isfinite(c_n))

    # numerical check against a pure-JAX reference of the PyTorch eval forward
    y_ref, h_ref, c_ref = reference_forward(noise, condition, raw, h0, c0)
    assert jnp.allclose(y, y_ref, atol=2e-4, rtol=2e-4)
    assert jnp.allclose(h_n, h_ref, atol=2e-4, rtol=2e-4)
    assert jnp.allclose(c_n, c_ref, atol=2e-4, rtol=2e-4)

    print("KERNEL_OK")
</pallas_src>

<mosaic_0001>
module attributes {stable_mosaic.version = 11 : i64} {
  func.func @kernel(%arg0: i32, %arg1: memref<8x8x32xf32, #tpu.memory_space<vmem>>, %arg2: memref<32x256xf32, #tpu.memory_space<vmem>>, %arg3: memref<64x256xf32, #tpu.memory_space<vmem>>, %arg4: memref<1x256xf32, #tpu.memory_space<vmem>>, %arg5: memref<64x256xf32, #tpu.memory_space<vmem>>, %arg6: memref<64x256xf32, #tpu.memory_space<vmem>>, %arg7: memref<1x256xf32, #tpu.memory_space<vmem>>, %arg8: memref<2x256xf32, #tpu.memory_space<vmem>>, %arg9: memref<2x8x64xf32, #tpu.memory_space<vmem>>, %arg10: memref<2x8x64xf32, #tpu.memory_space<vmem>>, %arg11: memref<64x128xf32, #tpu.memory_space<vmem>>, %arg12: memref<1x128xf32, #tpu.memory_space<vmem>>, %arg13: memref<8x8x128xf32, #tpu.memory_space<vmem>>, %arg14: memref<2x8x64xf32, #tpu.memory_space<vmem>>, %arg15: memref<2x8x64xf32, #tpu.memory_space<vmem>>, %arg16: memref<8x8x256xf32, #tpu.memory_space<vmem>>, %arg17: memref<8x8x64xf32, #tpu.memory_space<vmem>>) attributes {dimension_semantics = [#tpu.dimension_semantics<arbitrary>], iteration_bounds = array<i64: 1>, scalar_prefetch = 0 : i64, scratch_operands = 2 : i64, tpu.core_type = #tpu.core_type<tc>, window_params = [{pipeline_mode = #tpu.pipeline_mode<synchronous>, transform_indices = @transform_0, window_bounds = array<i64: 8, 8, 32>}, {pipeline_mode = #tpu.pipeline_mode<synchronous>, transform_indices = @transform_1, window_bounds = array<i64: 32, 256>}, {pipeline_mode = #tpu.pipeline_mode<synchronous>, transform_indices = @transform_2, window_bounds = array<i64: 64, 256>}, {pipeline_mode = #tpu.pipeline_mode<synchronous>, transform_indices = @transform_3, window_bounds = array<i64: 1, 256>}, {pipeline_mode = #tpu.pipeline_mode<synchronous>, transform_indices = @transform_4, window_bounds = array<i64: 64, 256>}, {pipeline_mode = #tpu.pipeline_mode<synchronous>, transform_indices = @transform_5, window_bounds = array<i64: 64, 256>}, {pipeline_mode = #tpu.pipeline_mode<synchronous>, transform_indices = @transform_6, window_bounds = array<i64: 1, 256>}, {pipeline_mode = #tpu.pipeline_mode<synchronous>, transform_indices = @transform_7, window_bounds = array<i64: 2, 256>}, {pipeline_mode = #tpu.pipeline_mode<synchronous>, transform_indices = @transform_8, window_bounds = array<i64: 2, 8, 64>}, {pipeline_mode = #tpu.pipeline_mode<synchronous>, transform_indices = @transform_9, window_bounds = array<i64: 2, 8, 64>}, {pipeline_mode = #tpu.pipeline_mode<synchronous>, transform_indices = @transform_10, window_bounds = array<i64: 64, 128>}, {pipeline_mode = #tpu.pipeline_mode<synchronous>, transform_indices = @transform_11, window_bounds = array<i64: 1, 128>}, {pipeline_mode = #tpu.pipeline_mode<synchronous>, transform_indices = @transform_12, window_bounds = array<i64: 8, 8, 128>}, {pipeline_mode = #tpu.pipeline_mode<synchronous>, transform_indices = @transform_13, window_bounds = array<i64: 2, 8, 64>}, {pipeline_mode = #tpu.pipeline_mode<synchronous>, transform_indices = @transform_14, window_bounds = array<i64: 2, 8, 64>}]} {
    %c0 = arith.constant 0 : index
    %c0_0 = arith.constant 0 : index
    %0 = vector.load %arg8[%c0, %c0_0] : memref<2x256xf32, #tpu.memory_space<vmem>>, vector<1x256xf32>
    %1 = vector.shape_cast %0 : vector<1x256xf32> to vector<1x256xf32>
    %2 = vector.broadcast %1 : vector<1x256xf32> to vector<8x256xf32>
    %c1 = arith.constant 1 : index
    %c0_1 = arith.constant 0 : index
    %3 = vector.load %arg8[%c1, %c0_1] : memref<2x256xf32, #tpu.memory_space<vmem>>, vector<1x256xf32>
    %4 = vector.shape_cast %3 : vector<1x256xf32> to vector<1x256xf32>
    %5 = vector.broadcast %4 : vector<1x256xf32> to vector<8x256xf32>
    %6 = tpu.iota {dimensions = array<i32: 1>} : vector<8x256xi32>
    %c64_i32 = arith.constant 64 : i32
    %c0_i32 = arith.constant 0 : i32
    %7 = arith.cmpi eq, %c64_i32, %c0_i32 : i32
    %c1_i32 = arith.constant 1 : i32
    %8 = arith.select %7, %c1_i32, %c64_i32 : i32
    %9 = vector.broadcast %8 : i32 to vector<8x256xi32>
    %10 = arith.remsi %6, %9 : vector<8x256xi32>
    %c0_i32_2 = arith.constant 0 : i32
    %11 = vector.broadcast %c0_i32_2 : i32 to vector<8x256xi32>
    %12 = arith.cmpi ne, %10, %11 : vector<8x256xi32>
    %c0_i32_3 = arith.constant 0 : i32
    %13 = vector.broadcast %c0_i32_3 : i32 to vector<8x256xi32>
    %14 = arith.cmpi slt, %10, %13 : vector<8x256xi32>
    %c0_i32_4 = arith.constant 0 : i32
    %15 = arith.cmpi slt, %8, %c0_i32_4 : i32
    %16 = vector.broadcast %15 : i1 to vector<8x256xi1>
    %17 = vector.broadcast %16 : vector<8x256xi1> to vector<8x256xi1>
    %18 = arith.xori %14, %17 : vector<8x256xi1>
    %19 = arith.andi %18, %12 : vector<8x256xi1>
    %20 = vector.broadcast %8 : i32 to vector<8x256xi32>
    %21 = arith.addi %10, %20 : vector<8x256xi32>
    %22 = arith.select %19, %21, %10 : vector<8x256xi1>, vector<8x256xi32>
    %c32_i32 = arith.constant 32 : i32
    %23 = vector.broadcast %c32_i32 : i32 to vector<8x256xi32>
    %24 = arith.cmpi slt, %22, %23 : vector<8x256xi32>
    %c0_5 = arith.constant 0 : index
    %c0_6 = arith.constant 0 : index
    %c0_7 = arith.constant 0 : index
    %25 = vector.load %arg1[%c0_5, %c0_6, %c0_7] : memref<8x8x32xf32, #tpu.memory_space<vmem>>, vector<8x8x32xf32>
    %26 = vector.shape_cast %25 : vector<8x8x32xf32> to vector<64x32xf32>
    %c0_8 = arith.constant 0 : index
    %c0_9 = arith.constant 0 : index
    %27 = vector.load %arg2[%c0_8, %c0_9] : memref<32x256xf32, #tpu.memory_space<vmem>>, vector<32x256xf32>
    %cst = arith.constant dense<0.000000e+00> : vector<64x256xf32>
    %28 = tpu.matmul %26, %27, %cst {dimension_numbers = #tpu.dot_dimension_numbers<[1], [0], [0], [1], [0, 0, 1, 1], [], []>} : vector<64x32xf32>, vector<32x256xf32>, vector<64x256xf32> -> vector<64x256xf32>
    %c0_10 = arith.constant 0 : index
    %c0_11 = arith.constant 0 : index
    %29 = vector.load %arg4[%c0_10, %c0_11] : memref<1x256xf32, #tpu.memory_space<vmem>>, vector<1x256xf32>
    %30 = vector.broadcast %29 : vector<1x256xf32> to vector<64x256xf32>
    %31 = arith.addf %28, %30 : vector<64x256xf32>
    %32 = vector.shape_cast %31 : vector<64x256xf32> to vector<8x8x256xf32>
    %c0_12 = arith.constant 0 : index
    %c0_13 = arith.constant 0 : index
    %c0_14 = arith.constant 0 : index
    %33 = vector.load %arg16[%c0_12, %c0_13, %c0_14] : memref<8x8x256xf32, #tpu.memory_space<vmem>>, vector<8x8x256xf32>
    tpu.vector_store %arg16[%c0_12, %c0_13, %c0_14], %32 {strides = array<i32>} : memref<8x8x256xf32, #tpu.memory_space<vmem>>, vector<8x8x256xf32>,
    %c0_15 = arith.constant 0 : index
    %c0_16 = arith.constant 0 : index
    %34 = vector.load %arg3[%c0_15, %c0_16] : memref<64x256xf32, #tpu.memory_space<vmem>>, vector<64x256xf32>
    %c0_17 = arith.constant 0 : index
    %c0_18 = arith.constant 0 : index
    %c0_19 = arith.constant 0 : index
    %35 = vector.load %arg9[%c0_17, %c0_18, %c0_19] : memref<2x8x64xf32, #tpu.memory_space<vmem>>, vector<1x8x64xf32>
    %36 = vector.shape_cast %35 : vector<1x8x64xf32> to vector<8x64xf32>
    %c0_20 = arith.constant 0 : index
    %c0_21 = arith.constant 0 : index
    %c0_22 = arith.constant 0 : index
    %37 = vector.load %arg10[%c0_20, %c0_21, %c0_22] : memref<2x8x64xf32, #tpu.memory_space<vmem>>, vector<1x8x64xf32>
    %38 = vector.shape_cast %37 : vector<1x8x64xf32> to vector<8x64xf32>
    %c0_i32_23 = arith.constant 0 : i32
    %c7_i32 = arith.constant 7 : i32
    %39 = arith.subi %c7_i32, %c0_i32_23 : i32
    %cst_24 = arith.constant dense<0.000000e+00> : vector<8x256xf32>
    %40 = tpu.matmul %36, %34, %cst_24 {dimension_numbers = #tpu.dot_dimension_numbers<[1], [0], [0], [1], [0, 0, 1, 1], [], []>} : vector<8x64xf32>, vector<64x256xf32>, vector<8x256xf32> -> vector<8x256xf32>
    %41 = arith.index_cast %c0_i32_23 : i32 to index
    %c0_25 = arith.constant 0 : index
    %c0_26 = arith.constant 0 : index
    %42 = vector.load %arg16[%41, %c0_25, %c0_26] : memref<8x8x256xf32, #tpu.memory_space<vmem>>, vector<1x8x256xf32>
    %43 = vector.shape_cast %42 : vector<1x8x256xf32> to vector<8x256xf32>
    %44 = arith.index_cast %39 : i32 to index
    %c0_27 = arith.constant 0 : index
    %c0_28 = arith.constant 0 : index
    %45 = vector.load %arg16[%44, %c0_27, %c0_28] : memref<8x8x256xf32, #tpu.memory_space<vmem>>, vector<1x8x256xf32>
    %46 = vector.shape_cast %45 : vector<1x8x256xf32> to vector<8x256xf32>
    %47 = arith.select %24, %43, %46 : vector<8x256xi1>, vector<8x256xf32>
    %48 = arith.addf %47, %40 : vector<8x256xf32>
    %49 = math.tanh %48 : vector<8x256xf32>
    %50 = arith.mulf %49, %2 : vector<8x256xf32>
    %51 = arith.addf %50, %5 : vector<8x256xf32>
    %52 = vector.extract_strided_slice %51 {offsets = [0, 0], sizes = [8, 64], strides = [1, 1]} : vector<8x256xf32> to vector<8x64xf32>
    %53 = vector.extract_strided_slice %51 {offsets = [0, 64], sizes = [8, 64], strides = [1, 1]} : vector<8x256xf32> to vector<8x64xf32>
    %54 = vector.extract_strided_slice %51 {offsets = [0, 128], sizes = [8, 64], strides = [1, 1]} : vector<8x256xf32> to vector<8x64xf32>
    %55 = vector.extract_strided_slice %51 {offsets = [0, 192], sizes = [8, 64], strides = [1, 1]} : vector<8x256xf32> to vector<8x64xf32>
    %56 = arith.mulf %53, %38 : vector<8x64xf32>
    %57 = arith.mulf %52, %54 : vector<8x64xf32>
    %58 = arith.addf %56, %57 : vector<8x64xf32>
    %59 = math.tanh %58 : vector<8x64xf32>
    %60 = arith.mulf %55, %59 : vector<8x64xf32>
    %61 = vector.extract_strided_slice %60 {offsets = [0, 0], sizes = [8, 32], strides = [1, 1]} : vector<8x64xf32> to vector<8x32xf32>
    %62 = arith.index_cast %c0_i32_23 : i32 to index
    %c0_29 = arith.constant 0 : index
    %c0_30 = arith.constant 0 : index
    %63 = vector.load %arg17[%62, %c0_29, %c0_30] : memref<8x8x64xf32, #tpu.memory_space<vmem>>, vector<1x8x32xf32>
    %64 = vector.shape_cast %63 : vector<1x8x32xf32> to vector<8x32xf32>
    %65 = vector.shape_cast %61 : vector<8x32xf32> to vector<1x8x32xf32>
    tpu.vector_store %arg17[%62, %c0_29, %c0_30], %65 {strides = array<i32>} : memref<8x8x64xf32, #tpu.memory_space<vmem>>, vector<1x8x32xf32>,
    %66 = vector.extract_strided_slice %60 {offsets = [0, 32], sizes = [8, 32], strides = [1, 1]} : vector<8x64xf32> to vector<8x32xf32>
    %67 = arith.index_cast %39 : i32 to index
    %c0_31 = arith.constant 0 : index
    %c32 = arith.constant 32 : index
    %68 = vector.load %arg17[%67, %c0_31, %c32] : memref<8x8x64xf32, #tpu.memory_space<vmem>>, vector<1x8x32xf32>
    %69 = vector.shape_cast %68 : vector<1x8x32xf32> to vector<8x32xf32>
    %70 = vector.shape_cast %66 : vector<8x32xf32> to vector<1x8x32xf32>
    tpu.vector_store %arg17[%67, %c0_31, %c32], %70 {strides = array<i32>} : memref<8x8x64xf32, #tpu.memory_space<vmem>>, vector<1x8x32xf32>,
    %c1_i32_32 = arith.constant 1 : i32
    %c7_i32_33 = arith.constant 7 : i32
    %71 = arith.subi %c7_i32_33, %c1_i32_32 : i32
    %cst_34 = arith.constant dense<0.000000e+00> : vector<8x256xf32>
    %72 = tpu.matmul %60, %34, %cst_34 {dimension_numbers = #tpu.dot_dimension_numbers<[1], [0], [0], [1], [0, 0, 1, 1], [], []>} : vector<8x64xf32>, vector<64x256xf32>, vector<8x256xf32> -> vector<8x256xf32>
    %73 = arith.index_cast %c1_i32_32 : i32 to index
    %c0_35 = arith.constant 0 : index
    %c0_36 = arith.constant 0 : index
    %74 = vector.load %arg16[%73, %c0_35, %c0_36] : memref<8x8x256xf32, #tpu.memory_space<vmem>>, vector<1x8x256xf32>
    %75 = vector.shape_cast %74 : vector<1x8x256xf32> to vector<8x256xf32>
    %76 = arith.index_cast %71 : i32 to index
    %c0_37 = arith.constant 0 : index
    %c0_38 = arith.constant 0 : index
    %77 = vector.load %arg16[%76, %c0_37, %c0_38] : memref<8x8x256xf32, #tpu.memory_space<vmem>>, vector<1x8x256xf32>
    %78 = vector.shape_cast %77 : vector<1x8x256xf32> to vector<8x256xf32>
    %79 = arith.select %24, %75, %78 : vector<8x256xi1>, vector<8x256xf32>
    %80 = arith.addf %79, %72 : vector<8x256xf32>
    %81 = math.tanh %80 : vector<8x256xf32>
    %82 = arith.mulf %81, %2 : vector<8x256xf32>
    %83 = arith.addf %82, %5 : vector<8x256xf32>
    %84 = vector.extract_strided_slice %83 {offsets = [0, 0], sizes = [8, 64], strides = [1, 1]} : vector<8x256xf32> to vector<8x64xf32>
    %85 = vector.extract_strided_slice %83 {offsets = [0, 64], sizes = [8, 64], strides = [1, 1]} : vector<8x256xf32> to vector<8x64xf32>
    %86 = vector.extract_strided_slice %83 {offsets = [0, 128], sizes = [8, 64], strides = [1, 1]} : vector<8x256xf32> to vector<8x64xf32>
    %87 = vector.extract_strided_slice %83 {offsets = [0, 192], sizes = [8, 64], strides = [1, 1]} : vector<8x256xf32> to vector<8x64xf32>
    %88 = arith.mulf %85, %58 : vector<8x64xf32>
    %89 = arith.mulf %84, %86 : vector<8x64xf32>
    %90 = arith.addf %88, %89 : vector<8x64xf32>
    %91 = math.tanh %90 : vector<8x64xf32>
    %92 = arith.mulf %87, %91 : vector<8x64xf32>
    %93 = vector.extract_strided_slice %92 {offsets = [0, 0], sizes = [8, 32], strides = [1, 1]} : vector<8x64xf32> to vector<8x32xf32>
    %94 = arith.index_cast %c1_i32_32 : i32 to index
    %c0_39 = arith.constant 0 : index
    %c0_40 = arith.constant 0 : index
    %95 = vector.load %arg17[%94, %c0_39, %c0_40] : memref<8x8x64xf32, #tpu.memory_space<vmem>>, vector<1x8x32xf32>
    %96 = vector.shape_cast %95 : vector<1x8x32xf32> to vector<8x32xf32>
    %97 = vector.shape_cast %93 : vector<8x32xf32> to vector<1x8x32xf32>
    tpu.vector_store %arg17[%94, %c0_39, %c0_40], %97 {strides = array<i32>} : memref<8x8x64xf32, #tpu.memory_space<vmem>>, vector<1x8x32xf32>,
    %98 = vector.extract_strided_slice %92 {offsets = [0, 32], sizes = [8, 32], strides = [1, 1]} : vector<8x64xf32> to vector<8x32xf32>
    %99 = arith.index_cast %71 : i32 to index
    %c0_41 = arith.constant 0 : index
    %c32_42 = arith.constant 32 : index
    %100 = vector.load %arg17[%99, %c0_41, %c32_42] : memref<8x8x64xf32, #tpu.memory_space<vmem>>, vector<1x8x32xf32>
    %101 = vector.shape_cast %100 : vector<1x8x32xf32> to vector<8x32xf32>
    %102 = vector.shape_cast %98 : vector<8x32xf32> to vector<1x8x32xf32>
    tpu.vector_store %arg17[%99, %c0_41, %c32_42], %102 {strides = array<i32>} : memref<8x8x64xf32, #tpu.memory_space<vmem>>, vector<1x8x32xf32>,
    %c2_i32 = arith.constant 2 : i32
    %c7_i32_43 = arith.constant 7 : i32
    %103 = arith.subi %c7_i32_43, %c2_i32 : i32
    %cst_44 = arith.constant dense<0.000000e+00> : vector<8x256xf32>
    %104 = tpu.matmul %92, %34, %cst_44 {dimension_numbers = #tpu.dot_dimension_numbers<[1], [0], [0], [1], [0, 0, 1, 1], [], []>} : vector<8x64xf32>, vector<64x256xf32>, vector<8x256xf32> -> vector<8x256xf32>
    %105 = arith.index_cast %c2_i32 : i32 to index
    %c0_45 = arith.constant 0 : index
    %c0_46 = arith.constant 0 : index
    %106 = vector.load %arg16[%105, %c0_45, %c0_46] : memref<8x8x256xf32, #tpu.memory_space<vmem>>, vector<1x8x256xf32>
    %107 = vector.shape_cast %106 : vector<1x8x256xf32> to vector<8x256xf32>
    %108 = arith.index_cast %103 : i32 to index
    %c0_47 = arith.constant 0 : index
    %c0_48 = arith.constant 0 : index
    %109 = vector.load %arg16[%108, %c0_47, %c0_48] : memref<8x8x256xf32, #tpu.memory_space<vmem>>, vector<1x8x256xf32>
    %110 = vector.shape_cast %109 : vector<1x8x256xf32> to vector<8x256xf32>
    %111 = arith.select %24, %107, %110 : vector<8x256xi1>, vector<8x256xf32>
    %112 = arith.addf %111, %104 : vector<8x256xf32>
    %113 = math.tanh %112 : vector<8x256xf32>
    %114 = arith.mulf %113, %2 : vector<8x256xf32>
    %115 = arith.addf %114, %5 : vector<8x256xf32>
    %116 = vector.extract_strided_slice %115 {offsets = [0, 0], sizes = [8, 64], strides = [1, 1]} : vector<8x256xf32> to vector<8x64xf32>
    %117 = vector.extract_strided_slice %115 {offsets = [0, 64], sizes = [8, 64], strides = [1, 1]} : vector<8x256xf32> to vector<8x64xf32>
    %118 = vector.extract_strided_slice %115 {offsets = [0, 128], sizes = [8, 64], strides = [1, 1]} : vector<8x256xf32> to vector<8x64xf32>
    %119 = vector.extract_strided_slice %115 {offsets = [0, 192], sizes = [8, 64], strides = [1, 1]} : vector<8x256xf32> to vector<8x64xf32>
    %120 = arith.mulf %117, %90 : vector<8x64xf32>
    %121 = arith.mulf %116, %118 : vector<8x64xf32>
    %122 = arith.addf %120, %121 : vector<8x64xf32>
    %123 = math.tanh %122 : vector<8x64xf32>
    %124 = arith.mulf %119, %123 : vector<8x64xf32>
    %125 = vector.extract_strided_slice %124 {offsets = [0, 0], sizes = [8, 32], strides = [1, 1]} : vector<8x64xf32> to vector<8x32xf32>
    %126 = arith.index_cast %c2_i32 : i32 to index
    %c0_49 = arith.constant 0 : index
    %c0_50 = arith.constant 0 : index
    %127 = vector.load %arg17[%126, %c0_49, %c0_50] : memref<8x8x64xf32, #tpu.memory_space<vmem>>, vector<1x8x32xf32>
    %128 = vector.shape_cast %127 : vector<1x8x32xf32> to vector<8x32xf32>
    %129 = vector.shape_cast %125 : vector<8x32xf32> to vector<1x8x32xf32>
    tpu.vector_store %arg17[%126, %c0_49, %c0_50], %129 {strides = array<i32>} : memref<8x8x64xf32, #tpu.memory_space<vmem>>, vector<1x8x32xf32>,
    %130 = vector.extract_strided_slice %124 {offsets = [0, 32], sizes = [8, 32], strides = [1, 1]} : vector<8x64xf32> to vector<8x32xf32>
    %131 = arith.index_cast %103 : i32 to index
    %c0_51 = arith.constant 0 : index
    %c32_52 = arith.constant 32 : index
    %132 = vector.load %arg17[%131, %c0_51, %c32_52] : memref<8x8x64xf32, #tpu.memory_space<vmem>>, vector<1x8x32xf32>
    %133 = vector.shape_cast %132 : vector<1x8x32xf32> to vector<8x32xf32>
    %134 = vector.shape_cast %130 : vector<8x32xf32> to vector<1x8x32xf32>
    tpu.vector_store %arg17[%131, %c0_51, %c32_52], %134 {strides = array<i32>} : memref<8x8x64xf32, #tpu.memory_space<vmem>>, vector<1x8x32xf32>,
    %c3_i32 = arith.constant 3 : i32
    %c7_i32_53 = arith.constant 7 : i32
    %135 = arith.subi %c7_i32_53, %c3_i32 : i32
    %cst_54 = arith.constant dense<0.000000e+00> : vector<8x256xf32>
    %136 = tpu.matmul %124, %34, %cst_54 {dimension_numbers = #tpu.dot_dimension_numbers<[1], [0], [0], [1], [0, 0, 1, 1], [], []>} : vector<8x64xf32>, vector<64x256xf32>, vector<8x256xf32> -> vector<8x256xf32>
    %137 = arith.index_cast %c3_i32 : i32 to index
    %c0_55 = arith.constant 0 : index
    %c0_56 = arith.constant 0 : index
    %138 = vector.load %arg16[%137, %c0_55, %c0_56] : memref<8x8x256xf32, #tpu.memory_space<vmem>>, vector<1x8x256xf32>
    %139 = vector.shape_cast %138 : vector<1x8x256xf32> to vector<8x256xf32>
    %140 = arith.index_cast %135 : i32 to index
    %c0_57 = arith.constant 0 : index
    %c0_58 = arith.constant 0 : index
    %141 = vector.load %arg16[%140, %c0_57, %c0_58] : memref<8x8x256xf32, #tpu.memory_space<vmem>>, vector<1x8x256xf32>
    %142 = vector.shape_cast %141 : vector<1x8x256xf32> to vector<8x256xf32>
    %143 = arith.select %24, %139, %142 : vector<8x256xi1>, vector<8x256xf32>
    %144 = arith.addf %143, %136 : vector<8x256xf32>
    %145 = math.tanh %144 : vector<8x256xf32>
    %146 = arith.mulf %145, %2 : vector<8x256xf32>
    %147 = arith.addf %146, %5 : vector<8x256xf32>
    %148 = vector.extract_strided_slice %147 {offsets = [0, 0], sizes = [8, 64], strides = [1, 1]} : vector<8x256xf32> to vector<8x64xf32>
    %149 = vector.extract_strided_slice %147 {offsets = [0, 64], sizes = [8, 64], strides = [1, 1]} : vector<8x256xf32> to vector<8x64xf32>
    %150 = vector.extract_strided_slice %147 {offsets = [0, 128], sizes = [8, 64], strides = [1, 1]} : vector<8x256xf32> to vector<8x64xf32>
    %151 = vector.extract_strided_slice %147 {offsets = [0, 192], sizes = [8, 64], strides = [1, 1]} : vector<8x256xf32> to vector<8x64xf32>
    %152 = arith.mulf %149, %122 : vector<8x64xf32>
    %153 = arith.mulf %148, %150 : vector<8x64xf32>
    %154 = arith.addf %152, %153 : vector<8x64xf32>
    %155 = math.tanh %154 : vector<8x64xf32>
    %156 = arith.mulf %151, %155 : vector<8x64xf32>
    %157 = vector.extract_strided_slice %156 {offsets = [0, 0], sizes = [8, 32], strides = [1, 1]} : vector<8x64xf32> to vector<8x32xf32>
    %158 = arith.index_cast %c3_i32 : i32 to index
    %c0_59 = arith.constant 0 : index
    %c0_60 = arith.constant 0 : index
    %159 = vector.load %arg17[%158, %c0_59, %c0_60] : memref<8x8x64xf32, #tpu.memory_space<vmem>>, vector<1x8x32xf32>
    %160 = vector.shape_cast %159 : vector<1x8x32xf32> to vector<8x32xf32>
    %161 = vector.shape_cast %157 : vector<8x32xf32> to vector<1x8x32xf32>
    tpu.vector_store %arg17[%158, %c0_59, %c0_60], %161 {strides = array<i32>} : memref<8x8x64xf32, #tpu.memory_space<vmem>>, vector<1x8x32xf32>,
    %162 = vector.extract_strided_slice %156 {offsets = [0, 32], sizes = [8, 32], strides = [1, 1]} : vector<8x64xf32> to vector<8x32xf32>
    %163 = arith.index_cast %135 : i32 to index
    %c0_61 = arith.constant 0 : index
    %c32_62 = arith.constant 32 : index
    %164 = vector.load %arg17[%163, %c0_61, %c32_62] : memref<8x8x64xf32, #tpu.memory_space<vmem>>, vector<1x8x32xf32>
    %165 = vector.shape_cast %164 : vector<1x8x32xf32> to vector<8x32xf32>
    %166 = vector.shape_cast %162 : vector<8x32xf32> to vector<1x8x32xf32>
    tpu.vector_store %arg17[%163, %c0_61, %c32_62], %166 {strides = array<i32>} : memref<8x8x64xf32, #tpu.memory_space<vmem>>, vector<1x8x32xf32>,
    %c4_i32 = arith.constant 4 : i32
    %c7_i32_63 = arith.constant 7 : i32
    %167 = arith.subi %c7_i32_63, %c4_i32 : i32
    %cst_64 = arith.constant dense<0.000000e+00> : vector<8x256xf32>
    %168 = tpu.matmul %156, %34, %cst_64 {dimension_numbers = #tpu.dot_dimension_numbers<[1], [0], [0], [1], [0, 0, 1, 1], [], []>} : vector<8x64xf32>, vector<64x256xf32>, vector<8x256xf32> -> vector<8x256xf32>
    %169 = arith.index_cast %c4_i32 : i32 to index
    %c0_65 = arith.constant 0 : index
    %c0_66 = arith.constant 0 : index
    %170 = vector.load %arg16[%169, %c0_65, %c0_66] : memref<8x8x256xf32, #tpu.memory_space<vmem>>, vector<1x8x256xf32>
    %171 = vector.shape_cast %170 : vector<1x8x256xf32> to vector<8x256xf32>
    %172 = arith.index_cast %167 : i32 to index
    %c0_67 = arith.constant 0 : index
    %c0_68 = arith.constant 0 : index
    %173 = vector.load %arg16[%172, %c0_67, %c0_68] : memref<8x8x256xf32, #tpu.memory_space<vmem>>, vector<1x8x256xf32>
    %174 = vector.shape_cast %173 : vector<1x8x256xf32> to vector<8x256xf32>
    %175 = arith.select %24, %171, %174 : vector<8x256xi1>, vector<8x256xf32>
    %176 = arith.addf %175, %168 : vector<8x256xf32>
    %177 = math.tanh %176 : vector<8x256xf32>
    %178 = arith.mulf %177, %2 : vector<8x256xf32>
    %179 = arith.addf %178, %5 : vector<8x256xf32>
    %180 = vector.extract_strided_slice %179 {offsets = [0, 0], sizes = [8, 64], strides = [1, 1]} : vector<8x256xf32> to vector<8x64xf32>
    %181 = vector.extract_strided_slice %179 {offsets = [0, 64], sizes = [8, 64], strides = [1, 1]} : vector<8x256xf32> to vector<8x64xf32>
    %182 = vector.extract_strided_slice %179 {offsets = [0, 128], sizes = [8, 64], strides = [1, 1]} : vector<8x256xf32> to vector<8x64xf32>
    %183 = vector.extract_strided_slice %179 {offsets = [0, 192], sizes = [8, 64], strides = [1, 1]} : vector<8x256xf32> to vector<8x64xf32>
    %184 = arith.mulf %181, %154 : vector<8x64xf32>
    %185 = arith.mulf %180, %182 : vector<8x64xf32>
    %186 = arith.addf %184, %185 : vector<8x64xf32>
    %187 = math.tanh %186 : vector<8x64xf32>
    %188 = arith.mulf %183, %187 : vector<8x64xf32>
    %189 = vector.extract_strided_slice %188 {offsets = [0, 0], sizes = [8, 32], strides = [1, 1]} : vector<8x64xf32> to vector<8x32xf32>
    %190 = arith.index_cast %c4_i32 : i32 to index
    %c0_69 = arith.constant 0 : index
    %c0_70 = arith.constant 0 : index
    %191 = vector.load %arg17[%190, %c0_69, %c0_70] : memref<8x8x64xf32, #tpu.memory_space<vmem>>, vector<1x8x32xf32>
    %192 = vector.shape_cast %191 : vector<1x8x32xf32> to vector<8x32xf32>
    %193 = vector.shape_cast %189 : vector<8x32xf32> to vector<1x8x32xf32>
    tpu.vector_store %arg17[%190, %c0_69, %c0_70], %193 {strides = array<i32>} : memref<8x8x64xf32, #tpu.memory_space<vmem>>, vector<1x8x32xf32>,
    %194 = vector.extract_strided_slice %188 {offsets = [0, 32], sizes = [8, 32], strides = [1, 1]} : vector<8x64xf32> to vector<8x32xf32>
    %195 = arith.index_cast %167 : i32 to index
    %c0_71 = arith.constant 0 : index
    %c32_72 = arith.constant 32 : index
    %196 = vector.load %arg17[%195, %c0_71, %c32_72] : memref<8x8x64xf32, #tpu.memory_space<vmem>>, vector<1x8x32xf32>
    %197 = vector.shape_cast %196 : vector<1x8x32xf32> to vector<8x32xf32>
    %198 = vector.shape_cast %194 : vector<8x32xf32> to vector<1x8x32xf32>
    tpu.vector_store %arg17[%195, %c0_71, %c32_72], %198 {strides = array<i32>} : memref<8x8x64xf32, #tpu.memory_space<vmem>>, vector<1x8x32xf32>,
    %c5_i32 = arith.constant 5 : i32
    %c7_i32_73 = arith.constant 7 : i32
    %199 = arith.subi %c7_i32_73, %c5_i32 : i32
    %cst_74 = arith.constant dense<0.000000e+00> : vector<8x256xf32>
    %200 = tpu.matmul %188, %34, %cst_74 {dimension_numbers = #tpu.dot_dimension_numbers<[1], [0], [0], [1], [0, 0, 1, 1], [], []>} : vector<8x64xf32>, vector<64x256xf32>, vector<8x256xf32> -> vector<8x256xf32>
    %201 = arith.index_cast %c5_i32 : i32 to index
    %c0_75 = arith.constant 0 : index
    %c0_76 = arith.constant 0 : index
    %202 = vector.load %arg16[%201, %c0_75, %c0_76] : memref<8x8x256xf32, #tpu.memory_space<vmem>>, vector<1x8x256xf32>
    %203 = vector.shape_cast %202 : vector<1x8x256xf32> to vector<8x256xf32>
    %204 = arith.index_cast %199 : i32 to index
    %c0_77 = arith.constant 0 : index
    %c0_78 = arith.constant 0 : index
    %205 = vector.load %arg16[%204, %c0_77, %c0_78] : memref<8x8x256xf32, #tpu.memory_space<vmem>>, vector<1x8x256xf32>
    %206 = vector.shape_cast %205 : vector<1x8x256xf32> to vector<8x256xf32>
    %207 = arith.select %24, %203, %206 : vector<8x256xi1>, vector<8x256xf32>
    %208 = arith.addf %207, %200 : vector<8x256xf32>
    %209 = math.tanh %208 : vector<8x256xf32>
    %210 = arith.mulf %209, %2 : vector<8x256xf32>
    %211 = arith.addf %210, %5 : vector<8x256xf32>
    %212 = vector.extract_strided_slice %211 {offsets = [0, 0], sizes = [8, 64], strides = [1, 1]} : vector<8x256xf32> to vector<8x64xf32>
    %213 = vector.extract_strided_slice %211 {offsets = [0, 64], sizes = [8, 64], strides = [1, 1]} : vector<8x256xf32> to vector<8x64xf32>
    %214 = vector.extract_strided_slice %211 {offsets = [0, 128], sizes = [8, 64], strides = [1, 1]} : vector<8x256xf32> to vector<8x64xf32>
    %215 = vector.extract_strided_slice %211 {offsets = [0, 192], sizes = [8, 64], strides = [1, 1]} : vector<8x256xf32> to vector<8x64xf32>
    %216 = arith.mulf %213, %186 : vector<8x64xf32>
    %217 = arith.mulf %212, %214 : vector<8x64xf32>
    %218 = arith.addf %216, %217 : vector<8x64xf32>
    %219 = math.tanh %218 : vector<8x64xf32>
    %220 = arith.mulf %215, %219 : vector<8x64xf32>
    %221 = vector.extract_strided_slice %220 {offsets = [0, 0], sizes = [8, 32], strides = [1, 1]} : vector<8x64xf32> to vector<8x32xf32>
    %222 = arith.index_cast %c5_i32 : i32 to index
    %c0_79 = arith.constant 0 : index
    %c0_80 = arith.constant 0 : index
    %223 = vector.load %arg17[%222, %c0_79, %c0_80] : memref<8x8x64xf32, #tpu.memory_space<vmem>>, vector<1x8x32xf32>
    %224 = vector.shape_cast %223 : vector<1x8x32xf32> to vector<8x32xf32>
    %225 = vector.shape_cast %221 : vector<8x32xf32> to vector<1x8x32xf32>
    tpu.vector_store %arg17[%222, %c0_79, %c0_80], %225 {strides = array<i32>} : memref<8x8x64xf32, #tpu.memory_space<vmem>>, vector<1x8x32xf32>,
    %226 = vector.extract_strided_slice %220 {offsets = [0, 32], sizes = [8, 32], strides = [1, 1]} : vector<8x64xf32> to vector<8x32xf32>
    %227 = arith.index_cast %199 : i32 to index
    %c0_81 = arith.constant 0 : index
    %c32_82 = arith.constant 32 : index
    %228 = vector.load %arg17[%227, %c0_81, %c32_82] : memref<8x8x64xf32, #tpu.memory_space<vmem>>, vector<1x8x32xf32>
    %229 = vector.shape_cast %228 : vector<1x8x32xf32> to vector<8x32xf32>
    %230 = vector.shape_cast %226 : vector<8x32xf32> to vector<1x8x32xf32>
    tpu.vector_store %arg17[%227, %c0_81, %c32_82], %230 {strides = array<i32>} : memref<8x8x64xf32, #tpu.memory_space<vmem>>, vector<1x8x32xf32>,
    %c6_i32 = arith.constant 6 : i32
    %c7_i32_83 = arith.constant 7 : i32
    %231 = arith.subi %c7_i32_83, %c6_i32 : i32
    %cst_84 = arith.constant dense<0.000000e+00> : vector<8x256xf32>
    %232 = tpu.matmul %220, %34, %cst_84 {dimension_numbers = #tpu.dot_dimension_numbers<[1], [0], [0], [1], [0, 0, 1, 1], [], []>} : vector<8x64xf32>, vector<64x256xf32>, vector<8x256xf32> -> vector<8x256xf32>
    %233 = arith.index_cast %c6_i32 : i32 to index
    %c0_85 = arith.constant 0 : index
    %c0_86 = arith.constant 0 : index
    %234 = vector.load %arg16[%233, %c0_85, %c0_86] : memref<8x8x256xf32, #tpu.memory_space<vmem>>, vector<1x8x256xf32>
    %235 = vector.shape_cast %234 : vector<1x8x256xf32> to vector<8x256xf32>
    %236 = arith.index_cast %231 : i32 to index
    %c0_87 = arith.constant 0 : index
    %c0_88 = arith.constant 0 : index
    %237 = vector.load %arg16[%236, %c0_87, %c0_88] : memref<8x8x256xf32, #tpu.memory_space<vmem>>, vector<1x8x256xf32>
    %238 = vector.shape_cast %237 : vector<1x8x256xf32> to vector<8x256xf32>
    %239 = arith.select %24, %235, %238 : vector<8x256xi1>, vector<8x256xf32>
    %240 = arith.addf %239, %232 : vector<8x256xf32>
    %241 = math.tanh %240 : vector<8x256xf32>
    %242 = arith.mulf %241, %2 : vector<8x256xf32>
    %243 = arith.addf %242, %5 : vector<8x256xf32>
    %244 = vector.extract_strided_slice %243 {offsets = [0, 0], sizes = [8, 64], strides = [1, 1]} : vector<8x256xf32> to vector<8x64xf32>
    %245 = vector.extract_strided_slice %243 {offsets = [0, 64], sizes = [8, 64], strides = [1, 1]} : vector<8x256xf32> to vector<8x64xf32>
    %246 = vector.extract_strided_slice %243 {offsets = [0, 128], sizes = [8, 64], strides = [1, 1]} : vector<8x256xf32> to vector<8x64xf32>
    %247 = vector.extract_strided_slice %243 {offsets = [0, 192], sizes = [8, 64], strides = [1, 1]} : vector<8x256xf32> to vector<8x64xf32>
    %248 = arith.mulf %245, %218 : vector<8x64xf32>
    %249 = arith.mulf %244, %246 : vector<8x64xf32>
    %250 = arith.addf %248, %249 : vector<8x64xf32>
    %251 = math.tanh %250 : vector<8x64xf32>
    %252 = arith.mulf %247, %251 : vector<8x64xf32>
    %253 = vector.extract_strided_slice %252 {offsets = [0, 0], sizes = [8, 32], strides = [1, 1]} : vector<8x64xf32> to vector<8x32xf32>
    %254 = arith.index_cast %c6_i32 : i32 to index
    %c0_89 = arith.constant 0 : index
    %c0_90 = arith.constant 0 : index
    %255 = vector.load %arg17[%254, %c0_89, %c0_90] : memref<8x8x64xf32, #tpu.memory_space<vmem>>, vector<1x8x32xf32>
    %256 = vector.shape_cast %255 : vector<1x8x32xf32> to vector<8x32xf32>
    %257 = vector.shape_cast %253 : vector<8x32xf32> to vector<1x8x32xf32>
    tpu.vector_store %arg17[%254, %c0_89, %c0_90], %257 {strides = array<i32>} : memref<8x8x64xf32, #tpu.memory_space<vmem>>, vector<1x8x32xf32>,
    %258 = vector.extract_strided_slice %252 {offsets = [0, 32], sizes = [8, 32], strides = [1, 1]} : vector<8x64xf32> to vector<8x32xf32>
    %259 = arith.index_cast %231 : i32 to index
    %c0_91 = arith.constant 0 : index
    %c32_92 = arith.constant 32 : index
    %260 = vector.load %arg17[%259, %c0_91, %c32_92] : memref<8x8x64xf32, #tpu.memory_space<vmem>>, vector<1x8x32xf32>
    %261 = vector.shape_cast %260 : vector<1x8x32xf32> to vector<8x32xf32>
    %262 = vector.shape_cast %258 : vector<8x32xf32> to vector<1x8x32xf32>
    tpu.vector_store %arg17[%259, %c0_91, %c32_92], %262 {strides = array<i32>} : memref<8x8x64xf32, #tpu.memory_space<vmem>>, vector<1x8x32xf32>,
    %c7_i32_93 = arith.constant 7 : i32
    %c7_i32_94 = arith.constant 7 : i32
    %263 = arith.subi %c7_i32_94, %c7_i32_93 : i32
    %cst_95 = arith.constant dense<0.000000e+00> : vector<8x256xf32>
    %264 = tpu.matmul %252, %34, %cst_95 {dimension_numbers = #tpu.dot_dimension_numbers<[1], [0], [0], [1], [0, 0, 1, 1], [], []>} : vector<8x64xf32>, vector<64x256xf32>, vector<8x256xf32> -> vector<8x256xf32>
    %265 = arith.index_cast %c7_i32_93 : i32 to index
    %c0_96 = arith.constant 0 : index
    %c0_97 = arith.constant 0 : index
    %266 = vector.load %arg16[%265, %c0_96, %c0_97] : memref<8x8x256xf32, #tpu.memory_space<vmem>>, vector<1x8x256xf32>
    %267 = vector.shape_cast %266 : vector<1x8x256xf32> to vector<8x256xf32>
    %268 = arith.index_cast %263 : i32 to index
    %c0_98 = arith.constant 0 : index
    %c0_99 = arith.constant 0 : index
    %269 = vector.load %arg16[%268, %c0_98, %c0_99] : memref<8x8x256xf32, #tpu.memory_space<vmem>>, vector<1x8x256xf32>
    %270 = vector.shape_cast %269 : vector<1x8x256xf32> to vector<8x256xf32>
    %271 = arith.select %24, %267, %270 : vector<8x256xi1>, vector<8x256xf32>
    %272 = arith.addf %271, %264 : vector<8x256xf32>
    %273 = math.tanh %272 : vector<8x256xf32>
    %274 = arith.mulf %273, %2 : vector<8x256xf32>
    %275 = arith.addf %274, %5 : vector<8x256xf32>
    %276 = vector.extract_strided_slice %275 {offsets = [0, 0], sizes = [8, 64], strides = [1, 1]} : vector<8x256xf32> to vector<8x64xf32>
    %277 = vector.extract_strided_slice %275 {offsets = [0, 64], sizes = [8, 64], strides = [1, 1]} : vector<8x256xf32> to vector<8x64xf32>
    %278 = vector.extract_strided_slice %275 {offsets = [0, 128], sizes = [8, 64], strides = [1, 1]} : vector<8x256xf32> to vector<8x64xf32>
    %279 = vector.extract_strided_slice %275 {offsets = [0, 192], sizes = [8, 64], strides = [1, 1]} : vector<8x256xf32> to vector<8x64xf32>
    %280 = arith.mulf %277, %250 : vector<8x64xf32>
    %281 = arith.mulf %276, %278 : vector<8x64xf32>
    %282 = arith.addf %280, %281 : vector<8x64xf32>
    %283 = math.tanh %282 : vector<8x64xf32>
    %284 = arith.mulf %279, %283 : vector<8x64xf32>
    %285 = vector.extract_strided_slice %284 {offsets = [0, 0], sizes = [8, 32], strides = [1, 1]} : vector<8x64xf32> to vector<8x32xf32>
    %286 = arith.index_cast %c7_i32_93 : i32 to index
    %c0_100 = arith.constant 0 : index
    %c0_101 = arith.constant 0 : index
    %287 = vector.load %arg17[%286, %c0_100, %c0_101] : memref<8x8x64xf32, #tpu.memory_space<vmem>>, vector<1x8x32xf32>
    %288 = vector.shape_cast %287 : vector<1x8x32xf32> to vector<8x32xf32>
    %289 = vector.shape_cast %285 : vector<8x32xf32> to vector<1x8x32xf32>
    tpu.vector_store %arg17[%286, %c0_100, %c0_101], %289 {strides = array<i32>} : memref<8x8x64xf32, #tpu.memory_space<vmem>>, vector<1x8x32xf32>,
    %290 = vector.extract_strided_slice %284 {offsets = [0, 32], sizes = [8, 32], strides = [1, 1]} : vector<8x64xf32> to vector<8x32xf32>
    %291 = arith.index_cast %263 : i32 to index
    %c0_102 = arith.constant 0 : index
    %c32_103 = arith.constant 32 : index
    %292 = vector.load %arg17[%291, %c0_102, %c32_103] : memref<8x8x64xf32, #tpu.memory_space<vmem>>, vector<1x8x32xf32>
    %293 = vector.shape_cast %292 : vector<1x8x32xf32> to vector<8x32xf32>
    %294 = vector.shape_cast %290 : vector<8x32xf32> to vector<1x8x32xf32>
    tpu.vector_store %arg17[%291, %c0_102, %c32_103], %294 {strides = array<i32>} : memref<8x8x64xf32, #tpu.memory_space<vmem>>, vector<1x8x32xf32>,
    %c8_i32 = arith.constant 8 : i32
    %c0_104 = arith.constant 0 : index
    %c0_105 = arith.constant 0 : index
    %c0_106 = arith.constant 0 : index
    %295 = vector.load %arg14[%c0_104, %c0_105, %c0_106] : memref<2x8x64xf32, #tpu.memory_space<vmem>>, vector<1x8x64xf32>
    %296 = vector.shape_cast %295 : vector<1x8x64xf32> to vector<8x64xf32>
    %297 = vector.shape_cast %284 : vector<8x64xf32> to vector<1x8x64xf32>
    tpu.vector_store %arg14[%c0_104, %c0_105, %c0_106], %297 {strides = array<i32>} : memref<2x8x64xf32, #tpu.memory_space<vmem>>, vector<1x8x64xf32>,
    %c0_107 = arith.constant 0 : index
    %c0_108 = arith.constant 0 : index
    %c0_109 = arith.constant 0 : index
    %298 = vector.load %arg15[%c0_107, %c0_108, %c0_109] : memref<2x8x64xf32, #tpu.memory_space<vmem>>, vector<1x8x64xf32>
    %299 = vector.shape_cast %298 : vector<1x8x64xf32> to vector<8x64xf32>
    %300 = vector.shape_cast %282 : vector<8x64xf32> to vector<1x8x64xf32>
    tpu.vector_store %arg15[%c0_107, %c0_108, %c0_109], %300 {strides = array<i32>} : memref<2x8x64xf32, #tpu.memory_space<vmem>>, vector<1x8x64xf32>,
    %c0_110 = arith.constant 0 : index
    %c0_111 = arith.constant 0 : index
    %c0_112 = arith.constant 0 : index
    %301 = vector.load %arg17[%c0_110, %c0_111, %c0_112] : memref<8x8x64xf32, #tpu.memory_space<vmem>>, vector<8x8x64xf32>
    %302 = vector.shape_cast %301 : vector<8x8x64xf32> to vector<64x64xf32>
    %c0_113 = arith.constant 0 : index
    %c0_114 = arith.constant 0 : index
    %303 = vector.load %arg5[%c0_113, %c0_114] : memref<64x256xf32, #tpu.memory_space<vmem>>, vector<64x256xf32>
    %cst_115 = arith.constant dense<0.000000e+00> : vector<64x256xf32>
    %304 = tpu.matmul %302, %303, %cst_115 {dimension_numbers = #tpu.dot_dimension_numbers<[1], [0], [0], [1], [0, 0, 1, 1], [], []>} : vector<64x64xf32>, vector<64x256xf32>, vector<64x256xf32> -> vector<64x256xf32>
    %c0_116 = arith.constant 0 : index
    %c0_117 = arith.constant 0 : index
    %305 = vector.load %arg7[%c0_116, %c0_117] : memref<1x256xf32, #tpu.memory_space<vmem>>, vector<1x256xf32>
    %306 = vector.broadcast %305 : vector<1x256xf32> to vector<64x256xf32>
    %307 = arith.addf %304, %306 : vector<64x256xf32>
    %308 = vector.shape_cast %307 : vector<64x256xf32> to vector<8x8x256xf32>
    %c0_118 = arith.constant 0 : index
    %c0_119 = arith.constant 0 : index
    %c0_120 = arith.constant 0 : index
    %309 = vector.load %arg16[%c0_118, %c0_119, %c0_120] : memref<8x8x256xf32, #tpu.memory_space<vmem>>, vector<8x8x256xf32>
    tpu.vector_store %arg16[%c0_118, %c0_119, %c0_120], %308 {strides = array<i32>} : memref<8x8x256xf32, #tpu.memory_space<vmem>>, vector<8x8x256xf32>,
    %c0_121 = arith.constant 0 : index
    %c0_122 = arith.constant 0 : index
    %310 = vector.load %arg6[%c0_121, %c0_122] : memref<64x256xf32, #tpu.memory_space<vmem>>, vector<64x256xf32>
    %c1_123 = arith.constant 1 : index
    %c0_124 = arith.constant 0 : index
    %c0_125 = arith.constant 0 : index
    %311 = vector.load %arg9[%c1_123, %c0_124, %c0_125] : memref<2x8x64xf32, #tpu.memory_space<vmem>>, vector<1x8x64xf32>
    %312 = vector.shape_cast %311 : vector<1x8x64xf32> to vector<8x64xf32>
    %c1_126 = arith.constant 1 : index
    %c0_127 = arith.constant 0 : index
    %c0_128 = arith.constant 0 : index
    %313 = vector.load %arg10[%c1_126, %c0_127, %c0_128] : memref<2x8x64xf32, #tpu.memory_space<vmem>>, vector<1x8x64xf32>
    %314 = vector.shape_cast %313 : vector<1x8x64xf32> to vector<8x64xf32>
    %c0_i32_129 = arith.constant 0 : i32
    %c7_i32_130 = arith.constant 7 : i32
    %315 = arith.subi %c7_i32_130, %c0_i32_129 : i32
    %cst_131 = arith.constant dense<0.000000e+00> : vector<8x256xf32>
    %316 = tpu.matmul %312, %310, %cst_131 {dimension_numbers = #tpu.dot_dimension_numbers<[1], [0], [0], [1], [0, 0, 1, 1], [], []>} : vector<8x64xf32>, vector<64x256xf32>, vector<8x256xf32> -> vector<8x256xf32>
    %317 = arith.index_cast %c0_i32_129 : i32 to index
    %c0_132 = arith.constant 0 : index
    %c0_133 = arith.constant 0 : index
    %318 = vector.load %arg16[%317, %c0_132, %c0_133] : memref<8x8x256xf32, #tpu.memory_space<vmem>>, vector<1x8x256xf32>
    %319 = vector.shape_cast %318 : vector<1x8x256xf32> to vector<8x256xf32>
    %320 = arith.index_cast %315 : i32 to index
    %c0_134 = arith.constant 0 : index
    %c0_135 = arith.constant 0 : index
    %321 = vector.load %arg16[%320, %c0_134, %c0_135] : memref<8x8x256xf32, #tpu.memory_space<vmem>>, vector<1x8x256xf32>
    %322 = vector.shape_cast %321 : vector<1x8x256xf32> to vector<8x256xf32>
    %323 = arith.select %24, %319, %322 : vector<8x256xi1>, vector<8x256xf32>
    %324 = arith.addf %323, %316 : vector<8x256xf32>
    %325 = math.tanh %324 : vector<8x256xf32>
    %326 = arith.mulf %325, %2 : vector<8x256xf32>
    %327 = arith.addf %326, %5 : vector<8x256xf32>
    %328 = vector.extract_strided_slice %327 {offsets = [0, 0], sizes = [8, 64], strides = [1, 1]} : vector<8x256xf32> to vector<8x64xf32>
    %329 = vector.extract_strided_slice %327 {offsets = [0, 64], sizes = [8, 64], strides = [1, 1]} : vector<8x256xf32> to vector<8x64xf32>
    %330 = vector.extract_strided_slice %327 {offsets = [0, 128], sizes = [8, 64], strides = [1, 1]} : vector<8x256xf32> to vector<8x64xf32>
    %331 = vector.extract_strided_slice %327 {offsets = [0, 192], sizes = [8, 64], strides = [1, 1]} : vector<8x256xf32> to vector<8x64xf32>
    %332 = arith.mulf %329, %314 : vector<8x64xf32>
    %333 = arith.mulf %328, %330 : vector<8x64xf32>
    %334 = arith.addf %332, %333 : vector<8x64xf32>
    %335 = math.tanh %334 : vector<8x64xf32>
    %336 = arith.mulf %331, %335 : vector<8x64xf32>
    %337 = vector.extract_strided_slice %336 {offsets = [0, 0], sizes = [8, 32], strides = [1, 1]} : vector<8x64xf32> to vector<8x32xf32>
    %338 = arith.index_cast %c0_i32_129 : i32 to index
    %c0_136 = arith.constant 0 : index
    %c0_137 = arith.constant 0 : index
    %339 = vector.load %arg17[%338, %c0_136, %c0_137] : memref<8x8x64xf32, #tpu.memory_space<vmem>>, vector<1x8x32xf32>
    %340 = vector.shape_cast %339 : vector<1x8x32xf32> to vector<8x32xf32>
    %341 = vector.shape_cast %337 : vector<8x32xf32> to vector<1x8x32xf32>
    tpu.vector_store %arg17[%338, %c0_136, %c0_137], %341 {strides = array<i32>} : memref<8x8x64xf32, #tpu.memory_space<vmem>>, vector<1x8x32xf32>,
    %342 = vector.extract_strided_slice %336 {offsets = [0, 32], sizes = [8, 32], strides = [1, 1]} : vector<8x64xf32> to vector<8x32xf32>
    %343 = arith.index_cast %315 : i32 to index
    %c0_138 = arith.constant 0 : index
    %c32_139 = arith.constant 32 : index
    %344 = vector.load %arg17[%343, %c0_138, %c32_139] : memref<8x8x64xf32, #tpu.memory_space<vmem>>, vector<1x8x32xf32>
    %345 = vector.shape_cast %344 : vector<1x8x32xf32> to vector<8x32xf32>
    %346 = vector.shape_cast %342 : vector<8x32xf32> to vector<1x8x32xf32>
    tpu.vector_store %arg17[%343, %c0_138, %c32_139], %346 {strides = array<i32>} : memref<8x8x64xf32, #tpu.memory_space<vmem>>, vector<1x8x32xf32>,
    %c1_i32_140 = arith.constant 1 : i32
    %c7_i32_141 = arith.constant 7 : i32
    %347 = arith.subi %c7_i32_141, %c1_i32_140 : i32
    %cst_142 = arith.constant dense<0.000000e+00> : vector<8x256xf32>
    %348 = tpu.matmul %336, %310, %cst_142 {dimension_numbers = #tpu.dot_dimension_numbers<[1], [0], [0], [1], [0, 0, 1, 1], [], []>} : vector<8x64xf32>, vector<64x256xf32>, vector<8x256xf32> -> vector<8x256xf32>
    %349 = arith.index_cast %c1_i32_140 : i32 to index
    %c0_143 = arith.constant 0 : index
    %c0_144 = arith.constant 0 : index
    %350 = vector.load %arg16[%349, %c0_143, %c0_144] : memref<8x8x256xf32, #tpu.memory_space<vmem>>, vector<1x8x256xf32>
    %351 = vector.shape_cast %350 : vector<1x8x256xf32> to vector<8x256xf32>
    %352 = arith.index_cast %347 : i32 to index
    %c0_145 = arith.constant 0 : index
    %c0_146 = arith.constant 0 : index
    %353 = vector.load %arg16[%352, %c0_145, %c0_146] : memref<8x8x256xf32, #tpu.memory_space<vmem>>, vector<1x8x256xf32>
    %354 = vector.shape_cast %353 : vector<1x8x256xf32> to vector<8x256xf32>
    %355 = arith.select %24, %351, %354 : vector<8x256xi1>, vector<8x256xf32>
    %356 = arith.addf %355, %348 : vector<8x256xf32>
    %357 = math.tanh %356 : vector<8x256xf32>
    %358 = arith.mulf %357, %2 : vector<8x256xf32>
    %359 = arith.addf %358, %5 : vector<8x256xf32>
    %360 = vector.extract_strided_slice %359 {offsets = [0, 0], sizes = [8, 64], strides = [1, 1]} : vector<8x256xf32> to vector<8x64xf32>
    %361 = vector.extract_strided_slice %359 {offsets = [0, 64], sizes = [8, 64], strides = [1, 1]} : vector<8x256xf32> to vector<8x64xf32>
    %362 = vector.extract_strided_slice %359 {offsets = [0, 128], sizes = [8, 64], strides = [1, 1]} : vector<8x256xf32> to vector<8x64xf32>
    %363 = vector.extract_strided_slice %359 {offsets = [0, 192], sizes = [8, 64], strides = [1, 1]} : vector<8x256xf32> to vector<8x64xf32>
    %364 = arith.mulf %361, %334 : vector<8x64xf32>
    %365 = arith.mulf %360, %362 : vector<8x64xf32>
    %366 = arith.addf %364, %365 : vector<8x64xf32>
    %367 = math.tanh %366 : vector<8x64xf32>
    %368 = arith.mulf %363, %367 : vector<8x64xf32>
    %369 = vector.extract_strided_slice %368 {offsets = [0, 0], sizes = [8, 32], strides = [1, 1]} : vector<8x64xf32> to vector<8x32xf32>
    %370 = arith.index_cast %c1_i32_140 : i32 to index
    %c0_147 = arith.constant 0 : index
    %c0_148 = arith.constant 0 : index
    %371 = vector.load %arg17[%370, %c0_147, %c0_148] : memref<8x8x64xf32, #tpu.memory_space<vmem>>, vector<1x8x32xf32>
    %372 = vector.shape_cast %371 : vector<1x8x32xf32> to vector<8x32xf32>
    %373 = vector.shape_cast %369 : vector<8x32xf32> to vector<1x8x32xf32>
    tpu.vector_store %arg17[%370, %c0_147, %c0_148], %373 {strides = array<i32>} : memref<8x8x64xf32, #tpu.memory_space<vmem>>, vector<1x8x32xf32>,
    %374 = vector.extract_strided_slice %368 {offsets = [0, 32], sizes = [8, 32], strides = [1, 1]} : vector<8x64xf32> to vector<8x32xf32>
    %375 = arith.index_cast %347 : i32 to index
    %c0_149 = arith.constant 0 : index
    %c32_150 = arith.constant 32 : index
    %376 = vector.load %arg17[%375, %c0_149, %c32_150] : memref<8x8x64xf32, #tpu.memory_space<vmem>>, vector<1x8x32xf32>
    %377 = vector.shape_cast %376 : vector<1x8x32xf32> to vector<8x32xf32>
    %378 = vector.shape_cast %374 : vector<8x32xf32> to vector<1x8x32xf32>
    tpu.vector_store %arg17[%375, %c0_149, %c32_150], %378 {strides = array<i32>} : memref<8x8x64xf32, #tpu.memory_space<vmem>>, vector<1x8x32xf32>,
    %c2_i32_151 = arith.constant 2 : i32
    %c7_i32_152 = arith.constant 7 : i32
    %379 = arith.subi %c7_i32_152, %c2_i32_151 : i32
    %cst_153 = arith.constant dense<0.000000e+00> : vector<8x256xf32>
    %380 = tpu.matmul %368, %310, %cst_153 {dimension_numbers = #tpu.dot_dimension_numbers<[1], [0], [0], [1], [0, 0, 1, 1], [], []>} : vector<8x64xf32>, vector<64x256xf32>, vector<8x256xf32> -> vector<8x256xf32>
    %381 = arith.index_cast %c2_i32_151 : i32 to index
    %c0_154 = arith.constant 0 : index
    %c0_155 = arith.constant 0 : index
    %382 = vector.load %arg16[%381, %c0_154, %c0_155] : memref<8x8x256xf32, #tpu.memory_space<vmem>>, vector<1x8x256xf32>
    %383 = vector.shape_cast %382 : vector<1x8x256xf32> to vector<8x256xf32>
    %384 = arith.index_cast %379 : i32 to index
    %c0_156 = arith.constant 0 : index
    %c0_157 = arith.constant 0 : index
    %385 = vector.load %arg16[%384, %c0_156, %c0_157] : memref<8x8x256xf32, #tpu.memory_space<vmem>>, vector<1x8x256xf32>
    %386 = vector.shape_cast %385 : vector<1x8x256xf32> to vector<8x256xf32>
    %387 = arith.select %24, %383, %386 : vector<8x256xi1>, vector<8x256xf32>
    %388 = arith.addf %387, %380 : vector<8x256xf32>
    %389 = math.tanh %388 : vector<8x256xf32>
    %390 = arith.mulf %389, %2 : vector<8x256xf32>
    %391 = arith.addf %390, %5 : vector<8x256xf32>
    %392 = vector.extract_strided_slice %391 {offsets = [0, 0], sizes = [8, 64], strides = [1, 1]} : vector<8x256xf32> to vector<8x64xf32>
    %393 = vector.extract_strided_slice %391 {offsets = [0, 64], sizes = [8, 64], strides = [1, 1]} : vector<8x256xf32> to vector<8x64xf32>
    %394 = vector.extract_strided_slice %391 {offsets = [0, 128], sizes = [8, 64], strides = [1, 1]} : vector<8x256xf32> to vector<8x64xf32>
    %395 = vector.extract_strided_slice %391 {offsets = [0, 192], sizes = [8, 64], strides = [1, 1]} : vector<8x256xf32> to vector<8x64xf32>
    %396 = arith.mulf %393, %366 : vector<8x64xf32>
    %397 = arith.mulf %392, %394 : vector<8x64xf32>
    %398 = arith.addf %396, %397 : vector<8x64xf32>
    %399 = math.tanh %398 : vector<8x64xf32>
    %400 = arith.mulf %395, %399 : vector<8x64xf32>
    %401 = vector.extract_strided_slice %400 {offsets = [0, 0], sizes = [8, 32], strides = [1, 1]} : vector<8x64xf32> to vector<8x32xf32>
    %402 = arith.index_cast %c2_i32_151 : i32 to index
    %c0_158 = arith.constant 0 : index
    %c0_159 = arith.constant 0 : index
    %403 = vector.load %arg17[%402, %c0_158, %c0_159] : memref<8x8x64xf32, #tpu.memory_space<vmem>>, vector<1x8x32xf32>
    %404 = vector.shape_cast %403 : vector<1x8x32xf32> to vector<8x32xf32>
    %405 = vector.shape_cast %401 : vector<8x32xf32> to vector<1x8x32xf32>
    tpu.vector_store %arg17[%402, %c0_158, %c0_159], %405 {strides = array<i32>} : memref<8x8x64xf32, #tpu.memory_space<vmem>>, vector<1x8x32xf32>,
    %406 = vector.extract_strided_slice %400 {offsets = [0, 32], sizes = [8, 32], strides = [1, 1]} : vector<8x64xf32> to vector<8x32xf32>
    %407 = arith.index_cast %379 : i32 to index
    %c0_160 = arith.constant 0 : index
    %c32_161 = arith.constant 32 : index
    %408 = vector.load %arg17[%407, %c0_160, %c32_161] : memref<8x8x64xf32, #tpu.memory_space<vmem>>, vector<1x8x32xf32>
    %409 = vector.shape_cast %408 : vector<1x8x32xf32> to vector<8x32xf32>
    %410 = vector.shape_cast %406 : vector<8x32xf32> to vector<1x8x32xf32>
    tpu.vector_store %arg17[%407, %c0_160, %c32_161], %410 {strides = array<i32>} : memref<8x8x64xf32, #tpu.memory_space<vmem>>, vector<1x8x32xf32>,
    %c3_i32_162 = arith.constant 3 : i32
    %c7_i32_163 = arith.constant 7 : i32
    %411 = arith.subi %c7_i32_163, %c3_i32_162 : i32
    %cst_164 = arith.constant dense<0.000000e+00> : vector<8x256xf32>
    %412 = tpu.matmul %400, %310, %cst_164 {dimension_numbers = #tpu.dot_dimension_numbers<[1], [0], [0], [1], [0, 0, 1, 1], [], []>} : vector<8x64xf32>, vector<64x256xf32>, vector<8x256xf32> -> vector<8x256xf32>
    %413 = arith.index_cast %c3_i32_162 : i32 to index
    %c0_165 = arith.constant 0 : index
    %c0_166 = arith.constant 0 : index
    %414 = vector.load %arg16[%413, %c0_165, %c0_166] : memref<8x8x256xf32, #tpu.memory_space<vmem>>, vector<1x8x256xf32>
    %415 = vector.shape_cast %414 : vector<1x8x256xf32> to vector<8x256xf32>
    %416 = arith.index_cast %411 : i32 to index
    %c0_167 = arith.constant 0 : index
    %c0_168 = arith.constant 0 : index
    %417 = vector.load %arg16[%416, %c0_167, %c0_168] : memref<8x8x256xf32, #tpu.memory_space<vmem>>, vector<1x8x256xf32>
    %418 = vector.shape_cast %417 : vector<1x8x256xf32> to vector<8x256xf32>
    %419 = arith.select %24, %415, %418 : vector<8x256xi1>, vector<8x256xf32>
    %420 = arith.addf %419, %412 : vector<8x256xf32>
    %421 = math.tanh %420 : vector<8x256xf32>
    %422 = arith.mulf %421, %2 : vector<8x256xf32>
    %423 = arith.addf %422, %5 : vector<8x256xf32>
    %424 = vector.extract_strided_slice %423 {offsets = [0, 0], sizes = [8, 64], strides = [1, 1]} : vector<8x256xf32> to vector<8x64xf32>
    %425 = vector.extract_strided_slice %423 {offsets = [0, 64], sizes = [8, 64], strides = [1, 1]} : vector<8x256xf32> to vector<8x64xf32>
    %426 = vector.extract_strided_slice %423 {offsets = [0, 128], sizes = [8, 64], strides = [1, 1]} : vector<8x256xf32> to vector<8x64xf32>
    %427 = vector.extract_strided_slice %423 {offsets = [0, 192], sizes = [8, 64], strides = [1, 1]} : vector<8x256xf32> to vector<8x64xf32>
    %428 = arith.mulf %425, %398 : vector<8x64xf32>
    %429 = arith.mulf %424, %426 : vector<8x64xf32>
    %430 = arith.addf %428, %429 : vector<8x64xf32>
    %431 = math.tanh %430 : vector<8x64xf32>
    %432 = arith.mulf %427, %431 : vector<8x64xf32>
    %433 = vector.extract_strided_slice %432 {offsets = [0, 0], sizes = [8, 32], strides = [1, 1]} : vector<8x64xf32> to vector<8x32xf32>
    %434 = arith.index_cast %c3_i32_162 : i32 to index
    %c0_169 = arith.constant 0 : index
    %c0_170 = arith.constant 0 : index
    %435 = vector.load %arg17[%434, %c0_169, %c0_170] : memref<8x8x64xf32, #tpu.memory_space<vmem>>, vector<1x8x32xf32>
    %436 = vector.shape_cast %435 : vector<1x8x32xf32> to vector<8x32xf32>
    %437 = vector.shape_cast %433 : vector<8x32xf32> to vector<1x8x32xf32>
    tpu.vector_store %arg17[%434, %c0_169, %c0_170], %437 {strides = array<i32>} : memref<8x8x64xf32, #tpu.memory_space<vmem>>, vector<1x8x32xf32>,
    %438 = vector.extract_strided_slice %432 {offsets = [0, 32], sizes = [8, 32], strides = [1, 1]} : vector<8x64xf32> to vector<8x32xf32>
    %439 = arith.index_cast %411 : i32 to index
    %c0_171 = arith.constant 0 : index
    %c32_172 = arith.constant 32 : index
    %440 = vector.load %arg17[%439, %c0_171, %c32_172] : memref<8x8x64xf32, #tpu.memory_space<vmem>>, vector<1x8x32xf32>
    %441 = vector.shape_cast %440 : vector<1x8x32xf32> to vector<8x32xf32>
    %442 = vector.shape_cast %438 : vector<8x32xf32> to vector<1x8x32xf32>
    tpu.vector_store %arg17[%439, %c0_171, %c32_172], %442 {strides = array<i32>} : memref<8x8x64xf32, #tpu.memory_space<vmem>>, vector<1x8x32xf32>,
    %c4_i32_173 = arith.constant 4 : i32
    %c7_i32_174 = arith.constant 7 : i32
    %443 = arith.subi %c7_i32_174, %c4_i32_173 : i32
    %cst_175 = arith.constant dense<0.000000e+00> : vector<8x256xf32>
    %444 = tpu.matmul %432, %310, %cst_175 {dimension_numbers = #tpu.dot_dimension_numbers<[1], [0], [0], [1], [0, 0, 1, 1], [], []>} : vector<8x64xf32>, vector<64x256xf32>, vector<8x256xf32> -> vector<8x256xf32>
    %445 = arith.index_cast %c4_i32_173 : i32 to index
    %c0_176 = arith.constant 0 : index
    %c0_177 = arith.constant 0 : index
    %446 = vector.load %arg16[%445, %c0_176, %c0_177] : memref<8x8x256xf32, #tpu.memory_space<vmem>>, vector<1x8x256xf32>
    %447 = vector.shape_cast %446 : vector<1x8x256xf32> to vector<8x256xf32>
    %448 = arith.index_cast %443 : i32 to index
    %c0_178 = arith.constant 0 : index
    %c0_179 = arith.constant 0 : index
    %449 = vector.load %arg16[%448, %c0_178, %c0_179] : memref<8x8x256xf32, #tpu.memory_space<vmem>>, vector<1x8x256xf32>
    %450 = vector.shape_cast %449 : vector<1x8x256xf32> to vector<8x256xf32>
    %451 = arith.select %24, %447, %450 : vector<8x256xi1>, vector<8x256xf32>
    %452 = arith.addf %451, %444 : vector<8x256xf32>
    %453 = math.tanh %452 : vector<8x256xf32>
    %454 = arith.mulf %453, %2 : vector<8x256xf32>
    %455 = arith.addf %454, %5 : vector<8x256xf32>
    %456 = vector.extract_strided_slice %455 {offsets = [0, 0], sizes = [8, 64], strides = [1, 1]} : vector<8x256xf32> to vector<8x64xf32>
    %457 = vector.extract_strided_slice %455 {offsets = [0, 64], sizes = [8, 64], strides = [1, 1]} : vector<8x256xf32> to vector<8x64xf32>
    %458 = vector.extract_strided_slice %455 {offsets = [0, 128], sizes = [8, 64], strides = [1, 1]} : vector<8x256xf32> to vector<8x64xf32>
    %459 = vector.extract_strided_slice %455 {offsets = [0, 192], sizes = [8, 64], strides = [1, 1]} : vector<8x256xf32> to vector<8x64xf32>
    %460 = arith.mulf %457, %430 : vector<8x64xf32>
    %461 = arith.mulf %456, %458 : vector<8x64xf32>
    %462 = arith.addf %460, %461 : vector<8x64xf32>
    %463 = math.tanh %462 : vector<8x64xf32>
    %464 = arith.mulf %459, %463 : vector<8x64xf32>
    %465 = vector.extract_strided_slice %464 {offsets = [0, 0], sizes = [8, 32], strides = [1, 1]} : vector<8x64xf32> to vector<8x32xf32>
    %466 = arith.index_cast %c4_i32_173 : i32 to index
    %c0_180 = arith.constant 0 : index
    %c0_181 = arith.constant 0 : index
    %467 = vector.load %arg17[%466, %c0_180, %c0_181] : memref<8x8x64xf32, #tpu.memory_space<vmem>>, vector<1x8x32xf32>
    %468 = vector.shape_cast %467 : vector<1x8x32xf32> to vector<8x32xf32>
    %469 = vector.shape_cast %465 : vector<8x32xf32> to vector<1x8x32xf32>
    tpu.vector_store %arg17[%466, %c0_180, %c0_181], %469 {strides = array<i32>} : memref<8x8x64xf32, #tpu.memory_space<vmem>>, vector<1x8x32xf32>,
    %470 = vector.extract_strided_slice %464 {offsets = [0, 32], sizes = [8, 32], strides = [1, 1]} : vector<8x64xf32> to vector<8x32xf32>
    %471 = arith.index_cast %443 : i32 to index
    %c0_182 = arith.constant 0 : index
    %c32_183 = arith.constant 32 : index
    %472 = vector.load %arg17[%471, %c0_182, %c32_183] : memref<8x8x64xf32, #tpu.memory_space<vmem>>, vector<1x8x32xf32>
    %473 = vector.shape_cast %472 : vector<1x8x32xf32> to vector<8x32xf32>
    %474 = vector.shape_cast %470 : vector<8x32xf32> to vector<1x8x32xf32>
    tpu.vector_store %arg17[%471, %c0_182, %c32_183], %474 {strides = array<i32>} : memref<8x8x64xf32, #tpu.memory_space<vmem>>, vector<1x8x32xf32>,
    %c5_i32_184 = arith.constant 5 : i32
    %c7_i32_185 = arith.constant 7 : i32
    %475 = arith.subi %c7_i32_185, %c5_i32_184 : i32
    %cst_186 = arith.constant dense<0.000000e+00> : vector<8x256xf32>
    %476 = tpu.matmul %464, %310, %cst_186 {dimension_numbers = #tpu.dot_dimension_numbers<[1], [0], [0], [1], [0, 0, 1, 1], [], []>} : vector<8x64xf32>, vector<64x256xf32>, vector<8x256xf32> -> vector<8x256xf32>
    %477 = arith.index_cast %c5_i32_184 : i32 to index
    %c0_187 = arith.constant 0 : index
    %c0_188 = arith.constant 0 : index
    %478 = vector.load %arg16[%477, %c0_187, %c0_188] : memref<8x8x256xf32, #tpu.memory_space<vmem>>, vector<1x8x256xf32>
    %479 = vector.shape_cast %478 : vector<1x8x256xf32> to vector<8x256xf32>
    %480 = arith.index_cast %475 : i32 to index
    %c0_189 = arith.constant 0 : index
    %c0_190 = arith.constant 0 : index
    %481 = vector.load %arg16[%480, %c0_189, %c0_190] : memref<8x8x256xf32, #tpu.memory_space<vmem>>, vector<1x8x256xf32>
    %482 = vector.shape_cast %481 : vector<1x8x256xf32> to vector<8x256xf32>
    %483 = arith.select %24, %479, %482 : vector<8x256xi1>, vector<8x256xf32>
    %484 = arith.addf %483, %476 : vector<8x256xf32>
    %485 = math.tanh %484 : vector<8x256xf32>
    %486 = arith.mulf %485, %2 : vector<8x256xf32>
    %487 = arith.addf %486, %5 : vector<8x256xf32>
    %488 = vector.extract_strided_slice %487 {offsets = [0, 0], sizes = [8, 64], strides = [1, 1]} : vector<8x256xf32> to vector<8x64xf32>
    %489 = vector.extract_strided_slice %487 {offsets = [0, 64], sizes = [8, 64], strides = [1, 1]} : vector<8x256xf32> to vector<8x64xf32>
    %490 = vector.extract_strided_slice %487 {offsets = [0, 128], sizes = [8, 64], strides = [1, 1]} : vector<8x256xf32> to vector<8x64xf32>
    %491 = vector.extract_strided_slice %487 {offsets = [0, 192], sizes = [8, 64], strides = [1, 1]} : vector<8x256xf32> to vector<8x64xf32>
    %492 = arith.mulf %489, %462 : vector<8x64xf32>
    %493 = arith.mulf %488, %490 : vector<8x64xf32>
    %494 = arith.addf %492, %493 : vector<8x64xf32>
    %495 = math.tanh %494 : vector<8x64xf32>
    %496 = arith.mulf %491, %495 : vector<8x64xf32>
    %497 = vector.extract_strided_slice %496 {offsets = [0, 0], sizes = [8, 32], strides = [1, 1]} : vector<8x64xf32> to vector<8x32xf32>
    %498 = arith.index_cast %c5_i32_184 : i32 to index
    %c0_191 = arith.constant 0 : index
    %c0_192 = arith.constant 0 : index
    %499 = vector.load %arg17[%498, %c0_191, %c0_192] : memref<8x8x64xf32, #tpu.memory_space<vmem>>, vector<1x8x32xf32>
    %500 = vector.shape_cast %499 : vector<1x8x32xf32> to vector<8x32xf32>
    %501 = vector.shape_cast %497 : vector<8x32xf32> to vector<1x8x32xf32>
    tpu.vector_store %arg17[%498, %c0_191, %c0_192], %501 {strides = array<i32>} : memref<8x8x64xf32, #tpu.memory_space<vmem>>, vector<1x8x32xf32>,
    %502 = vector.extract_strided_slice %496 {offsets = [0, 32], sizes = [8, 32], strides = [1, 1]} : vector<8x64xf32> to vector<8x32xf32>
    %503 = arith.index_cast %475 : i32 to index
    %c0_193 = arith.constant 0 : index
    %c32_194 = arith.constant 32 : index
    %504 = vector.load %arg17[%503, %c0_193, %c32_194] : memref<8x8x64xf32, #tpu.memory_space<vmem>>, vector<1x8x32xf32>
    %505 = vector.shape_cast %504 : vector<1x8x32xf32> to vector<8x32xf32>
    %506 = vector.shape_cast %502 : vector<8x32xf32> to vector<1x8x32xf32>
    tpu.vector_store %arg17[%503, %c0_193, %c32_194], %506 {strides = array<i32>} : memref<8x8x64xf32, #tpu.memory_space<vmem>>, vector<1x8x32xf32>,
    %c6_i32_195 = arith.constant 6 : i32
    %c7_i32_196 = arith.constant 7 : i32
    %507 = arith.subi %c7_i32_196, %c6_i32_195 : i32
    %cst_197 = arith.constant dense<0.000000e+00> : vector<8x256xf32>
    %508 = tpu.matmul %496, %310, %cst_197 {dimension_numbers = #tpu.dot_dimension_numbers<[1], [0], [0], [1], [0, 0, 1, 1], [], []>} : vector<8x64xf32>, vector<64x256xf32>, vector<8x256xf32> -> vector<8x256xf32>
    %509 = arith.index_cast %c6_i32_195 : i32 to index
    %c0_198 = arith.constant 0 : index
    %c0_199 = arith.constant 0 : index
    %510 = vector.load %arg16[%509, %c0_198, %c0_199] : memref<8x8x256xf32, #tpu.memory_space<vmem>>, vector<1x8x256xf32>
    %511 = vector.shape_cast %510 : vector<1x8x256xf32> to vector<8x256xf32>
    %512 = arith.index_cast %507 : i32 to index
    %c0_200 = arith.constant 0 : index
    %c0_201 = arith.constant 0 : index
    %513 = vector.load %arg16[%512, %c0_200, %c0_201] : memref<8x8x256xf32, #tpu.memory_space<vmem>>, vector<1x8x256xf32>
    %514 = vector.shape_cast %513 : vector<1x8x256xf32> to vector<8x256xf32>
    %515 = arith.select %24, %511, %514 : vector<8x256xi1>, vector<8x256xf32>
    %516 = arith.addf %515, %508 : vector<8x256xf32>
    %517 = math.tanh %516 : vector<8x256xf32>
    %518 = arith.mulf %517, %2 : vector<8x256xf32>
    %519 = arith.addf %518, %5 : vector<8x256xf32>
    %520 = vector.extract_strided_slice %519 {offsets = [0, 0], sizes = [8, 64], strides = [1, 1]} : vector<8x256xf32> to vector<8x64xf32>
    %521 = vector.extract_strided_slice %519 {offsets = [0, 64], sizes = [8, 64], strides = [1, 1]} : vector<8x256xf32> to vector<8x64xf32>
    %522 = vector.extract_strided_slice %519 {offsets = [0, 128], sizes = [8, 64], strides = [1, 1]} : vector<8x256xf32> to vector<8x64xf32>
    %523 = vector.extract_strided_slice %519 {offsets = [0, 192], sizes = [8, 64], strides = [1, 1]} : vector<8x256xf32> to vector<8x64xf32>
    %524 = arith.mulf %521, %494 : vector<8x64xf32>
    %525 = arith.mulf %520, %522 : vector<8x64xf32>
    %526 = arith.addf %524, %525 : vector<8x64xf32>
    %527 = math.tanh %526 : vector<8x64xf32>
    %528 = arith.mulf %523, %527 : vector<8x64xf32>
    %529 = vector.extract_strided_slice %528 {offsets = [0, 0], sizes = [8, 32], strides = [1, 1]} : vector<8x64xf32> to vector<8x32xf32>
    %530 = arith.index_cast %c6_i32_195 : i32 to index
    %c0_202 = arith.constant 0 : index
    %c0_203 = arith.constant 0 : index
    %531 = vector.load %arg17[%530, %c0_202, %c0_203] : memref<8x8x64xf32, #tpu.memory_space<vmem>>, vector<1x8x32xf32>
    %532 = vector.shape_cast %531 : vector<1x8x32xf32> to vector<8x32xf32>
    %533 = vector.shape_cast %529 : vector<8x32xf32> to vector<1x8x32xf32>
    tpu.vector_store %arg17[%530, %c0_202, %c0_203], %533 {strides = array<i32>} : memref<8x8x64xf32, #tpu.memory_space<vmem>>, vector<1x8x32xf32>,
    %534 = vector.extract_strided_slice %528 {offsets = [0, 32], sizes = [8, 32], strides = [1, 1]} : vector<8x64xf32> to vector<8x32xf32>
    %535 = arith.index_cast %507 : i32 to index
    %c0_204 = arith.constant 0 : index
    %c32_205 = arith.constant 32 : index
    %536 = vector.load %arg17[%535, %c0_204, %c32_205] : memref<8x8x64xf32, #tpu.memory_space<vmem>>, vector<1x8x32xf32>
    %537 = vector.shape_cast %536 : vector<1x8x32xf32> to vector<8x32xf32>
    %538 = vector.shape_cast %534 : vector<8x32xf32> to vector<1x8x32xf32>
    tpu.vector_store %arg17[%535, %c0_204, %c32_205], %538 {strides = array<i32>} : memref<8x8x64xf32, #tpu.memory_space<vmem>>, vector<1x8x32xf32>,
    %c7_i32_206 = arith.constant 7 : i32
    %c7_i32_207 = arith.constant 7 : i32
    %539 = arith.subi %c7_i32_207, %c7_i32_206 : i32
    %cst_208 = arith.constant dense<0.000000e+00> : vector<8x256xf32>
    %540 = tpu.matmul %528, %310, %cst_208 {dimension_numbers = #tpu.dot_dimension_numbers<[1], [0], [0], [1], [0, 0, 1, 1], [], []>} : vector<8x64xf32>, vector<64x256xf32>, vector<8x256xf32> -> vector<8x256xf32>
    %541 = arith.index_cast %c7_i32_206 : i32 to index
    %c0_209 = arith.constant 0 : index
    %c0_210 = arith.constant 0 : index
    %542 = vector.load %arg16[%541, %c0_209, %c0_210] : memref<8x8x256xf32, #tpu.memory_space<vmem>>, vector<1x8x256xf32>
    %543 = vector.shape_cast %542 : vector<1x8x256xf32> to vector<8x256xf32>
    %544 = arith.index_cast %539 : i32 to index
    %c0_211 = arith.constant 0 : index
    %c0_212 = arith.constant 0 : index
    %545 = vector.load %arg16[%544, %c0_211, %c0_212] : memref<8x8x256xf32, #tpu.memory_space<vmem>>, vector<1x8x256xf32>
    %546 = vector.shape_cast %545 : vector<1x8x256xf32> to vector<8x256xf32>
    %547 = arith.select %24, %543, %546 : vector<8x256xi1>, vector<8x256xf32>
    %548 = arith.addf %547, %540 : vector<8x256xf32>
    %549 = math.tanh %548 : vector<8x256xf32>
    %550 = arith.mulf %549, %2 : vector<8x256xf32>
    %551 = arith.addf %550, %5 : vector<8x256xf32>
    %552 = vector.extract_strided_slice %551 {offsets = [0, 0], sizes = [8, 64], strides = [1, 1]} : vector<8x256xf32> to vector<8x64xf32>
    %553 = vector.extract_strided_slice %551 {offsets = [0, 64], sizes = [8, 64], strides = [1, 1]} : vector<8x256xf32> to vector<8x64xf32>
    %554 = vector.extract_strided_slice %551 {offsets = [0, 128], sizes = [8, 64], strides = [1, 1]} : vector<8x256xf32> to vector<8x64xf32>
    %555 = vector.extract_strided_slice %551 {offsets = [0, 192], sizes = [8, 64], strides = [1, 1]} : vector<8x256xf32> to vector<8x64xf32>
    %556 = arith.mulf %553, %526 : vector<8x64xf32>
    %557 = arith.mulf %552, %554 : vector<8x64xf32>
    %558 = arith.addf %556, %557 : vector<8x64xf32>
    %559 = math.tanh %558 : vector<8x64xf32>
    %560 = arith.mulf %555, %559 : vector<8x64xf32>
    %561 = vector.extract_strided_slice %560 {offsets = [0, 0], sizes = [8, 32], strides = [1, 1]} : vector<8x64xf32> to vector<8x32xf32>
    %562 = arith.index_cast %c7_i32_206 : i32 to index
    %c0_213 = arith.constant 0 : index
    %c0_214 = arith.constant 0 : index
    %563 = vector.load %arg17[%562, %c0_213, %c0_214] : memref<8x8x64xf32, #tpu.memory_space<vmem>>, vector<1x8x32xf32>
    %564 = vector.shape_cast %563 : vector<1x8x32xf32> to vector<8x32xf32>
    %565 = vector.shape_cast %561 : vector<8x32xf32> to vector<1x8x32xf32>
    tpu.vector_store %arg17[%562, %c0_213, %c0_214], %565 {strides = array<i32>} : memref<8x8x64xf32, #tpu.memory_space<vmem>>, vector<1x8x32xf32>,
    %566 = vector.extract_strided_slice %560 {offsets = [0, 32], sizes = [8, 32], strides = [1, 1]} : vector<8x64xf32> to vector<8x32xf32>
    %567 = arith.index_cast %539 : i32 to index
    %c0_215 = arith.constant 0 : index
    %c32_216 = arith.constant 32 : index
    %568 = vector.load %arg17[%567, %c0_215, %c32_216] : memref<8x8x64xf32, #tpu.memory_space<vmem>>, vector<1x8x32xf32>
    %569 = vector.shape_cast %568 : vector<1x8x32xf32> to vector<8x32xf32>
    %570 = vector.shape_cast %566 : vector<8x32xf32> to vector<1x8x32xf32>
    tpu.vector_store %arg17[%567, %c0_215, %c32_216], %570 {strides = array<i32>} : memref<8x8x64xf32, #tpu.memory_space<vmem>>, vector<1x8x32xf32>,
    %c8_i32_217 = arith.constant 8 : i32
    %c1_218 = arith.constant 1 : index
    %c0_219 = arith.constant 0 : index
    %c0_220 = arith.constant 0 : index
    %571 = vector.load %arg14[%c1_218, %c0_219, %c0_220] : memref<2x8x64xf32, #tpu.memory_space<vmem>>, vector<1x8x64xf32>
    %572 = vector.shape_cast %571 : vector<1x8x64xf32> to vector<8x64xf32>
    %573 = vector.shape_cast %560 : vector<8x64xf32> to vector<1x8x64xf32>
    tpu.vector_store %arg14[%c1_218, %c0_219, %c0_220], %573 {strides = array<i32>} : memref<2x8x64xf32, #tpu.memory_space<vmem>>, vector<1x8x64xf32>,
    %c1_221 = arith.constant 1 : index
    %c0_222 = arith.constant 0 : index
    %c0_223 = arith.constant 0 : index
    %574 = vector.load %arg15[%c1_221, %c0_222, %c0_223] : memref<2x8x64xf32, #tpu.memory_space<vmem>>, vector<1x8x64xf32>
    %575 = vector.shape_cast %574 : vector<1x8x64xf32> to vector<8x64xf32>
    %576 = vector.shape_cast %558 : vector<8x64xf32> to vector<1x8x64xf32>
    tpu.vector_store %arg15[%c1_221, %c0_222, %c0_223], %576 {strides = array<i32>} : memref<2x8x64xf32, #tpu.memory_space<vmem>>, vector<1x8x64xf32>,
    %c0_224 = arith.constant 0 : index
    %c0_225 = arith.constant 0 : index
    %c0_226 = arith.constant 0 : index
    %577 = vector.load %arg17[%c0_224, %c0_225, %c0_226] : memref<8x8x64xf32, #tpu.memory_space<vmem>>, vector<8x8x64xf32>
    %578 = vector.shape_cast %577 : vector<8x8x64xf32> to vector<64x64xf32>
    %c0_227 = arith.constant 0 : index
    %c0_228 = arith.constant 0 : index
    %579 = vector.load %arg11[%c0_227, %c0_228] : memref<64x128xf32, #tpu.memory_space<vmem>>, vector<64x128xf32>
    %cst_229 = arith.constant dense<0.000000e+00> : vector<64x128xf32>
    %580 = tpu.matmul %578, %579, %cst_229 {dimension_numbers = #tpu.dot_dimension_numbers<[1], [0], [0], [1], [0, 0, 1, 1], [], []>} : vector<64x64xf32>, vector<64x128xf32>, vector<64x128xf32> -> vector<64x128xf32>
    %c0_230 = arith.constant 0 : index
    %c0_231 = arith.constant 0 : index
    %581 = vector.load %arg12[%c0_230, %c0_231] : memref<1x128xf32, #tpu.memory_space<vmem>>, vector<1x128xf32>
    %582 = vector.broadcast %581 : vector<1x128xf32> to vector<64x128xf32>
    %583 = arith.addf %580, %582 : vector<64x128xf32>
    %584 = vector.shape_cast %583 : vector<64x128xf32> to vector<8x8x128xf32>
    %c0_232 = arith.constant 0 : index
    %c0_233 = arith.constant 0 : index
    %c0_234 = arith.constant 0 : index
    %585 = vector.load %arg13[%c0_232, %c0_233, %c0_234] : memref<8x8x128xf32, #tpu.memory_space<vmem>>, vector<8x8x128xf32>
    tpu.vector_store %arg13[%c0_232, %c0_233, %c0_234], %584 {strides = array<i32>} : memref<8x8x128xf32, #tpu.memory_space<vmem>>, vector<8x8x128xf32>,
    return
  }
  func.func @transform_0(%arg0: i32) -> (i32, i32, i32) {
    %c0_i32 = arith.constant 0 : i32
    %c0_i32_0 = arith.constant 0 : i32
    %c0_i32_1 = arith.constant 0 : i32
    %c0_i32_2 = arith.constant 0 : i32
    return %c0_i32, %c0_i32_0, %c0_i32_1 : i32, i32, i32
  }
  func.func @transform_1(%arg0: i32) -> (i32, i32) {
    %c0_i32 = arith.constant 0 : i32
    %c0_i32_0 = arith.constant 0 : i32
    %c0_i32_1 = arith.constant 0 : i32
    return %c0_i32, %c0_i32_0 : i32, i32
  }
  func.func @transform_2(%arg0: i32) -> (i32, i32) {
    %c0_i32 = arith.constant 0 : i32
    %c0_i32_0 = arith.constant 0 : i32
    %c0_i32_1 = arith.constant 0 : i32
    return %c0_i32, %c0_i32_0 : i32, i32
  }
  func.func @transform_3(%arg0: i32) -> (i32, i32) {
    %c0_i32 = arith.constant 0 : i32
    %c0_i32_0 = arith.constant 0 : i32
    %c0_i32_1 = arith.constant 0 : i32
    return %c0_i32, %c0_i32_0 : i32, i32
  }
  func.func @transform_4(%arg0: i32) -> (i32, i32) {
    %c0_i32 = arith.constant 0 : i32
    %c0_i32_0 = arith.constant 0 : i32
    %c0_i32_1 = arith.constant 0 : i32
    return %c0_i32, %c0_i32_0 : i32, i32
  }
  func.func @transform_5(%arg0: i32) -> (i32, i32) {
    %c0_i32 = arith.constant 0 : i32
    %c0_i32_0 = arith.constant 0 : i32
    %c0_i32_1 = arith.constant 0 : i32
    return %c0_i32, %c0_i32_0 : i32, i32
  }
  func.func @transform_6(%arg0: i32) -> (i32, i32) {
    %c0_i32 = arith.constant 0 : i32
    %c0_i32_0 = arith.constant 0 : i32
    %c0_i32_1 = arith.constant 0 : i32
    return %c0_i32, %c0_i32_0 : i32, i32
  }
  func.func @transform_7(%arg0: i32) -> (i32, i32) {
    %c0_i32 = arith.constant 0 : i32
    %c0_i32_0 = arith.constant 0 : i32
    %c0_i32_1 = arith.constant 0 : i32
    return %c0_i32, %c0_i32_0 : i32, i32
  }
  func.func @transform_8(%arg0: i32) -> (i32, i32, i32) {
    %c0_i32 = arith.constant 0 : i32
    %c0_i32_0 = arith.constant 0 : i32
    %c0_i32_1 = arith.constant 0 : i32
    %c0_i32_2 = arith.constant 0 : i32
    return %c0_i32, %c0_i32_0, %c0_i32_1 : i32, i32, i32
  }
  func.func @transform_9(%arg0: i32) -> (i32, i32, i32) {
    %c0_i32 = arith.constant 0 : i32
    %c0_i32_0 = arith.constant 0 : i32
    %c0_i32_1 = arith.constant 0 : i32
    %c0_i32_2 = arith.constant 0 : i32
    return %c0_i32, %c0_i32_0, %c0_i32_1 : i32, i32, i32
  }
  func.func @transform_10(%arg0: i32) -> (i32, i32) {
    %c0_i32 = arith.constant 0 : i32
    %c0_i32_0 = arith.constant 0 : i32
    %c0_i32_1 = arith.constant 0 : i32
    return %c0_i32, %c0_i32_0 : i32, i32
  }
  func.func @transform_11(%arg0: i32) -> (i32, i32) {
    %c0_i32 = arith.constant 0 : i32
    %c0_i32_0 = arith.constant 0 : i32
    %c0_i32_1 = arith.constant 0 : i32
    return %c0_i32, %c0_i32_0 : i32, i32
  }
  func.func @transform_12(%arg0: i32) -> (i32, i32, i32) {
    %c0_i32 = arith.constant 0 : i32
    %c0_i32_0 = arith.constant 0 : i32
    %c0_i32_1 = arith.constant 0 : i32
    %c0_i32_2 = arith.constant 0 : i32
    return %c0_i32, %c0_i32_0, %c0_i32_1 : i32, i32, i32
  }
  func.func @transform_13(%arg0: i32) -> (i32, i32, i32) {
    %c0_i32 = arith.constant 0 : i32
    %c0_i32_0 = arith.constant 0 : i32
    %c0_i32_1 = arith.constant 0 : i32
    %c0_i32_2 = arith.constant 0 : i32
    return %c0_i32, %c0_i32_0, %c0_i32_1 : i32, i32, i32
  }
  func.func @transform_14(%arg0: i32) -> (i32, i32, i32) {
    %c0_i32 = arith.constant 0 : i32
    %c0_i32_0 = arith.constant 0 : i32
    %c0_i32_1 = arith.constant 0 : i32
    %c0_i32_2 = arith.constant 0 : i32
    return %c0_i32, %c0_i32_0, %c0_i32_1 : i32, i32, i32
  }
}

</mosaic_0001>

<bundles_post_ra>
// kernel: generator_forward.1
= control target key start
LH: loop header
LB: loop body
LE: loop exit
PB: predicated region body
PF: predicated region fallthrough
CT: control target
= control target key end

     0   :  { %20 = vsyncpa [#allocation5], 0  ;;  %s3133_s0 = inlined_call_operand.vmem [shape: f32[8,8,32], index: 0, kind: input, shape index: {}]   ;;  %s3134_s1 = inlined_call_operand.vmem [shape: f32[32,256], index: 1, kind: input, shape index: {}]   ;;  %s3135_s2 = inlined_call_operand.vmem [shape: f32[64,256], index: 2, kind: input, shape index: {}]   ;;  %s3136_s3 = inlined_call_operand.vmem [shape: f32[1,256], index: 3, kind: input, shape index: {}]   ;;  %s3137_s4 = inlined_call_operand.hbm [shape: f32[64,256], index: 4, kind: input, shape index: {}]   ;;  %s3138_s5 = inlined_call_operand.hbm [shape: f32[64,256], index: 5, kind: input, shape index: {}]   ;;  %s3139_s6 = inlined_call_operand.vmem [shape: f32[1,256], index: 6, kind: input, shape index: {}]   ;;  %s3140_s7 = inlined_call_operand.vmem [shape: f32[2,256], index: 7, kind: input, shape index: {}]   ;;  %s3141_s8 = inlined_call_operand.vmem [shape: f32[2,8,64], index: 8, kind: input, shape index: {}]   ;;  %s3142_s9 = inlined_call_operand.vmem [shape: f32[2,8,64], index: 9, kind: input, shape index: {}]   ;;  %s3143_s10 = inlined_call_operand.vmem [shape: f32[64,128], index: 10, kind: input, shape index: {}]   ;;  %s3144_s11 = inlined_call_operand.vmem [shape: f32[1,128], index: 11, kind: input, shape index: {}]   ;;  %s3145_s12 = inlined_call_operand.vmem [shape: f32[8,8,128], index: 12, kind: output, shape index: {0}]   ;;  %s3146_s13 = inlined_call_operand.vmem [shape: f32[2,8,64], index: 13, kind: output, shape index: {1}]   ;;  %s3147_s14 = inlined_call_operand.vmem [shape: f32[2,8,64], index: 14, kind: output, shape index: {2}]  }
   0x1   :  { %s34_s15 = sshll.u32 %s3137_s4, 4  ;;  %s35_s15 = int_to_ptr.hbm [resolvable:$true] %s34_s15 }
   0x2   :  { %21 = vsyncpa [#allocation7], 0  ;;  %s1975_s16 = smov [#allocation4]   ;;  %s47_s20 = sshll.u32 %s3138_s5, 4  ;;  %s48_s20 = int_to_ptr.hbm [resolvable:$true] %s47_s20 }
   0x3   :  { %s36_s17 = sshll.u32 %s1975_s16, 4  ;;  %s1976_s21 = smov 256   ;;  %s37_s17 = int_to_ptr.vmem [resolvable:$true] %s36_s17 }
   0x4   :  { %s1977_s22 = smov 16   ;;  %s1978_s23 = smov [#allocation6]  }
   0x5   :  { %42 = dma.hbm_to_vmem [thread:$0]  %s35_s15, 2048, %s37_s17, [#allocation5], %s1976_s21, %s1976_s21, %s1977_s22  }
   0x6   :  { %s49_s24 = sshll.u32 %s1978_s23, 4  ;;  %s50_s24 = int_to_ptr.vmem [resolvable:$true] %s49_s24 }
   0x7   :  { %55 = dma.hbm_to_vmem [thread:$0]  %s48_s20, 2048, %s50_s24, [#allocation7], %s1976_s21, %s1976_s21, %s1977_s22  }
   0x8   :  { %1971 = dma.done.wait [#allocation5], 2048  }
   0x9   :  { %1972 = vsyncadd [#allocation5], 4294965248 }
   0xa   :  { %1973 = dma.done.wait [#allocation7], 2048  }
   0xb   :  { %1974 = vsyncadd [#allocation7], 4294965248  ;;  %v132_v0 = vld [vmem:[%s3134_s1 + $0x30] sm:$0xff]  ;;  %v130_v1 = vld [vmem:[%s3134_s1 + $0x20] sm:$0xff]  ;;  %vm140_vm0 = vcmask 261120   ;;  %s1979_s20 = smov 64   ;;  %v89_v34 = vlaneseq }
   0xc   :  { %177 = vmatpush.msra.mxu1 %v132_v0  ;;  %1813 = vmatpush.msra.mxu2 %v132_v0  ;;  %v128_v2 = vld [vmem:[%s3134_s1 + $0x10] sm:$0xff]  ;;  %v126_v3 = vld [vmem:[%s3134_s1] sm:$0xff]  ;;  %v2086_v6 = vld [vmem:[%s3133_s0 + $0x18] sm:$0xff]  ;;  %vm281_vm1 = vcmask 523264   ;;  %vm359_vm4 = vcmask 523520  }
   0xd   :  { %1814 = vmatpush.msra.mxu3 %v132_v0  ;;  %v2076_v4 = vld [vmem:[%s3133_s0] sm:$0xff]  ;;  %v2081_v5 = vld [vmem:[%s3135_s2 + $0x70] sm:$0xff]  ;;  %v133_v8 = vld [vmem:[%s3134_s1 + $0x38] sm:$0xff]  ;;  %v90_v36 = vand.u32 127, %v89_v34 }
   0xe   :  { %178 = vmatpush.msra.mxu1 %v130_v1  ;;  %1815 = vmatpush.msra.mxu2 %v130_v1  ;;  %v2091_v7 = vld [vmem:[%s3133_s0 + $0x30] sm:$0xff]  ;;  %v131_v9 = vld [vmem:[%s3134_s1 + $0x28] sm:$0xff]  ;;  %v2109_v10 = vld [vmem:[%s3135_s2 + $0x60] sm:$0xff] }
   0xf   :  { %1816 = vmatpush.msra.mxu3 %v130_v1  ;;  %596 = vmatpush.msra.mxu0 %v2081_v5  ;;  %v129_v11 = vld [vmem:[%s3134_s1 + $0x18] sm:$0xff]  ;;  %v2118_v12 = vld [vmem:[%s3135_s2 + $0x50] sm:$0xff]  ;;  %v119_v13 = vld [vmem:[%s3133_s0 + $0x8] sm:$0xff]  ;;  %v96_v38 = vand.u32 63, %v90_v36 }
  0x10   :  { %179 = vmatpush.msra.mxu1 %v128_v2  ;;  %1817 = vmatpush.msra.mxu2 %v128_v2  ;;  %v2128_v14 = vld [vmem:[%s3135_s2 + $0x40] sm:$0xff]  ;;  %v2139_v16 = vld [vmem:[%s3133_s0 + $0x38] sm:$0xff]  ;;  %v2145_v17 = vld [vmem:[%s3135_s2 + $0x30] sm:$0xff] }
  0x11   :  { %1818 = vmatpush.msra.mxu3 %v128_v2  ;;  %597 = vmatpush.msra.mxu0 %v2109_v10  ;;  %v2134_v15 = vld [vmem:[%s3133_s0 + $0x20] sm:$0xff]  ;;  %v127_v18 = vld [vmem:[%s3134_s1 + $0x8] sm:$0xff]  ;;  %v2166_v20 = vld [vmem:[%s3135_s2 + $0x10] sm:$0xff]  ;;  %vm2325_vm2 = vcmp.lt.s32.totalorder %v96_v38, 32 }
  0x12   :  { %180 = vmatpush.msra.mxu1 %v126_v3  ;;  %1819 = vmatpush.msra.mxu2 %v126_v3  ;;  %v2160_v19 = vld [vmem:[%s3135_s2 + $0x20] sm:$0xff]  ;;  %v120_v21 = vld [vmem:[%s3133_s0 + $0x10] sm:$0xff]  ;;  %v2182_v23 = vld [vmem:[%s3133_s0 + $0x28] sm:$0xff] }
  0x13   :  { %1820 = vmatpush.msra.mxu3 %v126_v3  ;;  %1737 = vmatmul.msk.f32.vlgmr.msra.gmra.mxu1 %vm140_vm0, %v2076_v4  ;;  %v2176_v22 = vld [vmem:[%s3135_s2] sm:$0xff]  ;;  %v2209_v26 = vld [vmem:[%s3135_s2 + $0x78] sm:$0xff]  ;;  %v2214_v27 = vld [vmem:[%s3135_s2 + $0x68] sm:$0xff] }
  0x14   :  { %1740 = vmatmul.msk.f32.vlgmr.msra.gmra.mxu2 %vm140_vm0, %v2086_v6  ;;  %1743 = vmatmul.msk.f32.vlgmr.msra.gmra.mxu3 %vm140_vm0, %v2091_v7  ;;  %v280_v24 = vld [vmem:[%s3142_s9] sm:$0xff]  ;;  %v2232_v28 = vld [vmem:[%s3135_s2 + $0x58] sm:$0xff]  ;;  %v2237_v29 = vld [vmem:[%s3135_s2 + $0x48] sm:$0xff] }
  0x15   :  { %218 = vmatpush.msrb.mxu1 %v133_v8  ;;  %293 = vmatpush.msrb.mxu2 %v2081_v5  ;;  %v279_v25 = vld [vmem:[%s3141_s8] sm:$0xff]  ;;  %v2245_v30 = vld [vmem:[%s3135_s2 + $0x38] sm:$0xff]  ;;  %v2254_v31 = vld [vmem:[%s3135_s2 + $0x28] sm:$0xff] }
  0x16   :  { %598 = vmatpush.msra.mxu0 %v2118_v12  ;;  %341 = vrot.lane.b32.xlu0 %v280_v24, %s1979_s20  ;;  %v2267_v32 = vld [vmem:[%s3135_s2 + $0x18] sm:$0xff]  ;;  %v2272_v33 = vld [vmem:[%s3135_s2 + $0x8] sm:$0xff]  ;;  %v134_v37 = vld [vmem:[%s3136_s3] sm:$0x3] }
  0x17   :  { %219 = vmatpush.msrb.mxu1 %v131_v9  ;;  %294 = vmatpush.msrb.mxu2 %v2109_v10  ;;  %v136_v39 = vperm.slane %v134_v37, 0  ;;  %v137_v62 = vperm.slane %v134_v37, 1 }
  0x18   :  { %599 = vmatpush.msra.mxu0 %v2128_v14  ;;  %313 = vmatpush.msrb.mxu3 %v2209_v26 }
  0x19   :  { %220 = vmatpush.msrb.mxu1 %v129_v11  ;;  %295 = vmatpush.msrb.mxu2 %v2118_v12 }
  0x1a   :  { %600 = vmatpush.msra.mxu0 %v2145_v17  ;;  %314 = vmatpush.msrb.mxu3 %v2214_v27 }
  0x1b   :  { %1738 = vmatmul.msk.f32.gmra.mxu1 %vm140_vm0, %v119_v13  ;;  %296 = vmatpush.msrb.mxu2 %v2128_v14 }
  0x1c   :  { %1741 = vmatmul.msk.f32.gmra.mxu2 %vm140_vm0, %v2134_v15  ;;  %1744 = vmatmul.msk.f32.gmra.mxu3 %vm140_vm0, %v2139_v16 }
  0x1d   :  { %297 = vmatpush.msrb.mxu2 %v2145_v17  ;;  %221 = vmatpush.msrb.mxu1 %v127_v18 }
  0x1e   :  { %601 = vmatpush.msra.mxu0 %v2160_v19  ;;  %315 = vmatpush.msrb.mxu3 %v2232_v28 }
  0x1f   :  { %298 = vmatpush.msrb.mxu2 %v2160_v19  ;;  %616 = vmatpush.msra.mxu1 %v2209_v26 }
  0x20   :  { %602 = vmatpush.msra.mxu0 %v2166_v20  ;;  %316 = vmatpush.msrb.mxu3 %v2237_v29 }
  0x21   :  { %299 = vmatpush.msrb.mxu2 %v2166_v20  ;;  %617 = vmatpush.msra.mxu1 %v2214_v27 }
  0x22   :  { %603 = vmatpush.msra.mxu0 %v2176_v22  ;;  %317 = vmatpush.msrb.mxu3 %v2245_v30 }
  0x23   :  { %1739 = vmatmul.msk.f32.gmra.mxu1 %vm140_vm0, %v120_v21  ;;  %300 = vmatpush.msrb.mxu2 %v2176_v22 }
  0x24   :  { %1742 = vmatmul.msk.f32.gmra.mxu2 %vm140_vm0, %v2182_v23  ;;  %738 = vmatpush.msrb.mxu0 %v2081_v5 }
  0x25   :  { %371 = vmatpush.msra.mxu2 %v2081_v5  ;;  %618 = vmatpush.msra.mxu1 %v2232_v28 }
  0x26   :  { %739 = vmatpush.msrb.mxu0 %v2109_v10  ;;  %318 = vmatpush.msrb.mxu3 %v2254_v31 }
  0x27   :  { %372 = vmatpush.msra.mxu2 %v2109_v10  ;;  %619 = vmatpush.msra.mxu1 %v2237_v29 }
  0x28   :  { %740 = vmatpush.msrb.mxu0 %v2118_v12  ;;  %319 = vmatpush.msrb.mxu3 %v2267_v32 }
  0x29   :  { %373 = vmatpush.msra.mxu2 %v2118_v12  ;;  %620 = vmatpush.msra.mxu1 %v2245_v30 }
  0x2a   :  { %741 = vmatpush.msrb.mxu0 %v2128_v14  ;;  %320 = vmatpush.msrb.mxu3 %v2272_v33 }
  0x2b   :  { %1745 = vmatmul.msk.f32.vlgmr.msrb.gmra.mxu1 %vm140_vm0, %v2076_v4  ;;  %374 = vmatpush.msra.mxu2 %v2128_v14 }
  0x2c   :  { %1753 = vmatmul.msk.f32.vlgmr.msrb.gmra.mxu2 %vm281_vm1, %v279_v25  ;;  %742 = vmatpush.msrb.mxu0 %v2145_v17 }
  0x2d   :  { %375 = vmatpush.msra.mxu2 %v2145_v17  ;;  %621 = vmatpush.msra.mxu1 %v2254_v31 }
  0x2e   :  { %743 = vmatpush.msrb.mxu0 %v2160_v19  ;;  %1754 = vmatmul.msk.f32.vlgmr.msrb.gmra.mxu3 %vm281_vm1, %v279_v25 }
  0x2f   :  { %376 = vmatpush.msra.mxu2 %v2160_v19  ;;  %622 = vmatpush.msra.mxu1 %v2267_v32 }
  0x30   :  { %744 = vmatpush.msrb.mxu0 %v2166_v20  ;;  %391 = vmatpush.msra.mxu3 %v2209_v26 }
  0x31   :  { %377 = vmatpush.msra.mxu2 %v2166_v20  ;;  %623 = vmatpush.msra.mxu1 %v2272_v33 }
  0x32   :  { %745 = vmatpush.msrb.mxu0 %v2176_v22  ;;  %392 = vmatpush.msra.mxu3 %v2214_v27 }
  0x33   :  { %1746 = vmatmul.msk.f32.gmra.mxu1 %vm140_vm0, %v119_v13  ;;  %378 = vmatpush.msra.mxu2 %v2176_v22 }
  0x34   :  { %393 = vmatpush.msra.mxu3 %v2232_v28  ;;  %758 = vmatpush.msrb.mxu1 %v2209_v26 }
  0x35   :  { %446 = vmatpush.msrb.mxu2 %v2081_v5 }
  0x36   :  { %394 = vmatpush.msra.mxu3 %v2237_v29  ;;  %759 = vmatpush.msrb.mxu1 %v2214_v27 }
  0x37   :  { %447 = vmatpush.msrb.mxu2 %v2109_v10 }
  0x38   :  { %395 = vmatpush.msra.mxu3 %v2245_v30  ;;  %760 = vmatpush.msrb.mxu1 %v2232_v28 }
  0x39   :  { %448 = vmatpush.msrb.mxu2 %v2118_v12 }
  0x3a   :  { %396 = vmatpush.msra.mxu3 %v2254_v31  ;;  %761 = vmatpush.msrb.mxu1 %v2237_v29 }
  0x3b   :  { %449 = vmatpush.msrb.mxu2 %v2128_v14  ;;  %1747 = vmatmul.msk.f32.gmra.mxu1 %vm140_vm0, %v120_v21 }
  0x3c   :  { %397 = vmatpush.msra.mxu3 %v2267_v32  ;;  %762 = vmatpush.msrb.mxu1 %v2245_v30 }
  0x3d   :  { %450 = vmatpush.msrb.mxu2 %v2145_v17 }
  0x3e   :  { %398 = vmatpush.msra.mxu3 %v2272_v33  ;;  %763 = vmatpush.msrb.mxu1 %v2254_v31 }
  0x3f   :  { %451 = vmatpush.msrb.mxu2 %v2160_v19 }
  0x40   :  { %466 = vmatpush.msrb.mxu3 %v2209_v26  ;;  %764 = vmatpush.msrb.mxu1 %v2267_v32 }
  0x41   :  { %452 = vmatpush.msrb.mxu2 %v2166_v20 }
  0x42   :  { %467 = vmatpush.msrb.mxu3 %v2214_v27  ;;  %765 = vmatpush.msrb.mxu1 %v2272_v33 }
  0x43   :  { %453 = vmatpush.msrb.mxu2 %v2176_v22  ;;  %1748 = vmatmul.msk.f32.gmra.mxu1 %vm140_vm0, %v2086_v6 }
  0x44   :  { %468 = vmatpush.msrb.mxu3 %v2232_v28 }
  0x46   :  { %469 = vmatpush.msrb.mxu3 %v2237_v29 }
  0x48   :  { %470 = vmatpush.msrb.mxu3 %v2245_v30 }
  0x4a   :  { %471 = vmatpush.msrb.mxu3 %v2254_v31 }
  0x4b   :  { %1749 = vmatmul.msk.f32.gmra.mxu1 %vm140_vm0, %v2134_v15 }
  0x4c   :  { %472 = vmatpush.msrb.mxu3 %v2267_v32 }
  0x4e   :  { %473 = vmatpush.msrb.mxu3 %v2272_v33 }
  0x53   :  { %1750 = vmatmul.msk.f32.gmra.mxu1 %vm140_vm0, %v2182_v23 }
  0x5b   :  { %1751 = vmatmul.msk.f32.gmra.mxu1 %vm140_vm0, %v2091_v7  ;;  %v91_v7 = vadd.s32 128, %v90_v36 }
  0x5d   :  { %v103_v9 = vand.u32 63, %v91_v7 }
  0x5f   :  { %vm2375_vm3 = vcmp.lt.s32.totalorder %v103_v9, 32 }
  0x63   :  { %1752 = vmatmul.msk.f32.gmra.mxu1 %vm140_vm0, %v2139_v16 }
  0x90   :  { %v182_v35 = vpop.f32.mrf.mxu1 }
  0x91   :  { %v2339_v51 = vadd.f32 %v182_v35, %v136_v39 }
  0x97   :  { %v191_v40 = vpop.f32.mrf.mxu2  ;;  %v200_v41 = vpop.f32.mrf.mxu3 }
  0x98   :  { %v2321_v42 = vadd.f32 %v191_v40, %v136_v39  ;;  %v2323_v43 = vadd.f32 %v200_v41, %v136_v39  ;;  %v185_v44 = vpop.f32.mrf.mxu1 }
  0x99   :  { %v2329_v46 = vadd.f32 %v185_v44, %v136_v39 }
  0x9b   :  { %v409_v47 = vsel %vm2325_vm2, %v2329_v46, %v2323_v43  ;;  %v774_v48 = vsel %vm2325_vm2, %v2323_v43, %v2329_v46 }
  0x9f   :  { %v194_v49 = vpop.f32.mrf.mxu2  ;;  %v203_v50 = vpop.f32.mrf.mxu3 }
  0xa0   :  { %v2341_v52 = vadd.f32 %v194_v49, %v136_v39  ;;  %v2343_v53 = vadd.f32 %v203_v50, %v136_v39  ;;  %v188_v54 = vpop.f32.mrf.mxu1 }
  0xa1   :  { %v2345_v55 = vadd.f32 %v188_v54, %v136_v39 }
  0xa2   :  { %v559_v1 = vsel %vm2325_vm2, %v2321_v42, %v2341_v52  ;;  %v632_v2 = vsel %vm2325_vm2, %v2341_v52, %v2321_v42 }
  0xa7   :  { %v197_v57 = vpop.f32.mrf.mxu2 }
  0xa8   :  { %v2351_v58 = vadd.f32 %v197_v57, %v136_v39  ;;  %v223_v59 = vpop.f32.mrf.mxu1  ;;  %v330_v39 = vsel %vm2325_vm2, %v2339_v51, %v2343_v53 }
  0xa9   :  { %v2413_v44 = vadd.f32 %v223_v59, %v137_v62 }
  0xaa   :  { %v484_v60 = vsel %vm2325_vm2, %v2345_v55, %v2351_v58  ;;  %v703_v61 = vsel %vm2325_vm2, %v2351_v58, %v2345_v55 }
  0xaf   :  { %v302_v36 = vpop.f32.mrf.mxu2 }
  0xb0   :  { %v226_v63 = vpop.f32.mrf.mxu1  ;;  %v332_v40 = vadd.f32 %v330_v39, %v302_v36 }
  0xb1   :  { %v2361_v0 = vadd.f32 %v226_v63, %v137_v62  ;;  %v322_v50 = vpop.f32.mrf.mxu3  ;;  %v76_v63 = vld [vmem:[%s3140_s7] ss:$2 sm:$0x3] }
  0xb2   :  { %1827 = vtanh.f32 %v332_v40  ;;  %v2433_v7 = vperm.slane %v76_v63, 1 }
  0xb8   :  { %v229_v3 = vpop.f32.mrf.mxu1 }
  0xb9   :  { %v2371_v4 = vadd.f32 %v229_v3, %v137_v62  ;;  %v1828_v3 = vpop.eup %1827 }
  0xc0   :  { %v232_v6 = vpop.f32.mrf.mxu1 }
  0xc1   :  { %v2373_v8 = vadd.f32 %v232_v6, %v137_v62  ;;  %v1736_v6 = vld [vmem:[%s3140_s7 + $0x1] ss:$2 sm:$0x3] }
  0xc2   :  { %v2435_v9 = vperm.slane %v1736_v6, 0 }
  0xc8   :  { %v235_v11 = vpop.f32.mrf.mxu1 }
  0xc9   :  { %v2379_v15 = vadd.f32 %v235_v11, %v137_v62  ;;  %v2437_v11 = vperm.slane %v1736_v6, 1 }
  0xcb   :  { %v560_v16 = vsel %vm2375_vm3, %v2373_v8, %v2379_v15  ;;  %v633_v18 = vsel %vm2375_vm3, %v2379_v15, %v2373_v8 }
  0xd0   :  { %v238_v21 = vpop.f32.mrf.mxu1 }
  0xd1   :  { %v2389_v23 = vadd.f32 %v238_v21, %v137_v62 }
  0xd3   :  { %v485_v24 = vsel %vm2375_vm3, %v2371_v4, %v2389_v23  ;;  %v704_v25 = vsel %vm2375_vm3, %v2389_v23, %v2371_v4 }
  0xd8   :  { %v241_v34 = vpop.f32.mrf.mxu1 }
  0xd9   :  { %v2399_v35 = vadd.f32 %v241_v34, %v137_v62 }
  0xdb   :  { %v410_v37 = vsel %vm2375_vm3, %v2361_v0, %v2399_v35 }
  0xe0   :  { %v244_v41 = vpop.f32.mrf.mxu1 }
  0xe1   :  { %v2415_v49 = vadd.f32 %v244_v41, %v137_v62  ;;  %v2428_v62 = vperm.slane %v76_v63, 0 }
  0xe3   :  { %v331_v54 = vsel %vm2375_vm3, %v2413_v44, %v2415_v49  ;;  %v336_v21 = vmul.f32 %v1828_v3, %v2428_v62 }
  0xe4   :  { %v333_v59 = vadd.f32 %v331_v54, %v322_v50  ;;  %v342_v50 = vpop.permute.xlu0 %341 }
  0xe5   :  { %v338_v39 = vadd.f32 %v336_v21, %v2435_v9 }
  0xe6   :  { %1829 = vtanh.f32 %v333_v59 }
  0xe7   :  { %v344_v54 = vmul.f32 %v342_v50, %v338_v39 }
  0xec   :  { %v1830_v34 = vpop.eup %1829 }
  0xed   :  { %v337_v36 = vmul.f32 %v1830_v34, %v2433_v7 }
  0xef   :  { %v339_v40 = vadd.f32 %v337_v36, %v2437_v11 }
  0xf1   :  { %v345_v41 = vmul.f32 %v339_v40, %v338_v39 }
  0xf3   :  { %347 = vrot.lane.b32.xlu0 %v345_v41, %s1979_s20 }
 0x165   :  { %v348_v63 = vpop.permute.xlu0 %347 }
 0x166   :  { %v350_v59 = vadd.f32 %v348_v63, %v344_v54 }
 0x168   :  { %1831 = vtanh.f32 %v350_v59 }
 0x16e   :  { %v1832_v57 = vpop.eup %1831 }
 0x16f   :  { %v352_v6 = vmul.f32 %v1832_v57, %v339_v40 }
 0x171   :  { %354 = vrot.lane.b32.xlu1 %v352_v6, %s1979_s20 }
 0x1e3   :  { %v355_v3 = vpop.permute.xlu1 %354 }
 0x1e4   :  { %357 = vst.msk [vmem:[#allocation3] sm:$0xff] %vm140_vm0, %v355_v3  ;;  %1755 = vmatmul.msk.f32.vlgmr.msra.gmra.mxu2 %vm281_vm1, %v355_v3  ;;  %1756 = vmatmul.msk.f32.vlgmr.msra.gmra.mxu3 %vm281_vm1, %v355_v3 }
 0x1e5   :  { %360 = vst.msk [vmem:[#allocation3 + $0x38] sm:$0xff] %vm359_vm4, %v355_v3  ;;  %521 = vmatpush.msra.mxu2 %v2081_v5  ;;  %541 = vmatpush.msra.mxu3 %v2209_v26 }
 0x1e7   :  { %522 = vmatpush.msra.mxu2 %v2109_v10  ;;  %542 = vmatpush.msra.mxu3 %v2214_v27 }
 0x1e9   :  { %523 = vmatpush.msra.mxu2 %v2118_v12  ;;  %543 = vmatpush.msra.mxu3 %v2232_v28 }
 0x1eb   :  { %524 = vmatpush.msra.mxu2 %v2128_v14  ;;  %544 = vmatpush.msra.mxu3 %v2237_v29 }
 0x1ed   :  { %525 = vmatpush.msra.mxu2 %v2145_v17  ;;  %545 = vmatpush.msra.mxu3 %v2245_v30 }
 0x1ef   :  { %526 = vmatpush.msra.mxu2 %v2160_v19  ;;  %546 = vmatpush.msra.mxu3 %v2254_v31 }
 0x1f1   :  { %527 = vmatpush.msra.mxu2 %v2166_v20  ;;  %547 = vmatpush.msra.mxu3 %v2267_v32 }
 0x1f3   :  { %528 = vmatpush.msra.mxu2 %v2176_v22  ;;  %548 = vmatpush.msra.mxu3 %v2272_v33 }
 0x267   :  { %v380_v57 = vpop.f32.mrf.mxu2  ;;  %v400_v21 = vpop.f32.mrf.mxu3 }
 0x268   :  { %v411_v34 = vadd.f32 %v409_v47, %v380_v57  ;;  %v412_v36 = vadd.f32 %v410_v37, %v400_v21 }
 0x26a   :  { %1833 = vtanh.f32 %v411_v34 }
 0x26b   :  { %1835 = vtanh.f32 %v412_v36 }
 0x270   :  { %v1834_v39 = vpop.eup %1833 }
 0x271   :  { %v1836_v40 = vpop.eup %1835  ;;  %v415_v41 = vmul.f32 %v1834_v39, %v2428_v62 }
 0x272   :  { %v416_v50 = vmul.f32 %v1836_v40, %v2433_v7 }
 0x273   :  { %v417_v54 = vadd.f32 %v415_v41, %v2435_v9 }
 0x274   :  { %v418_v63 = vadd.f32 %v416_v50, %v2437_v11 }
 0x275   :  { %v419_v3 = vmul.f32 %v417_v54, %v350_v59 }
 0x276   :  { %v420_v6 = vmul.f32 %v418_v63, %v417_v54 }
 0x278   :  { %422 = vrot.lane.b32.xlu1 %v420_v6, %s1979_s20 }
 0x2ea   :  { %v423_v56 = vpop.permute.xlu1 %422 }
 0x2eb   :  { %v425_v38 = vadd.f32 %v423_v56, %v419_v3 }
 0x2ed   :  { %1837 = vtanh.f32 %v425_v38 }
 0x2f3   :  { %v1838_v47 = vpop.eup %1837 }
 0x2f4   :  { %v427_v37 = vmul.f32 %v1838_v47, %v418_v63 }
 0x2f6   :  { %429 = vrot.lane.b32.xlu2 %v427_v37, %s1979_s20 }
 0x350   :  { %v430_v57 = vpop.permute.xlu2 %429 }
 0x351   :  { %433 = vst.msk [vmem:[#allocation3 + $0x8] sm:$0xff] %vm140_vm0, %v430_v57  ;;  %1757 = vmatmul.msk.f32.vlgmr.msrb.gmra.mxu2 %vm281_vm1, %v430_v57  ;;  %1758 = vmatmul.msk.f32.vlgmr.msrb.gmra.mxu3 %vm281_vm1, %v430_v57 }
 0x352   :  { %435 = vst.msk [vmem:[#allocation3 + $0x30] sm:$0xff] %vm359_vm4, %v430_v57  ;;  %667 = vmatpush.msrb.mxu2 %v2081_v5  ;;  %687 = vmatpush.msrb.mxu3 %v2209_v26 }
 0x354   :  { %668 = vmatpush.msrb.mxu2 %v2109_v10  ;;  %688 = vmatpush.msrb.mxu3 %v2214_v27 }
 0x356   :  { %669 = vmatpush.msrb.mxu2 %v2118_v12  ;;  %689 = vmatpush.msrb.mxu3 %v2232_v28 }
 0x358   :  { %670 = vmatpush.msrb.mxu2 %v2128_v14  ;;  %690 = vmatpush.msrb.mxu3 %v2237_v29 }
 0x35a   :  { %671 = vmatpush.msrb.mxu2 %v2145_v17  ;;  %691 = vmatpush.msrb.mxu3 %v2245_v30 }
 0x35c   :  { %672 = vmatpush.msrb.mxu2 %v2160_v19  ;;  %692 = vmatpush.msrb.mxu3 %v2254_v31 }
 0x35e   :  { %673 = vmatpush.msrb.mxu2 %v2166_v20  ;;  %693 = vmatpush.msrb.mxu3 %v2267_v32 }
 0x360   :  { %674 = vmatpush.msrb.mxu2 %v2176_v22  ;;  %694 = vmatpush.msrb.mxu3 %v2272_v33 }
 0x3d4   :  { %v455_v56 = vpop.f32.mrf.mxu2  ;;  %v475_v59 = vpop.f32.mrf.mxu3 }
 0x3d5   :  { %v486_v21 = vadd.f32 %v484_v60, %v455_v56  ;;  %v487_v34 = vadd.f32 %v485_v24, %v475_v59 }
 0x3d7   :  { %1839 = vtanh.f32 %v486_v21 }
 0x3d8   :  { %1841 = vtanh.f32 %v487_v34 }
 0x3dd   :  { %v1840_v36 = vpop.eup %1839 }
 0x3de   :  { %v1842_v39 = vpop.eup %1841  ;;  %v490_v40 = vmul.f32 %v1840_v36, %v2428_v62 }
 0x3df   :  { %v491_v41 = vmul.f32 %v1842_v39, %v2433_v7 }
 0x3e0   :  { %v492_v50 = vadd.f32 %v490_v40, %v2435_v9 }
 0x3e1   :  { %v493_v54 = vadd.f32 %v491_v41, %v2437_v11 }
 0x3e2   :  { %v494_v60 = vmul.f32 %v492_v50, %v425_v38 }
 0x3e3   :  { %v495_v63 = vmul.f32 %v493_v54, %v492_v50 }
 0x3e5   :  { %497 = vrot.lane.b32.xlu2 %v495_v63, %s1979_s20 }
 0x43f   :  { %v498_v6 = vpop.permute.xlu2 %497 }
 0x440   :  { %v500_v3 = vadd.f32 %v498_v6, %v494_v60 }
 0x442   :  { %1843 = vtanh.f32 %v500_v3 }
 0x448   :  { %v1844_v24 = vpop.eup %1843 }
 0x449   :  { %v502_v47 = vmul.f32 %v1844_v24, %v493_v54 }
 0x44b   :  { %504 = vrot.lane.b32.xlu0 %v502_v47, %s1979_s20 }
 0x4bd   :  { %v505_v37 = vpop.permute.xlu0 %504 }
 0x4be   :  { %508 = vst.msk [vmem:[#allocation3 + $0x10] sm:$0xff] %vm140_vm0, %v505_v37  ;;  %1759 = vmatmul.msk.f32.vlgmr.msra.gmra.mxu2 %vm281_vm1, %v505_v37  ;;  %1760 = vmatmul.msk.f32.vlgmr.msra.gmra.mxu3 %vm281_vm1, %v505_v37 }
 0x4bf   :  { %510 = vst.msk [vmem:[#allocation3 + $0x28] sm:$0xff] %vm359_vm4, %v505_v37  ;;  %809 = vmatpush.msra.mxu2 %v2081_v5  ;;  %829 = vmatpush.msra.mxu3 %v2209_v26 }
 0x4c1   :  { %810 = vmatpush.msra.mxu2 %v2109_v10  ;;  %830 = vmatpush.msra.mxu3 %v2214_v27 }
 0x4c3   :  { %811 = vmatpush.msra.mxu2 %v2118_v12  ;;  %831 = vmatpush.msra.mxu3 %v2232_v28 }
 0x4c5   :  { %812 = vmatpush.msra.mxu2 %v2128_v14  ;;  %832 = vmatpush.msra.mxu3 %v2237_v29 }
 0x4c7   :  { %813 = vmatpush.msra.mxu2 %v2145_v17  ;;  %833 = vmatpush.msra.mxu3 %v2245_v30 }
 0x4c9   :  { %814 = vmatpush.msra.mxu2 %v2160_v19  ;;  %834 = vmatpush.msra.mxu3 %v2254_v31 }
 0x4cb   :  { %815 = vmatpush.msra.mxu2 %v2166_v20  ;;  %835 = vmatpush.msra.mxu3 %v2267_v32 }
 0x4cd   :  { %816 = vmatpush.msra.mxu2 %v2176_v22  ;;  %836 = vmatpush.msra.mxu3 %v2272_v33 }
 0x541   :  { %v530_v5 = vpop.f32.mrf.mxu2  ;;  %v550_v10 = vpop.f32.mrf.mxu3 }
 0x542   :  { %v561_v12 = vadd.f32 %v559_v1, %v530_v5  ;;  %v562_v14 = vadd.f32 %v560_v16, %v550_v10 }
 0x544   :  { %1845 = vtanh.f32 %v561_v12 }
 0x545   :  { %1847 = vtanh.f32 %v562_v14 }
 0x54a   :  { %v1846_v17 = vpop.eup %1845 }
 0x54b   :  { %v1848_v19 = vpop.eup %1847  ;;  %v565_v20 = vmul.f32 %v1846_v17, %v2428_v62 }
 0x54c   :  { %v566_v22 = vmul.f32 %v1848_v19, %v2433_v7  ;;  %v3152_v19 = vsel %vm2375_vm3, %v2399_v35, %v2361_v0 }
 0x54d   :  { %v567_v26 = vadd.f32 %v565_v20, %v2435_v9 }
 0x54e   :  { %v568_v27 = vadd.f32 %v566_v22, %v2437_v11 }
 0x54f   :  { %v569_v29 = vmul.f32 %v567_v26, %v500_v3 }
 0x550   :  { %v570_v28 = vmul.f32 %v568_v27, %v567_v26 }
 0x552   :  { %572 = vrot.lane.b32.xlu1 %v570_v28, %s1979_s20 }
 0x5c4   :  { %v573_v30 = vpop.permute.xlu1 %572 }
 0x5c5   :  { %v575_v31 = vadd.f32 %v573_v30, %v569_v29 }
 0x5c7   :  { %1849 = vtanh.f32 %v575_v31 }
 0x5cd   :  { %v1850_v32 = vpop.eup %1849 }
 0x5ce   :  { %v577_v33 = vmul.f32 %v1850_v32, %v568_v27 }
 0x5d0   :  { %579 = vrot.lane.b32.xlu2 %v577_v33, %s1979_s20 }
 0x62a   :  { %v580_v1 = vpop.permute.xlu2 %579 }
 0x62b   :  { %583 = vst.msk [vmem:[#allocation3 + $0x18] sm:$0xff] %vm140_vm0, %v580_v1  ;;  %1761 = vmatmul.msk.f32.vlgmr.msra.gmra.mxu0 %vm281_vm1, %v580_v1  ;;  %1762 = vmatmul.msk.f32.vlgmr.msra.gmra.mxu1 %vm281_vm1, %v580_v1 }
 0x62c   :  { %585 = vst.msk [vmem:[#allocation3 + $0x20] sm:$0xff] %vm359_vm4, %v580_v1 }
 0x6a8   :  { %v605_v16 = vpop.f32.mrf.mxu0  ;;  %v625_v38 = vpop.f32.mrf.mxu1 }
 0x6a9   :  { %v634_v57 = vadd.f32 %v632_v2, %v605_v16  ;;  %v635_v56 = vadd.f32 %v633_v18, %v625_v38  ;;  %v3153_v16 = vsel %vm2325_vm2, %v2343_v53, %v2339_v51  ;;  %v898_v53 = vld [vmem:[#allocation4 + $0x70] sm:$0xff] }
 0x6aa   :  { %938 = vmatpush.msra.mxu0 %v898_v53 }
 0x6ab   :  { %1851 = vtanh.f32 %v634_v57  ;;  %v3154_v57 = vsel %vm2375_vm3, %v2415_v49, %v2413_v44  ;;  %v897_v44 = vld [vmem:[#allocation4 + $0x68] sm:$0xff]  ;;  %v894_v49 = vld [vmem:[#allocation4 + $0x50] sm:$0xff] }
 0x6ac   :  { %1853 = vtanh.f32 %v635_v56 }
 0x6b1   :  { %v1852_v59 = vpop.eup %1851 }
 0x6b2   :  { %v1854_v21 = vpop.eup %1853  ;;  %v638_v34 = vmul.f32 %v1852_v59, %v2428_v62 }
 0x6b3   :  { %v639_v36 = vmul.f32 %v1854_v21, %v2433_v7 }
 0x6b4   :  { %v640_v39 = vadd.f32 %v638_v34, %v2435_v9 }
 0x6b5   :  { %v641_v40 = vadd.f32 %v639_v36, %v2437_v11 }
 0x6b6   :  { %v642_v52 = vmul.f32 %v640_v39, %v575_v31 }
 0x6b7   :  { %v643_v42 = vmul.f32 %v641_v40, %v640_v39 }
 0x6b9   :  { %645 = vrot.lane.b32.xlu0 %v643_v42, %s1979_s20  ;;  %v899_v42 = vld [vmem:[#allocation4 + $0x78] sm:$0xff] }
 0x6ba   :  { %979 = vmatpush.msra.mxu1 %v899_v42 }
 0x6bc   :  { %980 = vmatpush.msra.mxu1 %v897_v44 }
 0x72b   :  { %v646_v2 = vpop.permute.xlu0 %645 }
 0x72c   :  { %v648_v41 = vadd.f32 %v646_v2, %v642_v52  ;;  %v896_v52 = vld [vmem:[#allocation4 + $0x60] sm:$0xff]  ;;  %v895_v2 = vld [vmem:[#allocation4 + $0x58] sm:$0xff] }
 0x72d   :  { %939 = vmatpush.msra.mxu0 %v896_v52  ;;  %981 = vmatpush.msra.mxu1 %v895_v2 }
 0x72e   :  { %1855 = vtanh.f32 %v648_v41 }
 0x72f   :  { %940 = vmatpush.msra.mxu0 %v894_v49 }
 0x734   :  { %v1856_v8 = vpop.eup %1855 }
 0x735   :  { %v650_v15 = vmul.f32 %v1856_v8, %v641_v40  ;;  %v893_v8 = vld [vmem:[#allocation4 + $0x48] sm:$0xff] }
 0x736   :  { %982 = vmatpush.msra.mxu1 %v893_v8 }
 0x737   :  { %652 = vrot.lane.b32.xlu1 %v650_v15, %s1979_s20 }
 0x7a9   :  { %v653_v18 = vpop.permute.xlu1 %652 }
 0x7aa   :  { %655 = vst.msk [vmem:[#allocation3 + $0x20] sm:$0xff] %vm140_vm0, %v653_v18  ;;  %1763 = vmatmul.msk.f32.vlgmr.msrb.gmra.mxu2 %vm281_vm1, %v653_v18  ;;  %1764 = vmatmul.msk.f32.vlgmr.msrb.gmra.mxu3 %vm281_vm1, %v653_v18 }
 0x7ab   :  { %656 = vst.msk [vmem:[#allocation3 + $0x18] sm:$0xff] %vm359_vm4, %v653_v18 }
 0x82d   :  { %v676_v50 = vpop.f32.mrf.mxu2  ;;  %v696_v54 = vpop.f32.mrf.mxu3 }
 0x82e   :  { %v705_v63 = vadd.f32 %v703_v61, %v676_v50  ;;  %v706_v60 = vadd.f32 %v704_v25, %v696_v54 }
 0x830   :  { %1857 = vtanh.f32 %v705_v63 }
 0x831   :  { %1859 = vtanh.f32 %v706_v60  ;;  %v890_v60 = vld [vmem:[#allocation4 + $0x30] sm:$0xff] }
 0x836   :  { %v1858_v6 = vpop.eup %1857 }
 0x837   :  { %v1860_v3 = vpop.eup %1859  ;;  %v709_v24 = vmul.f32 %v1858_v6, %v2428_v62  ;;  %v891_v6 = vld [vmem:[#allocation4 + $0x38] sm:$0xff] }
 0x838   :  { %v710_v47 = vmul.f32 %v1860_v3, %v2433_v7  ;;  %v888_v3 = vld [vmem:[#allocation4 + $0x20] sm:$0xff]  ;;  %983 = vmatpush.msra.mxu1 %v891_v6 }
 0x839   :  { %v711_v37 = vadd.f32 %v709_v24, %v2435_v9  ;;  %v889_v24 = vld [vmem:[#allocation4 + $0x28] sm:$0xff] }
 0x83a   :  { %v712_v5 = vadd.f32 %v710_v47, %v2437_v11  ;;  %v886_v47 = vld [vmem:[#allocation4 + $0x10] sm:$0xff]  ;;  %984 = vmatpush.msra.mxu1 %v889_v24 }
 0x83b   :  { %v713_v58 = vmul.f32 %v711_v37, %v648_v41  ;;  %v892_v41 = vld [vmem:[#allocation4 + $0x40] sm:$0xff] }
 0x83c   :  { %v714_v55 = vmul.f32 %v712_v5, %v711_v37  ;;  %941 = vmatpush.msra.mxu0 %v892_v41  ;;  %v887_v37 = vld [vmem:[#allocation4 + $0x18] sm:$0xff] }
 0x83d   :  { %985 = vmatpush.msra.mxu1 %v887_v37 }
 0x83e   :  { %716 = vrot.lane.b32.xlu2 %v714_v55, %s1979_s20  ;;  %942 = vmatpush.msra.mxu0 %v890_v60  ;;  %v885_v55 = vld [vmem:[#allocation4 + $0x8] sm:$0xff] }
 0x83f   :  { %986 = vmatpush.msra.mxu1 %v885_v55 }
 0x840   :  { %943 = vmatpush.msra.mxu0 %v888_v3 }
 0x842   :  { %944 = vmatpush.msra.mxu0 %v886_v47 }
 0x898   :  { %v717_v61 = vpop.permute.xlu2 %716 }
 0x899   :  { %v719_v10 = vadd.f32 %v717_v61, %v713_v58 }
 0x89b   :  { %1861 = vtanh.f32 %v719_v10 }
 0x8a1   :  { %v1862_v4 = vpop.eup %1861 }
 0x8a2   :  { %v721_v23 = vmul.f32 %v1862_v4, %v712_v5  ;;  %v884_v5 = vld [vmem:[#allocation4] sm:$0xff]  ;;  %v2641_v4 = vld [vmem:[#allocation6 + $0x78] sm:$0xff] }
 0x8a3   :  { %945 = vmatpush.msra.mxu0 %v884_v5  ;;  %1079 = vmatpush.msrb.mxu3 %v2641_v4 }
 0x8a4   :  { %723 = vrot.lane.b32.xlu0 %v721_v23, %s1979_s20 }
 0x916   :  { %v724_v25 = vpop.permute.xlu0 %723 }
 0x917   :  { %726 = vst.msk [vmem:[#allocation3 + $0x28] sm:$0xff] %vm140_vm0, %v724_v25  ;;  %1765 = vmatmul.msk.f32.vlgmr.msrb.gmra.mxu0 %vm281_vm1, %v724_v25  ;;  %1766 = vmatmul.msk.f32.vlgmr.msrb.gmra.mxu1 %vm281_vm1, %v724_v25 }
 0x918   :  { %727 = vst.msk [vmem:[#allocation3 + $0x10] sm:$0xff] %vm359_vm4, %v724_v25  ;;  %1367 = vmatpush.msrb.mxu1 %v2641_v4  ;;  %v2649_v25 = vld [vmem:[#allocation6 + $0x60] sm:$0xff] }
 0x994   :  { %v747_v12 = vpop.f32.mrf.mxu0  ;;  %v767_v14 = vpop.f32.mrf.mxu1 }
 0x995   :  { %v776_v17 = vadd.f32 %v774_v48, %v747_v12  ;;  %v777_v20 = vadd.f32 %v3152_v19, %v767_v14  ;;  %v2651_v12 = vld [vmem:[#allocation6 + $0x68] sm:$0xff]  ;;  %v2653_v14 = vld [vmem:[#allocation6 + $0x50] sm:$0xff]  ;;  %v2659_v19 = vld [vmem:[#allocation6 + $0x40] sm:$0xff] }
 0x996   :  { %1080 = vmatpush.msrb.mxu3 %v2651_v12  ;;  %1368 = vmatpush.msrb.mxu1 %v2651_v12 }
 0x997   :  { %1863 = vtanh.f32 %v776_v17  ;;  %v2657_v17 = vld [vmem:[#allocation6 + $0x58] sm:$0xff] }
 0x998   :  { %1865 = vtanh.f32 %v777_v20  ;;  %v2661_v20 = vld [vmem:[#allocation6 + $0x48] sm:$0xff]  ;;  %1081 = vmatpush.msrb.mxu3 %v2657_v17  ;;  %1369 = vmatpush.msrb.mxu1 %v2657_v17 }
 0x99a   :  { %1082 = vmatpush.msrb.mxu3 %v2661_v20  ;;  %1370 = vmatpush.msrb.mxu1 %v2661_v20 }
 0x99d   :  { %v1864_v22 = vpop.eup %1863 }
 0x99e   :  { %v1866_v26 = vpop.eup %1865  ;;  %v780_v27 = vmul.f32 %v1864_v22, %v2428_v62  ;;  %v2667_v22 = vld [vmem:[#allocation6 + $0x30] sm:$0xff] }
 0x99f   :  { %v781_v28 = vmul.f32 %v1866_v26, %v2433_v7  ;;  %v2669_v26 = vld [vmem:[#allocation6 + $0x38] sm:$0xff] }
 0x9a0   :  { %v782_v29 = vadd.f32 %v780_v27, %v2435_v9  ;;  %v878_v27 = vld [vmem:[#allocation3 + $0x10] sm:$0xff]  ;;  %1083 = vmatpush.msrb.mxu3 %v2669_v26  ;;  %1371 = vmatpush.msrb.mxu1 %v2669_v26 }
 0x9a1   :  { %v783_v30 = vadd.f32 %v781_v28, %v2437_v11  ;;  %v2681_v28 = vld [vmem:[#allocation6 + $0x20] sm:$0xff] }
 0x9a2   :  { %v784_v46 = vmul.f32 %v782_v29, %v719_v10  ;;  %v2639_v10 = vld [vmem:[#allocation6 + $0x70] sm:$0xff] }
 0x9a3   :  { %v785_v43 = vmul.f32 %v783_v30, %v782_v29  ;;  %1059 = vmatpush.msrb.mxu2 %v2639_v10  ;;  %1347 = vmatpush.msrb.mxu0 %v2639_v10  ;;  %v2683_v29 = vld [vmem:[#allocation6 + $0x28] sm:$0xff] }
 0x9a4   :  { %1084 = vmatpush.msrb.mxu3 %v2683_v29  ;;  %1372 = vmatpush.msrb.mxu1 %v2683_v29 }
 0x9a5   :  { %787 = vrot.lane.b32.xlu1 %v785_v43, %s1979_s20  ;;  %1060 = vmatpush.msrb.mxu2 %v2649_v25  ;;  %v2689_v43 = vld [vmem:[#allocation6 + $0x18] sm:$0xff] }
 0x9a6   :  { %1348 = vmatpush.msrb.mxu0 %v2649_v25  ;;  %1085 = vmatpush.msrb.mxu3 %v2689_v43 }
 0x9a7   :  { %1061 = vmatpush.msrb.mxu2 %v2653_v14  ;;  %1373 = vmatpush.msrb.mxu1 %v2689_v43 }
 0x9a8   :  { %1349 = vmatpush.msrb.mxu0 %v2653_v14 }
 0x9a9   :  { %1062 = vmatpush.msrb.mxu2 %v2659_v19 }
 0x9aa   :  { %1350 = vmatpush.msrb.mxu0 %v2659_v19 }
 0x9ab   :  { %1063 = vmatpush.msrb.mxu2 %v2667_v22 }
 0x9ac   :  { %1351 = vmatpush.msrb.mxu0 %v2667_v22 }
 0x9ad   :  { %1064 = vmatpush.msrb.mxu2 %v2681_v28 }
 0x9ae   :  { %1352 = vmatpush.msrb.mxu0 %v2681_v28 }
 0xa17   :  { %v788_v48 = vpop.permute.xlu1 %787 }
 0xa18   :  { %v790_v31 = vadd.f32 %v788_v48, %v784_v46  ;;  %v2691_v46 = vld [vmem:[#allocation6] sm:$0xff]  ;;  %v2693_v48 = vld [vmem:[#allocation6 + $0x8] sm:$0xff] }
 0xa19   :  { %1086 = vmatpush.msrb.mxu3 %v2693_v48  ;;  %1374 = vmatpush.msrb.mxu1 %v2693_v48 }
 0xa1a   :  { %1867 = vtanh.f32 %v790_v31 }
 0xa20   :  { %v1868_v0 = vpop.eup %1867 }
 0xa21   :  { %v792_v35 = vmul.f32 %v1868_v0, %v783_v30  ;;  %v2685_v30 = vld [vmem:[#allocation6 + $0x10] sm:$0xff]  ;;  %v879_v0 = vld [vmem:[#allocation3 + $0x18] sm:$0xff] }
 0xa22   :  { %1065 = vmatpush.msrb.mxu2 %v2685_v30  ;;  %1353 = vmatpush.msrb.mxu0 %v2685_v30 }
 0xa23   :  { %794 = vrot.lane.b32.xlu2 %v792_v35, %s1979_s20  ;;  %v1786_v35 = vld [vmem:[%s3142_s9 + $0x8] sm:$0xff] }
 0xa24   :  { %1066 = vmatpush.msrb.mxu2 %v2691_v46  ;;  %1354 = vmatpush.msrb.mxu0 %v2691_v46 }
 0xa2b   :  { %1106 = vrot.lane.b32.xlu2 %v1786_v35, %s1979_s20 }
 0xa7d   :  { %v795_v32 = vpop.permute.xlu2 %794 }
 0xa7e   :  { %797 = vst.msk [vmem:[#allocation3 + $0x30] sm:$0xff] %vm140_vm0, %v795_v32  ;;  %1767 = vmatmul.msk.f32.vlgmr.msra.gmra.mxu2 %vm281_vm1, %v795_v32  ;;  %1768 = vmatmul.msk.f32.vlgmr.msra.gmra.mxu3 %vm281_vm1, %v795_v32 }
 0xa7f   :  { %798 = vst.msk [vmem:[#allocation3 + $0x8] sm:$0xff] %vm359_vm4, %v795_v32  ;;  %1134 = vmatpush.msra.mxu2 %v2639_v10  ;;  %1154 = vmatpush.msra.mxu3 %v2641_v4  ;;  %v880_v32 = vld [vmem:[#allocation3 + $0x20] sm:$0xff] }
 0xa81   :  { %1135 = vmatpush.msra.mxu2 %v2649_v25  ;;  %1155 = vmatpush.msra.mxu3 %v2651_v12 }
 0xa83   :  { %1136 = vmatpush.msra.mxu2 %v2653_v14  ;;  %1156 = vmatpush.msra.mxu3 %v2657_v17 }
 0xa85   :  { %1137 = vmatpush.msra.mxu2 %v2659_v19  ;;  %1157 = vmatpush.msra.mxu3 %v2661_v20 }
 0xa86   :  { %v877_v23 = vld [vmem:[#allocation3 + $0x8] sm:$0xff] }
 0xa87   :  { %1138 = vmatpush.msra.mxu2 %v2667_v22  ;;  %1158 = vmatpush.msra.mxu3 %v2669_v26 }
 0xa89   :  { %1139 = vmatpush.msra.mxu2 %v2681_v28  ;;  %1159 = vmatpush.msra.mxu3 %v2683_v29 }
 0xa8b   :  { %1140 = vmatpush.msra.mxu2 %v2685_v30  ;;  %1160 = vmatpush.msra.mxu3 %v2689_v43 }
 0xa8d   :  { %1141 = vmatpush.msra.mxu2 %v2691_v46  ;;  %1161 = vmatpush.msra.mxu3 %v2693_v48 }
 0xb01   :  { %v818_v33 = vpop.f32.mrf.mxu2  ;;  %v838_v1 = vpop.f32.mrf.mxu3 }
 0xb02   :  { %v847_v38 = vadd.f32 %v3153_v16, %v818_v33  ;;  %v848_v56 = vadd.f32 %v3154_v57, %v838_v1  ;;  %v881_v33 = vld [vmem:[#allocation3 + $0x28] sm:$0xff]  ;;  %v882_v1 = vld [vmem:[#allocation3 + $0x30] sm:$0xff] }
 0xb04   :  { %1869 = vtanh.f32 %v847_v38 }
 0xb05   :  { %1871 = vtanh.f32 %v848_v56  ;;  %v900_v56 = vld [vmem:[%s3139_s6] sm:$0x3] }
 0xb0a   :  { %v1870_v59 = vpop.eup %1869 }
 0xb0b   :  { %v1872_v21 = vpop.eup %1871  ;;  %v851_v34 = vmul.f32 %v1870_v59, %v2428_v62  ;;  %v902_v59 = vperm.slane %v900_v56, 0 }
 0xb0c   :  { %v852_v36 = vmul.f32 %v1872_v21, %v2433_v7  ;;  %v903_v21 = vperm.slane %v900_v56, 1 }
 0xb0d   :  { %v853_v39 = vadd.f32 %v851_v34, %v2435_v9 }
 0xb0e   :  { %v854_v40 = vadd.f32 %v852_v36, %v2437_v11 }
 0xb0f   :  { %v855_v15 = vmul.f32 %v853_v39, %v790_v31  ;;  %v1785_v31 = vld [vmem:[%s3141_s8 + $0x8] sm:$0xff] }
 0xb10   :  { %v856_v51 = vmul.f32 %v854_v40, %v853_v39  ;;  %1787 = vmatmul.msk.f32.vlgmr.msrb.gmra.mxu2 %vm281_vm1, %v1785_v31  ;;  %1788 = vmatmul.msk.f32.vlgmr.msrb.gmra.mxu3 %vm281_vm1, %v1785_v31 }
 0xb11   :  { %1205 = vmatpush.msrb.mxu2 %v2639_v10  ;;  %1225 = vmatpush.msrb.mxu3 %v2641_v4 }
 0xb12   :  { %858 = vrot.lane.b32.xlu0 %v856_v51, %s1979_s20 }
 0xb13   :  { %1206 = vmatpush.msrb.mxu2 %v2649_v25  ;;  %1226 = vmatpush.msrb.mxu3 %v2651_v12 }
 0xb15   :  { %1207 = vmatpush.msrb.mxu2 %v2653_v14  ;;  %1227 = vmatpush.msrb.mxu3 %v2657_v17 }
 0xb17   :  { %1208 = vmatpush.msrb.mxu2 %v2659_v19  ;;  %1228 = vmatpush.msrb.mxu3 %v2661_v20 }
 0xb19   :  { %1209 = vmatpush.msrb.mxu2 %v2667_v22  ;;  %1229 = vmatpush.msrb.mxu3 %v2669_v26 }
 0xb1b   :  { %1210 = vmatpush.msrb.mxu2 %v2681_v28  ;;  %1230 = vmatpush.msrb.mxu3 %v2683_v29 }
 0xb1d   :  { %1211 = vmatpush.msrb.mxu2 %v2685_v30  ;;  %1231 = vmatpush.msrb.mxu3 %v2689_v43 }
 0xb1f   :  { %1212 = vmatpush.msrb.mxu2 %v2691_v46  ;;  %1232 = vmatpush.msrb.mxu3 %v2693_v48 }
 0xb84   :  { %v859_v18 = vpop.permute.xlu0 %858 }
 0xb85   :  { %v2627_v50 = vadd.f32 %v859_v18, %v855_v15 }
 0xb87   :  { %1873 = vtanh.f32 %v2627_v50 }
 0xb8d   :  { %v1874_v54 = vpop.eup %1873 }
 0xb8e   :  { %v863_v63 = vmul.f32 %v1874_v54, %v854_v40 }
 0xb90   :  { %865 = vrot.lane.b32.xlu1 %v863_v63, %s1979_s20 }
 0xc02   :  { %v866_v58 = vpop.permute.xlu1 %865 }
 0xc03   :  { %868 = vst.msk [vmem:[#allocation3 + $0x38] sm:$0xff] %vm140_vm0, %v866_v58 }
 0xc04   :  { %869 = vst.msk [vmem:[#allocation3] sm:$0xff] %vm359_vm4, %v866_v58 }
 0xc05   :  { %870 = vst.msk [vmem:[%s3146_s13] sm:$0xff] %vm281_vm1, %v866_v58 }
 0xc0a   :  { %v883_v16 = vld [vmem:[#allocation3 + $0x38] sm:$0xff] }
 0xc0b   :  { %v876_v61 = vld [vmem:[#allocation3] sm:$0xff] }
 0xc0c   :  { %1769 = vmatmul.msk.f32.vlgmr.msra.gmra.mxu0 %vm281_vm1, %v876_v61  ;;  %1777 = vmatmul.msk.f32.vlgmr.msra.gmra.mxu1 %vm281_vm1, %v876_v61 }
 0xc0d   :  { %1489 = vmatpush.msra.mxu0 %v2639_v10  ;;  %1509 = vmatpush.msra.mxu1 %v2641_v4 }
 0xc0f   :  { %1490 = vmatpush.msra.mxu0 %v2649_v25  ;;  %1510 = vmatpush.msra.mxu1 %v2651_v12 }
 0xc11   :  { %1491 = vmatpush.msra.mxu0 %v2653_v14  ;;  %1511 = vmatpush.msra.mxu1 %v2657_v17 }
 0xc13   :  { %1492 = vmatpush.msra.mxu0 %v2659_v19  ;;  %1512 = vmatpush.msra.mxu1 %v2661_v20 }
 0xc14   :  { %1770 = vmatmul.msk.f32.gmra.mxu0 %vm281_vm1, %v877_v23  ;;  %1778 = vmatmul.msk.f32.gmra.mxu1 %vm281_vm1, %v877_v23 }
 0xc15   :  { %1493 = vmatpush.msra.mxu0 %v2667_v22  ;;  %1513 = vmatpush.msra.mxu1 %v2669_v26 }
 0xc17   :  { %1494 = vmatpush.msra.mxu0 %v2681_v28  ;;  %1514 = vmatpush.msra.mxu1 %v2683_v29 }
 0xc19   :  { %1495 = vmatpush.msra.mxu0 %v2685_v30  ;;  %1515 = vmatpush.msra.mxu1 %v2689_v43 }
 0xc1b   :  { %1496 = vmatpush.msra.mxu0 %v2691_v46  ;;  %1516 = vmatpush.msra.mxu1 %v2693_v48 }
 0xc1c   :  { %1771 = vmatmul.msk.f32.gmra.mxu0 %vm281_vm1, %v878_v27  ;;  %1779 = vmatmul.msk.f32.gmra.mxu1 %vm281_vm1, %v878_v27 }
 0xc24   :  { %1772 = vmatmul.msk.f32.gmra.mxu0 %vm281_vm1, %v879_v0  ;;  %1780 = vmatmul.msk.f32.gmra.mxu1 %vm281_vm1, %v879_v0 }
 0xc2c   :  { %1773 = vmatmul.msk.f32.gmra.mxu0 %vm281_vm1, %v880_v32  ;;  %1781 = vmatmul.msk.f32.gmra.mxu1 %vm281_vm1, %v880_v32 }
 0xc34   :  { %1774 = vmatmul.msk.f32.gmra.mxu0 %vm281_vm1, %v881_v33  ;;  %1782 = vmatmul.msk.f32.gmra.mxu1 %vm281_vm1, %v881_v33 }
 0xc3c   :  { %1775 = vmatmul.msk.f32.gmra.mxu0 %vm281_vm1, %v882_v1  ;;  %1783 = vmatmul.msk.f32.gmra.mxu1 %vm281_vm1, %v882_v1  ;;  %v1107_v1 = vpop.permute.xlu2 %1106 }
 0xc44   :  { %1776 = vmatmul.msk.f32.gmra.mxu0 %vm281_vm1, %v883_v16  ;;  %1784 = vmatmul.msk.f32.gmra.mxu1 %vm281_vm1, %v883_v16 }
 0xc89   :  { %v947_v38 = vpop.f32.mrf.mxu0  ;;  %v988_v57 = vpop.f32.mrf.mxu1 }
 0xc91   :  { %v950_v34 = vpop.f32.mrf.mxu0  ;;  %v991_v36 = vpop.f32.mrf.mxu1 }
 0xc92   :  { %v2777_v39 = vadd.f32 %v950_v34, %v902_v59  ;;  %v2779_v40 = vadd.f32 %v991_v36, %v903_v21  ;;  %v2849_v36 = vadd.f32 %v947_v38, %v902_v59 }
 0xc99   :  { %v953_v51 = vpop.f32.mrf.mxu0  ;;  %v994_v53 = vpop.f32.mrf.mxu1 }
 0xc9a   :  { %v2781_v42 = vadd.f32 %v953_v51, %v902_v59  ;;  %v2783_v52 = vadd.f32 %v994_v53, %v903_v21  ;;  %v2851_v51 = vadd.f32 %v988_v57, %v903_v21 }
 0xca1   :  { %v956_v44 = vpop.f32.mrf.mxu0  ;;  %v997_v49 = vpop.f32.mrf.mxu1 }
 0xca2   :  { %v2785_v2 = vadd.f32 %v956_v44, %v902_v59  ;;  %v2787_v41 = vadd.f32 %v997_v49, %v903_v21  ;;  %v1068_v49 = vpop.f32.mrf.mxu2 }
 0xca9   :  { %v959_v8 = vpop.f32.mrf.mxu0  ;;  %v1000_v15 = vpop.f32.mrf.mxu1 }
 0xcaa   :  { %v2789_v18 = vadd.f32 %v959_v8, %v902_v59  ;;  %v2791_v54 = vadd.f32 %v1000_v15, %v903_v21  ;;  %v1088_v8 = vpop.f32.mrf.mxu3 }
 0xcac   :  { %v1312_v63 = vsel %vm2325_vm2, %v2785_v2, %v2789_v18  ;;  %v1313_v60 = vsel %vm2375_vm3, %v2787_v41, %v2791_v54  ;;  %v1383_v6 = vsel %vm2325_vm2, %v2789_v18, %v2785_v2  ;;  %v1384_v3 = vsel %vm2375_vm3, %v2791_v54, %v2787_v41 }
 0xcb1   :  { %v962_v24 = vpop.f32.mrf.mxu0  ;;  %v1003_v47 = vpop.f32.mrf.mxu1 }
 0xcb2   :  { %v2809_v37 = vadd.f32 %v962_v24, %v902_v59  ;;  %v2811_v5 = vadd.f32 %v1003_v47, %v903_v21 }
 0xcb4   :  { %v1241_v55 = vsel %vm2325_vm2, %v2781_v42, %v2809_v37  ;;  %v1242_v58 = vsel %vm2375_vm3, %v2783_v52, %v2811_v5  ;;  %v1454_v61 = vsel %vm2325_vm2, %v2809_v37, %v2781_v42 }
 0xcb9   :  { %v965_v27 = vpop.f32.mrf.mxu0  ;;  %v1006_v31 = vpop.f32.mrf.mxu1 }
 0xcba   :  { %v2829_v0 = vadd.f32 %v965_v27, %v902_v59  ;;  %v2831_v35 = vadd.f32 %v1006_v31, %v903_v21 }
 0xcbc   :  { %v1170_v32 = vsel %vm2325_vm2, %v2777_v39, %v2829_v0  ;;  %v1171_v33 = vsel %vm2375_vm3, %v2779_v40, %v2831_v35 }
 0xcc1   :  { %v968_v56 = vpop.f32.mrf.mxu0  ;;  %v1009_v34 = vpop.f32.mrf.mxu1 }
 0xcc2   :  { %v2853_v53 = vadd.f32 %v968_v56, %v902_v59  ;;  %v2855_v44 = vadd.f32 %v1009_v34, %v903_v21 }
 0xcc4   :  { %v1095_v15 = vsel %vm2325_vm2, %v2849_v36, %v2853_v53  ;;  %v1096_v24 = vsel %vm2375_vm3, %v2851_v51, %v2855_v44 }
 0xcc5   :  { %v1097_v59 = vadd.f32 %v1095_v15, %v1068_v49  ;;  %v1098_v21 = vadd.f32 %v1096_v24, %v1088_v8 }
 0xcc7   :  { %1875 = vtanh.f32 %v1097_v59 }
 0xcc8   :  { %1877 = vtanh.f32 %v1098_v21 }
 0xccd   :  { %v1876_v47 = vpop.eup %1875 }
 0xcce   :  { %v1878_v27 = vpop.eup %1877  ;;  %v1101_v31 = vmul.f32 %v1876_v47, %v2428_v62 }
 0xccf   :  { %v1102_v56 = vmul.f32 %v1878_v27, %v2433_v7 }
 0xcd0   :  { %v1103_v34 = vadd.f32 %v1101_v31, %v2435_v9 }
 0xcd1   :  { %v1104_v16 = vadd.f32 %v1102_v56, %v2437_v11 }
 0xcd2   :  { %v1109_v23 = vmul.f32 %v1107_v1, %v1103_v34 }
 0xcd3   :  { %v1110_v38 = vmul.f32 %v1104_v16, %v1103_v34 }
 0xcd5   :  { %1112 = vrot.lane.b32.xlu0 %v1110_v38, %s1979_s20 }
 0xd47   :  { %v1113_v57 = vpop.permute.xlu0 %1112 }
 0xd48   :  { %v1115_v49 = vadd.f32 %v1113_v57, %v1109_v23 }
 0xd4a   :  { %1879 = vtanh.f32 %v1115_v49 }
 0xd50   :  { %v1880_v8 = vpop.eup %1879 }
 0xd51   :  { %v1117_v15 = vmul.f32 %v1880_v8, %v1104_v16 }
 0xd53   :  { %1119 = vrot.lane.b32.xlu1 %v1117_v15, %s1979_s20 }
 0xdc5   :  { %v1120_v24 = vpop.permute.xlu1 %1119 }
 0xdc6   :  { %1122 = vst.msk [vmem:[#allocation3] sm:$0xff] %vm140_vm0, %v1120_v24  ;;  %1789 = vmatmul.msk.f32.vlgmr.msra.gmra.mxu2 %vm281_vm1, %v1120_v24  ;;  %1790 = vmatmul.msk.f32.vlgmr.msra.gmra.mxu3 %vm281_vm1, %v1120_v24 }
 0xdc7   :  { %1123 = vst.msk [vmem:[#allocation3 + $0x38] sm:$0xff] %vm359_vm4, %v1120_v24  ;;  %1276 = vmatpush.msra.mxu2 %v2639_v10  ;;  %1296 = vmatpush.msra.mxu3 %v2641_v4 }
 0xdc9   :  { %1277 = vmatpush.msra.mxu2 %v2649_v25  ;;  %1297 = vmatpush.msra.mxu3 %v2651_v12 }
 0xdcb   :  { %1278 = vmatpush.msra.mxu2 %v2653_v14  ;;  %1298 = vmatpush.msra.mxu3 %v2657_v17 }
 0xdcd   :  { %1279 = vmatpush.msra.mxu2 %v2659_v19  ;;  %1299 = vmatpush.msra.mxu3 %v2661_v20 }
 0xdcf   :  { %1280 = vmatpush.msra.mxu2 %v2667_v22  ;;  %1300 = vmatpush.msra.mxu3 %v2669_v26 }
 0xdd1   :  { %1281 = vmatpush.msra.mxu2 %v2681_v28  ;;  %1301 = vmatpush.msra.mxu3 %v2683_v29 }
 0xdd3   :  { %1282 = vmatpush.msra.mxu2 %v2685_v30  ;;  %1302 = vmatpush.msra.mxu3 %v2689_v43 }
 0xdd5   :  { %1283 = vmatpush.msra.mxu2 %v2691_v46  ;;  %1303 = vmatpush.msra.mxu3 %v2693_v48 }
 0xe49   :  { %v1143_v23 = vpop.f32.mrf.mxu2  ;;  %v1163_v1 = vpop.f32.mrf.mxu3 }
 0xe4a   :  { %v1172_v16 = vadd.f32 %v1170_v32, %v1143_v23  ;;  %v1173_v38 = vadd.f32 %v1171_v33, %v1163_v1 }
 0xe4c   :  { %1881 = vtanh.f32 %v1172_v16 }
 0xe4d   :  { %1883 = vtanh.f32 %v1173_v38 }
 0xe52   :  { %v1882_v57 = vpop.eup %1881 }
 0xe53   :  { %v1884_v59 = vpop.eup %1883  ;;  %v1176_v21 = vmul.f32 %v1882_v57, %v2428_v62 }
 0xe54   :  { %v1177_v47 = vmul.f32 %v1884_v59, %v2433_v7 }
 0xe55   :  { %v1178_v27 = vadd.f32 %v1176_v21, %v2435_v9 }
 0xe56   :  { %v1179_v31 = vadd.f32 %v1177_v47, %v2437_v11 }
 0xe57   :  { %v1180_v34 = vmul.f32 %v1178_v27, %v1115_v49 }
 0xe58   :  { %v1181_v56 = vmul.f32 %v1179_v31, %v1178_v27 }
 0xe5a   :  { %1183 = vrot.lane.b32.xlu2 %v1181_v56, %s1979_s20 }
 0xeb4   :  { %v1184_v8 = vpop.permute.xlu2 %1183 }
 0xeb5   :  { %v1186_v15 = vadd.f32 %v1184_v8, %v1180_v34 }
 0xeb7   :  { %1885 = vtanh.f32 %v1186_v15 }
 0xebd   :  { %v1886_v32 = vpop.eup %1885 }
 0xebe   :  { %v1188_v33 = vmul.f32 %v1886_v32, %v1179_v31 }
 0xec0   :  { %1190 = vrot.lane.b32.xlu0 %v1188_v33, %s1979_s20 }
 0xf32   :  { %v1191_v24 = vpop.permute.xlu0 %1190 }
 0xf33   :  { %1193 = vst.msk [vmem:[#allocation3 + $0x8] sm:$0xff] %vm140_vm0, %v1191_v24  ;;  %1791 = vmatmul.msk.f32.vlgmr.msrb.gmra.mxu2 %vm281_vm1, %v1191_v24  ;;  %1792 = vmatmul.msk.f32.vlgmr.msrb.gmra.mxu3 %vm281_vm1, %v1191_v24 }
 0xf34   :  { %1194 = vst.msk [vmem:[#allocation3 + $0x30] sm:$0xff] %vm359_vm4, %v1191_v24  ;;  %1418 = vmatpush.msrb.mxu2 %v2639_v10  ;;  %1438 = vmatpush.msrb.mxu3 %v2641_v4 }
 0xf36   :  { %1419 = vmatpush.msrb.mxu2 %v2649_v25  ;;  %1439 = vmatpush.msrb.mxu3 %v2651_v12 }
 0xf38   :  { %1420 = vmatpush.msrb.mxu2 %v2653_v14  ;;  %1440 = vmatpush.msrb.mxu3 %v2657_v17 }
 0xf3a   :  { %1421 = vmatpush.msrb.mxu2 %v2659_v19  ;;  %1441 = vmatpush.msrb.mxu3 %v2661_v20 }
 0xf3c   :  { %1422 = vmatpush.msrb.mxu2 %v2667_v22  ;;  %1442 = vmatpush.msrb.mxu3 %v2669_v26 }
 0xf3e   :  { %1423 = vmatpush.msrb.mxu2 %v2681_v28  ;;  %1443 = vmatpush.msrb.mxu3 %v2683_v29 }
 0xf40   :  { %1424 = vmatpush.msrb.mxu2 %v2685_v30  ;;  %1444 = vmatpush.msrb.mxu3 %v2689_v43 }
 0xf42   :  { %1425 = vmatpush.msrb.mxu2 %v2691_v46  ;;  %1445 = vmatpush.msrb.mxu3 %v2693_v48 }
 0xfb6   :  { %v1214_v49 = vpop.f32.mrf.mxu2  ;;  %v1234_v23 = vpop.f32.mrf.mxu3 }
 0xfb7   :  { %v1243_v1 = vadd.f32 %v1241_v55, %v1214_v49  ;;  %v1244_v16 = vadd.f32 %v1242_v58, %v1234_v23 }
 0xfb9   :  { %1887 = vtanh.f32 %v1243_v1 }
 0xfba   :  { %1889 = vtanh.f32 %v1244_v16 }
 0xfbf   :  { %v1888_v38 = vpop.eup %1887 }
 0xfc0   :  { %v1890_v57 = vpop.eup %1889  ;;  %v1247_v59 = vmul.f32 %v1888_v38, %v2428_v62 }
 0xfc1   :  { %v1248_v21 = vmul.f32 %v1890_v57, %v2433_v7 }
 0xfc2   :  { %v1249_v47 = vadd.f32 %v1247_v59, %v2435_v9 }
 0xfc3   :  { %v1250_v27 = vadd.f32 %v1248_v21, %v2437_v11 }
 0xfc4   :  { %v1251_v55 = vmul.f32 %v1249_v47, %v1186_v15 }
 0xfc5   :  { %v1252_v31 = vmul.f32 %v1250_v27, %v1249_v47 }
 0xfc7   :  { %1254 = vrot.lane.b32.xlu1 %v1252_v31, %s1979_s20  ;;  %v3155_v31 = vsel %vm2375_vm3, %v2811_v5, %v2783_v52 }
0x1039   :  { %v1255_v56 = vpop.permute.xlu1 %1254 }
0x103a   :  { %v1257_v34 = vadd.f32 %v1255_v56, %v1251_v55 }
0x103c   :  { %1891 = vtanh.f32 %v1257_v34 }
0x1042   :  { %v1892_v58 = vpop.eup %1891 }
0x1043   :  { %v1259_v8 = vmul.f32 %v1892_v58, %v1250_v27 }
0x1045   :  { %1261 = vrot.lane.b32.xlu2 %v1259_v8, %s1979_s20 }
0x109f   :  { %v1262_v32 = vpop.permute.xlu2 %1261 }
0x10a0   :  { %1264 = vst.msk [vmem:[#allocation3 + $0x10] sm:$0xff] %vm140_vm0, %v1262_v32  ;;  %1793 = vmatmul.msk.f32.vlgmr.msra.gmra.mxu2 %vm281_vm1, %v1262_v32  ;;  %1794 = vmatmul.msk.f32.vlgmr.msra.gmra.mxu3 %vm281_vm1, %v1262_v32 }
0x10a1   :  { %1265 = vst.msk [vmem:[#allocation3 + $0x28] sm:$0xff] %vm359_vm4, %v1262_v32  ;;  %1560 = vmatpush.msra.mxu2 %v2639_v10  ;;  %1580 = vmatpush.msra.mxu3 %v2641_v4 }
0x10a3   :  { %1561 = vmatpush.msra.mxu2 %v2649_v25  ;;  %1581 = vmatpush.msra.mxu3 %v2651_v12 }
0x10a5   :  { %1562 = vmatpush.msra.mxu2 %v2653_v14  ;;  %1582 = vmatpush.msra.mxu3 %v2657_v17 }
0x10a7   :  { %1563 = vmatpush.msra.mxu2 %v2659_v19  ;;  %1583 = vmatpush.msra.mxu3 %v2661_v20 }
0x10a9   :  { %1564 = vmatpush.msra.mxu2 %v2667_v22  ;;  %1584 = vmatpush.msra.mxu3 %v2669_v26 }
0x10ab   :  { %1565 = vmatpush.msra.mxu2 %v2681_v28  ;;  %1585 = vmatpush.msra.mxu3 %v2683_v29 }
0x10ad   :  { %1566 = vmatpush.msra.mxu2 %v2685_v30  ;;  %1586 = vmatpush.msra.mxu3 %v2689_v43 }
0x10af   :  { %1567 = vmatpush.msra.mxu2 %v2691_v46  ;;  %1587 = vmatpush.msra.mxu3 %v2693_v48 }
0x1123   :  { %v1285_v10 = vpop.f32.mrf.mxu2  ;;  %v1305_v4 = vpop.f32.mrf.mxu3 }
0x1124   :  { %v1314_v25 = vadd.f32 %v1312_v63, %v1285_v10  ;;  %v1315_v12 = vadd.f32 %v1313_v60, %v1305_v4 }
0x1126   :  { %1893 = vtanh.f32 %v1314_v25 }
0x1127   :  { %1895 = vtanh.f32 %v1315_v12 }
0x112c   :  { %v1894_v14 = vpop.eup %1893 }
0x112d   :  { %v1896_v17 = vpop.eup %1895  ;;  %v1318_v19 = vmul.f32 %v1894_v14, %v2428_v62 }
0x112e   :  { %v1319_v20 = vmul.f32 %v1896_v17, %v2433_v7  ;;  %v3156_v17 = vsel %vm2325_vm2, %v2829_v0, %v2777_v39 }
0x112f   :  { %v1320_v22 = vadd.f32 %v1318_v19, %v2435_v9 }
0x1130   :  { %v1321_v26 = vadd.f32 %v1319_v20, %v2437_v11  ;;  %v3157_v20 = vsel %vm2375_vm3, %v2831_v35, %v2779_v40 }
0x1131   :  { %v1322_v29 = vmul.f32 %v1320_v22, %v1257_v34 }
0x1132   :  { %v1323_v28 = vmul.f32 %v1321_v26, %v1320_v22 }
0x1134   :  { %1325 = vrot.lane.b32.xlu0 %v1323_v28, %s1979_s20 }
0x11a6   :  { %v1326_v30 = vpop.permute.xlu0 %1325 }
0x11a7   :  { %v1328_v43 = vadd.f32 %v1326_v30, %v1322_v29 }
0x11a9   :  { %1897 = vtanh.f32 %v1328_v43 }
0x11af   :  { %v1898_v46 = vpop.eup %1897 }
0x11b0   :  { %v1330_v48 = vmul.f32 %v1898_v46, %v1321_v26 }
0x11b2   :  { %1332 = vrot.lane.b32.xlu1 %v1330_v48, %s1979_s20 }
0x1224   :  { %v1333_v63 = vpop.permute.xlu1 %1332 }
0x1225   :  { %1335 = vst.msk [vmem:[#allocation3 + $0x18] sm:$0xff] %vm140_vm0, %v1333_v63  ;;  %1795 = vmatmul.msk.f32.vlgmr.msrb.gmra.mxu0 %vm281_vm1, %v1333_v63  ;;  %1796 = vmatmul.msk.f32.vlgmr.msrb.gmra.mxu1 %vm281_vm1, %v1333_v63 }
0x1226   :  { %1336 = vst.msk [vmem:[#allocation3 + $0x20] sm:$0xff] %vm359_vm4, %v1333_v63 }
0x12a2   :  { %v1356_v60 = vpop.f32.mrf.mxu0  ;;  %v1376_v15 = vpop.f32.mrf.mxu1 }
0x12a3   :  { %v1385_v33 = vadd.f32 %v1383_v6, %v1356_v60  ;;  %v1386_v24 = vadd.f32 %v1384_v3, %v1376_v15 }
0x12a5   :  { %1899 = vtanh.f32 %v1385_v33 }
0x12a6   :  { %1901 = vtanh.f32 %v1386_v24 }
0x12ab   :  { %v1900_v49 = vpop.eup %1899 }
0x12ac   :  { %v1902_v23 = vpop.eup %1901  ;;  %v1389_v1 = vmul.f32 %v1900_v49, %v2428_v62 }
0x12ad   :  { %v1390_v16 = vmul.f32 %v1902_v23, %v2433_v7  ;;  %v3159_v23 = vsel %vm2375_vm3, %v2855_v44, %v2851_v51 }
0x12ae   :  { %v1391_v38 = vadd.f32 %v1389_v1, %v2435_v9 }
0x12af   :  { %v1392_v57 = vadd.f32 %v1390_v16, %v2437_v11 }
0x12b0   :  { %v1393_v18 = vmul.f32 %v1391_v38, %v1328_v43 }
0x12b1   :  { %v1394_v2 = vmul.f32 %v1392_v57, %v1391_v38 }
0x12b3   :  { %1396 = vrot.lane.b32.xlu2 %v1394_v2, %s1979_s20 }
0x130d   :  { %v1397_v6 = vpop.permute.xlu2 %1396 }
0x130e   :  { %v1399_v59 = vadd.f32 %v1397_v6, %v1393_v18 }
0x1310   :  { %1903 = vtanh.f32 %v1399_v59 }
0x1316   :  { %v1904_v41 = vpop.eup %1903 }
0x1317   :  { %v1401_v54 = vmul.f32 %v1904_v41, %v1392_v57  ;;  %v1640_v41 = vld [vmem:[%s3143_s10 + $0x18] sm:$0xff] }
0x1319   :  { %1403 = vrot.lane.b32.xlu0 %v1401_v54, %s1979_s20  ;;  %v1639_v54 = vld [vmem:[%s3143_s10 + $0x10] sm:$0xff] }
0x138b   :  { %v1404_v3 = vpop.permute.xlu0 %1403 }
0x138c   :  { %1406 = vst.msk [vmem:[#allocation3 + $0x20] sm:$0xff] %vm140_vm0, %v1404_v3  ;;  %1797 = vmatmul.msk.f32.vlgmr.msrb.gmra.mxu2 %vm281_vm1, %v1404_v3  ;;  %1798 = vmatmul.msk.f32.vlgmr.msrb.gmra.mxu3 %vm281_vm1, %v1404_v3 }
0x138d   :  { %1407 = vst.msk [vmem:[#allocation3 + $0x18] sm:$0xff] %vm359_vm4, %v1404_v3  ;;  %v1638_v3 = vld [vmem:[%s3143_s10 + $0x8] sm:$0xff] }
0x140f   :  { %v1427_v21 = vpop.f32.mrf.mxu2  ;;  %v1447_v47 = vpop.f32.mrf.mxu3 }
0x1410   :  { %v1456_v27 = vadd.f32 %v1454_v61, %v1427_v21  ;;  %v1457_v55 = vadd.f32 %v3155_v31, %v1447_v47  ;;  %v1637_v21 = vld [vmem:[%s3143_s10] sm:$0xff] }
0x1412   :  { %1905 = vtanh.f32 %v1456_v27 }
0x1413   :  { %1907 = vtanh.f32 %v1457_v55 }
0x1418   :  { %v1906_v56 = vpop.eup %1905 }
0x1419   :  { %v1908_v34 = vpop.eup %1907  ;;  %v1460_v58 = vmul.f32 %v1906_v56, %v2428_v62  ;;  %v1632_v56 = vld [vmem:[#allocation3 + $0x18] sm:$0xff] }
0x141a   :  { %v1461_v8 = vmul.f32 %v1908_v34, %v2433_v7  ;;  %v1633_v34 = vld [vmem:[#allocation3 + $0x20] sm:$0xff] }
0x141b   :  { %v1462_v32 = vadd.f32 %v1460_v58, %v2435_v9 }
0x141c   :  { %v1463_v10 = vadd.f32 %v1461_v8, %v2437_v11 }
0x141d   :  { %v1464_v37 = vmul.f32 %v1462_v32, %v1399_v59 }
0x141e   :  { %v1465_v42 = vmul.f32 %v1463_v10, %v1462_v32 }
0x1420   :  { %1467 = vrot.lane.b32.xlu1 %v1465_v42, %s1979_s20 }
0x1492   :  { %v1468_v61 = vpop.permute.xlu1 %1467 }
0x1493   :  { %v1470_v4 = vadd.f32 %v1468_v61, %v1464_v37 }
0x1495   :  { %1909 = vtanh.f32 %v1470_v4 }
0x149b   :  { %v1910_v52 = vpop.eup %1909 }
0x149c   :  { %v1472_v5 = vmul.f32 %v1910_v52, %v1463_v10  ;;  %v1826_v10 = vld [vmem:[%s3144_s11] ss:$0 sm:$0xff] }
0x149e   :  { %1474 = vrot.lane.b32.xlu2 %v1472_v5, %s1979_s20 }
0x14f8   :  { %v1475_v25 = vpop.permute.xlu2 %1474 }
0x14f9   :  { %1477 = vst.msk [vmem:[#allocation3 + $0x28] sm:$0xff] %vm140_vm0, %v1475_v25  ;;  %1799 = vmatmul.msk.f32.vlgmr.msra.gmra.mxu0 %vm281_vm1, %v1475_v25  ;;  %1800 = vmatmul.msk.f32.vlgmr.msra.gmra.mxu1 %vm281_vm1, %v1475_v25 }
0x14fa   :  { %1478 = vst.msk [vmem:[#allocation3 + $0x10] sm:$0xff] %vm359_vm4, %v1475_v25 }
0x1500   :  { %v1634_v58 = vld [vmem:[#allocation3 + $0x28] sm:$0xff] }
0x1501   :  { %v1631_v55 = vld [vmem:[#allocation3 + $0x10] sm:$0xff] }
0x1576   :  { %v1498_v12 = vpop.f32.mrf.mxu0  ;;  %v1518_v14 = vpop.f32.mrf.mxu1 }
0x1577   :  { %v1527_v19 = vadd.f32 %v3156_v17, %v1498_v12  ;;  %v1528_v22 = vadd.f32 %v3157_v20, %v1518_v14 }
0x1579   :  { %1911 = vtanh.f32 %v1527_v19 }
0x157a   :  { %1913 = vtanh.f32 %v1528_v22 }
0x157f   :  { %v1912_v26 = vpop.eup %1911 }
0x1580   :  { %v1914_v28 = vpop.eup %1913  ;;  %v1531_v29 = vmul.f32 %v1912_v26, %v2428_v62 }
0x1581   :  { %v1532_v30 = vmul.f32 %v1914_v28, %v2433_v7 }
0x1582   :  { %v1533_v43 = vadd.f32 %v1531_v29, %v2435_v9 }
0x1583   :  { %v1534_v46 = vadd.f32 %v1532_v30, %v2437_v11 }
0x1584   :  { %v1535_v0 = vmul.f32 %v1533_v43, %v1470_v4 }
0x1585   :  { %v1536_v39 = vmul.f32 %v1534_v46, %v1533_v43 }
0x1587   :  { %1538 = vrot.lane.b32.xlu0 %v1536_v39, %s1979_s20 }
0x15f9   :  { %v1539_v48 = vpop.permute.xlu0 %1538 }
0x15fa   :  { %v1541_v63 = vadd.f32 %v1539_v48, %v1535_v0 }
0x15fc   :  { %1915 = vtanh.f32 %v1541_v63 }
0x1602   :  { %v1916_v40 = vpop.eup %1915 }
0x1603   :  { %v1543_v35 = vmul.f32 %v1916_v40, %v1534_v46 }
0x1605   :  { %1545 = vrot.lane.b32.xlu1 %v1543_v35, %s1979_s20 }
0x160d   :  { %872 = vrot.lane.b32.xlu1 %v2627_v50, %s1979_s20  ;;  %v3158_v50 = vsel %vm2325_vm2, %v2853_v53, %v2849_v36 }
0x1677   :  { %v1546_v60 = vpop.permute.xlu1 %1545 }
0x1678   :  { %1548 = vst.msk [vmem:[#allocation3 + $0x30] sm:$0xff] %vm140_vm0, %v1546_v60  ;;  %1801 = vmatmul.msk.f32.vlgmr.msra.gmra.mxu2 %vm281_vm1, %v1546_v60  ;;  %1802 = vmatmul.msk.f32.vlgmr.msra.gmra.mxu3 %vm281_vm1, %v1546_v60 }
0x1679   :  { %1549 = vst.msk [vmem:[#allocation3 + $0x8] sm:$0xff] %vm359_vm4, %v1546_v60 }
0x167f   :  { %v873_v15 = vpop.permute.xlu1 %872  ;;  %v1635_v8 = vld [vmem:[#allocation3 + $0x30] sm:$0xff] }
0x1680   :  { %875 = vst.msk [vmem:[%s3147_s14] sm:$0xff] %vm281_vm1, %v873_v15  ;;  %v1630_v31 = vld [vmem:[#allocation3 + $0x8] sm:$0xff] }
0x16fb   :  { %v1569_v33 = vpop.f32.mrf.mxu2  ;;  %v1589_v24 = vpop.f32.mrf.mxu3 }
0x16fc   :  { %v1598_v49 = vadd.f32 %v3158_v50, %v1569_v33  ;;  %v1599_v1 = vadd.f32 %v3159_v23, %v1589_v24 }
0x16fe   :  { %1917 = vtanh.f32 %v1598_v49 }
0x16ff   :  { %1919 = vtanh.f32 %v1599_v1 }
0x1704   :  { %v1918_v16 = vpop.eup %1917 }
0x1705   :  { %v1920_v38 = vpop.eup %1919  ;;  %v1602_v57 = vmul.f32 %v1918_v16, %v2428_v62  ;;  %v1644_v62 = vld [vmem:[%s3143_s10 + $0x38] sm:$0xff] }
0x1706   :  { %v1603_v2 = vmul.f32 %v1920_v38, %v2433_v7  ;;  %v1643_v7 = vld [vmem:[%s3143_s10 + $0x30] sm:$0xff]  ;;  %1681 = vmatpush.msrb.mxu0 %v1644_v62 }
0x1707   :  { %v1604_v45 = vadd.f32 %v1602_v57, %v2435_v9  ;;  %v1642_v9 = vld [vmem:[%s3143_s10 + $0x28] sm:$0xff] }
0x1708   :  { %v1605_v18 = vadd.f32 %v1603_v2, %v2437_v11  ;;  %1682 = vmatpush.msrb.mxu0 %v1643_v7  ;;  %v1641_v11 = vld [vmem:[%s3143_s10 + $0x20] sm:$0xff] }
0x1709   :  { %v1606_v13 = vmul.f32 %v1604_v45, %v1541_v63 }
0x170a   :  { %v1607_v36 = vmul.f32 %v1605_v18, %v1604_v45  ;;  %1683 = vmatpush.msrb.mxu0 %v1642_v9 }
0x170c   :  { %1609 = vrot.lane.b32.xlu2 %v1607_v36, %s1979_s20  ;;  %1684 = vmatpush.msrb.mxu0 %v1641_v11 }
0x170e   :  { %1685 = vmatpush.msrb.mxu0 %v1640_v41 }
0x1710   :  { %1686 = vmatpush.msrb.mxu0 %v1639_v54 }
0x1712   :  { %1687 = vmatpush.msrb.mxu0 %v1638_v3 }
0x1714   :  { %1688 = vmatpush.msrb.mxu0 %v1637_v21 }
0x1766   :  { %v1610_v53 = vpop.permute.xlu2 %1609 }
0x1767   :  { %v1612_v6 = vadd.f32 %v1610_v53, %v1606_v13 }
0x1769   :  { %1921 = vtanh.f32 %v1612_v6  ;;  %1624 = vrot.lane.b32.xlu2 %v1612_v6, %s1979_s20 }
0x176f   :  { %v1922_v51 = vpop.eup %1921 }
0x1770   :  { %v1614_v44 = vmul.f32 %v1922_v51, %v1605_v18 }
0x1772   :  { %1616 = vrot.lane.b32.xlu0 %v1614_v44, %s1979_s20 }
0x17c3   :  { %v1625_v59 = vpop.permute.xlu2 %1624 }
0x17c4   :  { %1804 = vst.msk [vmem:[%s3147_s14 + $0x8] sm:$0xff] %vm281_vm1, %v1625_v59 }
0x17e4   :  { %v1617_v47 = vpop.permute.xlu0 %1616 }
0x17e5   :  { %1619 = vst.msk [vmem:[#allocation3 + $0x38] sm:$0xff] %vm140_vm0, %v1617_v47 }
0x17e6   :  { %1620 = vst.msk [vmem:[#allocation3] sm:$0xff] %vm359_vm4, %v1617_v47 }
0x17e7   :  { %1803 = vst.msk [vmem:[%s3146_s13 + $0x8] sm:$0xff] %vm281_vm1, %v1617_v47 }
0x17ec   :  { %v1636_v32 = vld [vmem:[#allocation3 + $0x38] sm:$0xff] }
0x17ed   :  { %v1629_v27 = vld [vmem:[#allocation3] sm:$0xff] }
0x17ee   :  { %1805 = vmatmul.msk.f32.vlgmr.msrb.gmra.mxu0 %vm281_vm1, %v1629_v27 }
0x17f6   :  { %1806 = vmatmul.msk.f32.gmra.mxu0 %vm281_vm1, %v1630_v31 }
0x17fe   :  { %1807 = vmatmul.msk.f32.gmra.mxu0 %vm281_vm1, %v1631_v55 }
0x1806   :  { %1808 = vmatmul.msk.f32.gmra.mxu0 %vm281_vm1, %v1632_v56 }
0x180e   :  { %1809 = vmatmul.msk.f32.gmra.mxu0 %vm281_vm1, %v1633_v34 }
0x1816   :  { %1810 = vmatmul.msk.f32.gmra.mxu0 %vm281_vm1, %v1634_v58 }
0x181e   :  { %1811 = vmatmul.msk.f32.gmra.mxu0 %vm281_vm1, %v1635_v8 }
0x1826   :  { %1812 = vmatmul.msk.f32.gmra.mxu0 %vm281_vm1, %v1636_v32 }
0x186b   :  { %v1690_v42 = vpop.f32.mrf.mxu0 }
0x186c   :  { %v1691_v37 = vadd.f32 %v1826_v10, %v1690_v42 }
0x186e   :  { %1714 = vst [vmem:[%s3145_s12] sm:$0xff] %v1691_v37 }
0x1873   :  { %v1693_v61 = vpop.f32.mrf.mxu0 }
0x1874   :  { %v1694_v4 = vadd.f32 %v1826_v10, %v1693_v61 }
0x1876   :  { %1715 = vst [vmem:[%s3145_s12 + $0x8] sm:$0xff] %v1694_v4 }
0x187b   :  { %v1696_v52 = vpop.f32.mrf.mxu0 }
0x187c   :  { %v1697_v5 = vadd.f32 %v1826_v10, %v1696_v52 }
0x187e   :  { %1716 = vst [vmem:[%s3145_s12 + $0x10] sm:$0xff] %v1697_v5 }
0x1883   :  { %v1699_v25 = vpop.f32.mrf.mxu0 }
0x1884   :  { %v1700_v12 = vadd.f32 %v1826_v10, %v1699_v25 }
0x1886   :  { %1717 = vst [vmem:[%s3145_s12 + $0x18] sm:$0xff] %v1700_v12 }
0x188b   :  { %v1702_v14 = vpop.f32.mrf.mxu0 }
0x188c   :  { %v1703_v17 = vadd.f32 %v1826_v10, %v1702_v14 }
0x188e   :  { %1718 = vst [vmem:[%s3145_s12 + $0x20] sm:$0xff] %v1703_v17 }
0x1893   :  { %v1705_v19 = vpop.f32.mrf.mxu0 }
0x1894   :  { %v1706_v20 = vadd.f32 %v1826_v10, %v1705_v19 }
0x1896   :  { %1719 = vst [vmem:[%s3145_s12 + $0x28] sm:$0xff] %v1706_v20 }
0x189b   :  { %v1708_v22 = vpop.f32.mrf.mxu0 }
0x189c   :  { %v1709_v26 = vadd.f32 %v1826_v10, %v1708_v22 }
0x189e   :  { %1720 = vst [vmem:[%s3145_s12 + $0x30] sm:$0xff] %v1709_v26 }
0x18a3   :  { %v1711_v28 = vpop.f32.mrf.mxu0 }
0x18a4   :  { %v1712_v29 = vadd.f32 %v1826_v10, %v1711_v28 }
0x18a6   :  { %1721 = vst [vmem:[%s3145_s12 + $0x38] sm:$0xff] %v1712_v29 }
0x18a7   :  { %1734 = vsyncpa [#allocation5], 1 }
0x18a8   :  { %1735 = vsyncpa [#allocation7], 1 }

</bundles_post_ra>
